<compile_context>
chip_gen: v7x
topology: tpu7x:2x2x1
jax: 0.10.0
libtpu: 0.0.40
codegen_flags: <defaults>
</compile_context>

<pallas_src>
import jax
import jax.numpy as jnp
import numpy as np
from jax.experimental import pallas as pl
from jax.experimental.pallas import tpu as pltpu


_ACT_DTYPE = jnp.bfloat16     # intermediate-activation / scratch dtype


# ----------------------------------------------------------------------------
# Fused kernel
# ----------------------------------------------------------------------------
def _make_rfb_kernel(H, W, scale, has_shortcut, pad_a, pad_b):
    HW = H * W
    act_dtype = _ACT_DTYPE

    def kernel(*refs):
        x_ref = refs[0]
        (w10, b10, w11, b11, w12, b12, w13, b13,
         w20, b20, w21, b21, w22, b22, w23, b23,
         wla, wlb, bl) = refs[1:20]
        idx = 20
        if has_shortcut:
            ws, bs = refs[idx], refs[idx + 1]
            idx += 2
        o_ref = refs[idx]
        buf_a, buf_b = refs[idx + 1], refs[idx + 2]

        # ---- per-step preamble -------------------------------------------
        # Zero ONLY the border columns of the padded scratch (they provide the
        # vertical zero padding of every tap read).  Tiny ((C, pad) bf16 per
        # side) and megacore-safe, unlike a program_id==0 one-time init.
        c_a, c_b = buf_a.shape[0], buf_b.shape[0]
        zeros_a = jnp.zeros((c_a, pad_a), act_dtype)
        zeros_b = jnp.zeros((c_b, pad_b), act_dtype)
        buf_a[:, pl.ds(0, pad_a)] = zeros_a
        buf_a[:, pl.ds(pad_a + HW, pad_a)] = zeros_a
        buf_b[:, pl.ds(0, pad_b)] = zeros_b
        buf_b[:, pl.ds(pad_b + HW, pad_b)] = zeros_b

        # Hoisted horizontal-padding masks (only dx = +-1, +-3, +-5 are used);
        # built once and reused by every tap of every conv.
        col = jax.lax.broadcasted_iota(jnp.int32, (1, HW), 1) % W
        masks = {}
        for d in (1, 3, 5):
            masks[d] = (col < (W - d)).astype(jnp.float32).astype(act_dtype)
            masks[-d] = (col >= d).astype(jnp.float32).astype(act_dtype)

        def conv1x1(x, w_ref, b_ref, relu):
            """1x1 conv: one MXU dot + bias (+ ReLU).  x: (Cin, HW) bf16."""
            acc = jnp.dot(w_ref[0], x, preferred_element_type=jnp.float32)
            acc = acc + b_ref[...]
            return jnp.maximum(acc, 0.0) if relu else acc

        def taps(x, buf, pad, kh, kw, ph, pw, dil):
            """Write x (as bf16) into the column-padded scratch (borders stay
            zero) and return the kh*kw statically shifted, masked taps."""
            buf[:, pl.ds(pad, HW)] = x.astype(act_dtype)
            out = []
            for i in range(kh):
                for j in range(kw):
                    dy, dx = i * dil - ph, j * dil - pw
                    xs = buf[:, pl.ds(pad + dy * W + dx, HW)]
                    if dx != 0:
                        xs = xs * masks[dx]
                    out.append(xs)
            return out

        def conv(x, w_ref, b_ref, buf, pad, kh, kw, ph, pw, dil, relu):
            """Dense conv (stride 1): one bf16 MXU dot per tap, f32 accum;
            per-tap weight loads keep vreg pressure flat at large C."""
            acc = None
            for t, xs in enumerate(taps(x, buf, pad, kh, kw, ph, pw, dil)):
                y = jnp.dot(w_ref[t], xs, preferred_element_type=jnp.float32)
                acc = y if acc is None else acc + y
            acc = acc + b_ref[...]
            return jnp.maximum(acc, 0.0) if relu else acc

        def sepconv(x, w_ref, b_ref, buf, pad, kh, kw, ph, pw, dil, relu):
            """Depthwise conv (groups == channels): pure VPU, f32 accum."""
            acc = None
            for t, xs in enumerate(taps(x, buf, pad, kh, kw, ph, pw, dil)):
                y = xs * w_ref[t]                    # bf16 * (C,1) f32 -> f32
                acc = y if acc is None else acc + y
            acc = acc + b_ref[...]
            return jnp.maximum(acc, 0.0) if relu else acc

        x = x_ref[0]                                 # (Cin, HW) bf16

        # branch 1: 1x1 -> (1,3) -> (3,1) -> depthwise 3x3 dil=3 (no relu)
        t = conv1x1(x, w10, b10, relu=True)
        t = conv(t, w11, b11, buf_a, pad_a, 1, 3, 0, 1, 1, relu=True)
        t = conv(t, w12, b12, buf_b, pad_b, 3, 1, 1, 0, 1, relu=True)
        x1 = sepconv(t, w13, b13, buf_b, pad_b, 3, 3, 3, 3, 3, relu=False)

        # branch 2: 1x1 -> 3x3 -> 3x3 -> depthwise 3x3 dil=5 (no relu)
        t = conv1x1(x, w20, b20, relu=True)
        t = conv(t, w21, b21, buf_a, pad_a, 3, 3, 1, 1, 1, relu=True)
        t = conv(t, w22, b22, buf_b, pad_b, 3, 3, 1, 1, 1, relu=True)
        x2 = sepconv(t, w23, b23, buf_b, pad_b, 3, 3, 5, 5, 5, relu=False)

        # concat + 1x1 ConvLinear fused as two half-weight matmuls (no relu)
        lin = (jnp.dot(wla[...], x1.astype(jnp.bfloat16),
                       preferred_element_type=jnp.float32)
               + jnp.dot(wlb[...], x2.astype(jnp.bfloat16),
                         preferred_element_type=jnp.float32)
               + bl[...])

        if has_shortcut:
            short = jnp.dot(ws[...], x, preferred_element_type=jnp.float32)
            short = short + bs[...]
        else:
            short = x.astype(jnp.float32)            # identity residual

        # Lane-dense epilogue + store: out block (1, Cout, HW), minor dim = HW
        # (multiple of 128) -> unmasked stores, no wrapper transpose needed.
        o_ref[0] = jnp.maximum(lin * scale + short, 0.0)

    return kernel


# ----------------------------------------------------------------------------
# Public wrapper
# ----------------------------------------------------------------------------
def basic_rfb_forward(x_nchw, params, scale=0.1):
    """BasicRFB forward (inference, stride=1).  x_nchw: (N, C, H, W) float32."""
    N, Cin, H, W = x_nchw.shape
    HW = H * W
    # NCHW is already channels-on-sublanes when flattened: (N, C, H*W).
    x_flat = x_nchw.reshape(N, Cin, HW).astype(_ACT_DTYPE)

    def dense(name):
        w, b = params[name]                          # (kh,kw,ci,co), (co,)
        kh, kw, ci, co = w.shape
        w_t = jnp.transpose(w.reshape(kh * kw, ci, co), (0, 2, 1))
        return w_t.astype(jnp.bfloat16), b.reshape(co, 1).astype(jnp.float32)

    def depthw(name):
        w, b = params[name]                          # (kh,kw,1,c), (c,)
        kh, kw, _, c = w.shape
        w_t = jnp.transpose(w.reshape(kh * kw, 1, c), (0, 2, 1))
        return w_t.astype(jnp.float32), b.reshape(c, 1).astype(jnp.float32)

    w10, b10 = dense("b1_0"); w11, b11 = dense("b1_1"); w12, b12 = dense("b1_2")
    w13, b13 = depthw("b1_3")
    w20, b20 = dense("b2_0"); w21, b21 = dense("b2_1"); w22, b22 = dense("b2_2")
    w23, b23 = depthw("b2_3")

    wl, blin = params["lin"]
    cout = wl.shape[-1]
    c_half = params["b1_3"][0].shape[-1]             # channels of x1 (= ip//2*3)
    wl2d = wl.reshape(wl.shape[2], cout)
    wla = wl2d[:c_half].T.astype(jnp.bfloat16)       # (cout, c_half)
    wlb = wl2d[c_half:].T.astype(jnp.bfloat16)
    bl = blin.reshape(cout, 1).astype(jnp.float32)

    args = [x_flat, w10, b10, w11, b11, w12, b12, w13, b13,
            w20, b20, w21, b21, w22, b22, w23, b23, wla, wlb, bl]

    has_shortcut = "shortcut" in params
    if has_shortcut:
        wsr, bsr = params["shortcut"]
        args += [wsr.reshape(wsr.shape[2], cout).T.astype(jnp.bfloat16),
                 bsr.reshape(cout, 1).astype(jnp.float32)]

    # Column-padded scratch: border per buffer = largest |dy*W + dx| of the
    # convs that use it, rounded to a 128-lane tile so the activation store at
    # offset `pad` stays lane-aligned.  The zeroed borders ARE the vertical
    # padding, so every tap offset must fit inside them (static assert).
    c_a = params["b1_0"][0].shape[-1]                # inter_planes
    c_b = c_half                                     # inter_planes // 2 * 3
    max_off_a = W + 1                                # 3x3, pad=1  (b2_1)
    max_off_b = 5 * W + 5                            # depthwise 3x3, dil=5, pad=5
    pad_a = max(128, -(-max_off_a // 128) * 128)
    pad_b = max(128, -(-max_off_b // 128) * 128)
    assert max_off_a <= pad_a and max_off_b <= pad_b, "tap outside zeroed border"

    def full_spec(a):
        nd = a.ndim
        return pl.BlockSpec(a.shape, lambda n, _nd=nd: (0,) * _nd)

    in_specs = ([pl.BlockSpec((1, Cin, HW), lambda n: (n, 0, 0))]
                + [full_spec(a) for a in args[1:]])

    out_flat = pl.pallas_call(
        _make_rfb_kernel(H, W, scale, has_shortcut, pad_a, pad_b),
        out_shape=jax.ShapeDtypeStruct((N, cout, HW), jnp.float32),
        grid=(N,),
        in_specs=in_specs,
        out_specs=pl.BlockSpec((1, cout, HW), lambda n: (n, 0, 0)),
        scratch_shapes=[pltpu.VMEM((c_a, 2 * pad_a + HW), _ACT_DTYPE),
                        pltpu.VMEM((c_b, 2 * pad_b + HW), _ACT_DTYPE)],
        compiler_params=pltpu.CompilerParams(
            dimension_semantics=("parallel",),
            vmem_limit_bytes=32 * 1024 * 1024),      # explicit budget (v7x: 64 MiB/TC)
    )(*args)

    # No transpose: the kernel already produced NCHW-flat output.
    return out_flat.reshape(N, cout, H, W)


# ----------------------------------------------------------------------------
# Parameter init (deterministic, synthetic) + BN folding
# ----------------------------------------------------------------------------
def _fold_bn(w, gamma, beta, mean, var, eps=1e-5):
    s = gamma / jnp.sqrt(var + eps)
    return w * s, beta - mean * s


def _init_conv_bn(key, kh, kw, cin, cout, depthwise=False):
    k = jax.random.split(key, 5)
    shape = (kh, kw, 1, cout) if depthwise else (kh, kw, cin, cout)
    fan_in = kh * kw * (1 if depthwise else cin)
    w = jax.random.normal(k[0], shape, jnp.float32) / np.sqrt(fan_in)
    gamma = 1.0 + 0.1 * jax.random.normal(k[1], (cout,), jnp.float32)
    beta = 0.1 * jax.random.normal(k[2], (cout,), jnp.float32)
    mean = 0.1 * jax.random.normal(k[3], (cout,), jnp.float32)
    var = jax.random.uniform(k[4], (cout,), jnp.float32, minval=0.5, maxval=1.5)
    return _fold_bn(w, gamma, beta, mean, var)


def init_basic_rfb_params(key, in_planes, out_planes):
    assert in_planes % 16 == 0, "need even inter_planes so 3*inter == 2*(inter//2*3)"
    inter = in_planes // 8
    ip3 = inter // 2 * 3
    keys = jax.random.split(key, 10)
    p = {}
    p["b1_0"] = _init_conv_bn(keys[0], 1, 1, in_planes, inter)
    p["b1_1"] = _init_conv_bn(keys[1], 1, 3, inter, ip3)
    p["b1_2"] = _init_conv_bn(keys[2], 3, 1, ip3, ip3)
    p["b1_3"] = _init_conv_bn(keys[3], 3, 3, ip3, ip3, depthwise=True)
    p["b2_0"] = _init_conv_bn(keys[4], 1, 1, in_planes, inter)
    p["b2_1"] = _init_conv_bn(keys[5], 3, 3, inter, ip3)
    p["b2_2"] = _init_conv_bn(keys[6], 3, 3, ip3, ip3)
    p["b2_3"] = _init_conv_bn(keys[7], 3, 3, ip3, ip3, depthwise=True)
    p["lin"] = _init_conv_bn(keys[8], 1, 1, 3 * inter, out_planes)
    if in_planes != out_planes:
        p["shortcut"] = _init_conv_bn(keys[9], 1, 1, in_planes, out_planes)
    return p


# ----------------------------------------------------------------------------
# Pure-JAX reference (correctness check only, f32 HIGHEST)
# ----------------------------------------------------------------------------
def _ref_conv(x, w, b, padding, dilation, relu, groups=1):
    y = jax.lax.conv_general_dilated(
        x, w, window_strides=(1, 1),
        padding=((padding[0], padding[0]), (padding[1], padding[1])),
        rhs_dilation=dilation,
        dimension_numbers=("NHWC", "HWIO", "NHWC"),
        feature_group_count=groups,
        precision=jax.lax.Precision.HIGHEST)
    y = y + b
    return jnp.maximum(y, 0.0) if relu else y


def _ref_forward(x_nchw, params, scale=0.1):
    x = jnp.transpose(x_nchw, (0, 2, 3, 1)).astype(jnp.float32)
    t = _ref_conv(x, *params["b1_0"], (0, 0), (1, 1), True)
    t = _ref_conv(t, *params["b1_1"], (0, 1), (1, 1), True)
    t = _ref_conv(t, *params["b1_2"], (1, 0), (1, 1), True)
    x1 = _ref_conv(t, *params["b1_3"], (3, 3), (3, 3), False, groups=t.shape[-1])
    t = _ref_conv(x, *params["b2_0"], (0, 0), (1, 1), True)
    t = _ref_conv(t, *params["b2_1"], (1, 1), (1, 1), True)
    t = _ref_conv(t, *params["b2_2"], (1, 1), (1, 1), True)
    x2 = _ref_conv(t, *params["b2_3"], (5, 5), (5, 5), False, groups=t.shape[-1])
    cat = jnp.concatenate([x1, x2], axis=-1)
    out = _ref_conv(cat, *params["lin"], (0, 0), (1, 1), False)
    short = x if "shortcut" not in params else _ref_conv(
        x, *params["shortcut"], (0, 0), (1, 1), False)
    out = jnp.maximum(out * scale + short, 0.0)
    return jnp.transpose(out, (0, 3, 1, 2))


if __name__ == "__main__":
    key = jax.random.PRNGKey(0)
    kx, kp1, kp2 = jax.random.split(key, 3)

    N, H, W = 2, 16, 16
    C = 32                      # in_planes -> inter_planes = 4

    x = jax.random.normal(kx, (N, C, H, W), jnp.float32)

    # Tolerance: deliberate bf16 activation / matmul path vs f32 HIGHEST ref.
    TOL = 3e-2

    # Case 1: in_planes == out_planes -> identity shortcut.
    params = init_basic_rfb_params(kp1, in_planes=C, out_planes=C)
    out = jax.block_until_ready(basic_rfb_forward(x, params, scale=0.1))
    assert out.shape == (N, C, H, W)
    ref = _ref_forward(x, params, scale=0.1)
    np.testing.assert_allclose(np.asarray(out), np.asarray(ref),
                               atol=TOL, rtol=TOL)

    # Case 2: in_planes != out_planes -> 1x1 shortcut conv.
    C_out = 16
    params2 = init_basic_rfb_params(kp2, in_planes=C, out_planes=C_out)
    out2 = jax.block_until_ready(basic_rfb_forward(x, params2, scale=0.1))
    assert out2.shape == (N, C_out, H, W)
    ref2 = _ref_forward(x, params2, scale=0.1)
    np.testing.assert_allclose(np.asarray(out2), np.asarray(ref2),
                               atol=TOL, rtol=TOL)

    print("KERNEL_OK")
</pallas_src>

<mosaic_0001>
module attributes {stable_mosaic.version = 11 : i64} {
  func.func @kernel(%arg0: i32, %arg1: memref<1x32x256xbf16, #tpu.memory_space<vmem>>, %arg2: memref<1x4x32xbf16, #tpu.memory_space<vmem>>, %arg3: memref<4x1xf32, #tpu.memory_space<vmem>>, %arg4: memref<3x6x4xbf16, #tpu.memory_space<vmem>>, %arg5: memref<6x1xf32, #tpu.memory_space<vmem>>, %arg6: memref<3x6x6xbf16, #tpu.memory_space<vmem>>, %arg7: memref<6x1xf32, #tpu.memory_space<vmem>>, %arg8: memref<9x6x1xf32, #tpu.memory_space<vmem>>, %arg9: memref<6x1xf32, #tpu.memory_space<vmem>>, %arg10: memref<1x4x32xbf16, #tpu.memory_space<vmem>>, %arg11: memref<4x1xf32, #tpu.memory_space<vmem>>, %arg12: memref<9x6x4xbf16, #tpu.memory_space<vmem>>, %arg13: memref<6x1xf32, #tpu.memory_space<vmem>>, %arg14: memref<9x6x6xbf16, #tpu.memory_space<vmem>>, %arg15: memref<6x1xf32, #tpu.memory_space<vmem>>, %arg16: memref<9x6x1xf32, #tpu.memory_space<vmem>>, %arg17: memref<6x1xf32, #tpu.memory_space<vmem>>, %arg18: memref<32x6xbf16, #tpu.memory_space<vmem>>, %arg19: memref<32x6xbf16, #tpu.memory_space<vmem>>, %arg20: memref<32x1xf32, #tpu.memory_space<vmem>>, %arg21: memref<1x32x256xf32, #tpu.memory_space<vmem>>, %arg22: memref<4x512xbf16, #tpu.memory_space<vmem>>, %arg23: memref<6x512xbf16, #tpu.memory_space<vmem>>) attributes {dimension_semantics = [#tpu.dimension_semantics<parallel>], iteration_bounds = array<i64: 2>, scalar_prefetch = 0 : i64, scratch_operands = 2 : i64, tpu.core_type = #tpu.core_type<tc>, window_params = [{transform_indices = @transform_0, window_bounds = array<i64: 1, 32, 256>}, {pipeline_mode = #tpu.pipeline_mode<synchronous>, transform_indices = @transform_1, window_bounds = array<i64: 1, 4, 32>}, {pipeline_mode = #tpu.pipeline_mode<synchronous>, transform_indices = @transform_2, window_bounds = array<i64: 4, 1>}, {pipeline_mode = #tpu.pipeline_mode<synchronous>, transform_indices = @transform_3, window_bounds = array<i64: 3, 6, 4>}, {pipeline_mode = #tpu.pipeline_mode<synchronous>, transform_indices = @transform_4, window_bounds = array<i64: 6, 1>}, {pipeline_mode = #tpu.pipeline_mode<synchronous>, transform_indices = @transform_5, window_bounds = array<i64: 3, 6, 6>}, {pipeline_mode = #tpu.pipeline_mode<synchronous>, transform_indices = @transform_6, window_bounds = array<i64: 6, 1>}, {pipeline_mode = #tpu.pipeline_mode<synchronous>, transform_indices = @transform_7, window_bounds = array<i64: 9, 6, 1>}, {pipeline_mode = #tpu.pipeline_mode<synchronous>, transform_indices = @transform_8, window_bounds = array<i64: 6, 1>}, {pipeline_mode = #tpu.pipeline_mode<synchronous>, transform_indices = @transform_9, window_bounds = array<i64: 1, 4, 32>}, {pipeline_mode = #tpu.pipeline_mode<synchronous>, transform_indices = @transform_10, window_bounds = array<i64: 4, 1>}, {pipeline_mode = #tpu.pipeline_mode<synchronous>, transform_indices = @transform_11, window_bounds = array<i64: 9, 6, 4>}, {pipeline_mode = #tpu.pipeline_mode<synchronous>, transform_indices = @transform_12, window_bounds = array<i64: 6, 1>}, {pipeline_mode = #tpu.pipeline_mode<synchronous>, transform_indices = @transform_13, window_bounds = array<i64: 9, 6, 6>}, {pipeline_mode = #tpu.pipeline_mode<synchronous>, transform_indices = @transform_14, window_bounds = array<i64: 6, 1>}, {pipeline_mode = #tpu.pipeline_mode<synchronous>, transform_indices = @transform_15, window_bounds = array<i64: 9, 6, 1>}, {pipeline_mode = #tpu.pipeline_mode<synchronous>, transform_indices = @transform_16, window_bounds = array<i64: 6, 1>}, {pipeline_mode = #tpu.pipeline_mode<synchronous>, transform_indices = @transform_17, window_bounds = array<i64: 32, 6>}, {pipeline_mode = #tpu.pipeline_mode<synchronous>, transform_indices = @transform_18, window_bounds = array<i64: 32, 6>}, {pipeline_mode = #tpu.pipeline_mode<synchronous>, transform_indices = @transform_19, window_bounds = array<i64: 32, 1>}, {transform_indices = @transform_20, window_bounds = array<i64: 1, 32, 256>}]} {
    %cst = arith.constant 0.000000e+00 : bf16
    %0 = vector.broadcast %cst : bf16 to vector<4x128xbf16>
    %cst_0 = arith.constant 0.000000e+00 : bf16
    %1 = vector.broadcast %cst_0 : bf16 to vector<6x128xbf16>
    %c0 = arith.constant 0 : index
    %c0_1 = arith.constant 0 : index
    %2 = vector.load %arg22[%c0, %c0_1] : memref<4x512xbf16, #tpu.memory_space<vmem>>, vector<4x128xbf16>
    tpu.vector_store %arg22[%c0, %c0_1], %0 {strides = array<i32>} : memref<4x512xbf16, #tpu.memory_space<vmem>>, vector<4x128xbf16>,
    %c0_2 = arith.constant 0 : index
    %c384 = arith.constant 384 : index
    %3 = vector.load %arg22[%c0_2, %c384] : memref<4x512xbf16, #tpu.memory_space<vmem>>, vector<4x128xbf16>
    tpu.vector_store %arg22[%c0_2, %c384], %0 {strides = array<i32>} : memref<4x512xbf16, #tpu.memory_space<vmem>>, vector<4x128xbf16>,
    %c0_3 = arith.constant 0 : index
    %c0_4 = arith.constant 0 : index
    %4 = vector.load %arg23[%c0_3, %c0_4] : memref<6x512xbf16, #tpu.memory_space<vmem>>, vector<6x128xbf16>
    tpu.vector_store %arg23[%c0_3, %c0_4], %1 {strides = array<i32>} : memref<6x512xbf16, #tpu.memory_space<vmem>>, vector<6x128xbf16>,
    %c0_5 = arith.constant 0 : index
    %c384_6 = arith.constant 384 : index
    %5 = vector.load %arg23[%c0_5, %c384_6] : memref<6x512xbf16, #tpu.memory_space<vmem>>, vector<6x128xbf16>
    tpu.vector_store %arg23[%c0_5, %c384_6], %1 {strides = array<i32>} : memref<6x512xbf16, #tpu.memory_space<vmem>>, vector<6x128xbf16>,
    %6 = tpu.iota {dimensions = array<i32: 1>} : vector<1x256xi32>
    %c16_i32 = arith.constant 16 : i32
    %c0_i32 = arith.constant 0 : i32
    %7 = arith.cmpi eq, %c16_i32, %c0_i32 : i32
    %c1_i32 = arith.constant 1 : i32
    %8 = arith.select %7, %c1_i32, %c16_i32 : i32
    %9 = vector.broadcast %8 : i32 to vector<1x256xi32>
    %10 = arith.remsi %6, %9 : vector<1x256xi32>
    %c0_i32_7 = arith.constant 0 : i32
    %11 = vector.broadcast %c0_i32_7 : i32 to vector<1x256xi32>
    %12 = arith.cmpi ne, %10, %11 : vector<1x256xi32>
    %c0_i32_8 = arith.constant 0 : i32
    %13 = vector.broadcast %c0_i32_8 : i32 to vector<1x256xi32>
    %14 = arith.cmpi slt, %10, %13 : vector<1x256xi32>
    %c0_i32_9 = arith.constant 0 : i32
    %15 = arith.cmpi slt, %8, %c0_i32_9 : i32
    %16 = vector.broadcast %15 : i1 to vector<1x256xi1>
    %17 = vector.broadcast %16 : vector<1x256xi1> to vector<1x256xi1>
    %18 = arith.xori %14, %17 : vector<1x256xi1>
    %19 = arith.andi %18, %12 : vector<1x256xi1>
    %20 = vector.broadcast %8 : i32 to vector<1x256xi32>
    %21 = arith.addi %10, %20 : vector<1x256xi32>
    %22 = arith.select %19, %21, %10 : vector<1x256xi1>, vector<1x256xi32>
    %c15_i32 = arith.constant 15 : i32
    %23 = vector.broadcast %c15_i32 : i32 to vector<1x256xi32>
    %24 = arith.cmpi slt, %22, %23 : vector<1x256xi32>
    %25 = arith.extui %24 : vector<1x256xi1> to vector<1x256xi32>
    %26 = arith.sitofp %25 : vector<1x256xi32> to vector<1x256xf32>
    %27 = arith.truncf %26 : vector<1x256xf32> to vector<1x256xbf16>
    %c1_i32_10 = arith.constant 1 : i32
    %28 = vector.broadcast %c1_i32_10 : i32 to vector<1x256xi32>
    %29 = arith.cmpi sge, %22, %28 : vector<1x256xi32>
    %30 = arith.extui %29 : vector<1x256xi1> to vector<1x256xi32>
    %31 = arith.sitofp %30 : vector<1x256xi32> to vector<1x256xf32>
    %32 = arith.truncf %31 : vector<1x256xf32> to vector<1x256xbf16>
    %c13_i32 = arith.constant 13 : i32
    %33 = vector.broadcast %c13_i32 : i32 to vector<1x256xi32>
    %34 = arith.cmpi slt, %22, %33 : vector<1x256xi32>
    %35 = arith.extui %34 : vector<1x256xi1> to vector<1x256xi32>
    %36 = arith.sitofp %35 : vector<1x256xi32> to vector<1x256xf32>
    %37 = arith.truncf %36 : vector<1x256xf32> to vector<1x256xbf16>
    %c3_i32 = arith.constant 3 : i32
    %38 = vector.broadcast %c3_i32 : i32 to vector<1x256xi32>
    %39 = arith.cmpi sge, %22, %38 : vector<1x256xi32>
    %40 = arith.extui %39 : vector<1x256xi1> to vector<1x256xi32>
    %41 = arith.sitofp %40 : vector<1x256xi32> to vector<1x256xf32>
    %42 = arith.truncf %41 : vector<1x256xf32> to vector<1x256xbf16>
    %c11_i32 = arith.constant 11 : i32
    %43 = vector.broadcast %c11_i32 : i32 to vector<1x256xi32>
    %44 = arith.cmpi slt, %22, %43 : vector<1x256xi32>
    %45 = arith.extui %44 : vector<1x256xi1> to vector<1x256xi32>
    %46 = arith.sitofp %45 : vector<1x256xi32> to vector<1x256xf32>
    %47 = arith.truncf %46 : vector<1x256xf32> to vector<1x256xbf16>
    %c5_i32 = arith.constant 5 : i32
    %48 = vector.broadcast %c5_i32 : i32 to vector<1x256xi32>
    %49 = arith.cmpi sge, %22, %48 : vector<1x256xi32>
    %50 = arith.extui %49 : vector<1x256xi1> to vector<1x256xi32>
    %51 = arith.sitofp %50 : vector<1x256xi32> to vector<1x256xf32>
    %52 = arith.truncf %51 : vector<1x256xf32> to vector<1x256xbf16>
    %c0_11 = arith.constant 0 : index
    %c0_12 = arith.constant 0 : index
    %c0_13 = arith.constant 0 : index
    %53 = vector.load %arg1[%c0_11, %c0_12, %c0_13] : memref<1x32x256xbf16, #tpu.memory_space<vmem>>, vector<1x32x256xbf16>
    %54 = vector.shape_cast %53 : vector<1x32x256xbf16> to vector<32x256xbf16>
    %c0_14 = arith.constant 0 : index
    %c0_15 = arith.constant 0 : index
    %c0_16 = arith.constant 0 : index
    %55 = vector.load %arg2[%c0_14, %c0_15, %c0_16] : memref<1x4x32xbf16, #tpu.memory_space<vmem>>, vector<1x4x32xbf16>
    %56 = vector.shape_cast %55 : vector<1x4x32xbf16> to vector<4x32xbf16>
    %cst_17 = arith.constant dense<0.000000e+00> : vector<4x256xf32>
    %57 = tpu.matmul %56, %54, %cst_17 {dimension_numbers = #tpu.dot_dimension_numbers<[1], [0], [0], [1], [0, 0, 1, 1], [], []>} : vector<4x32xbf16>, vector<32x256xbf16>, vector<4x256xf32> -> vector<4x256xf32>
    %c0_18 = arith.constant 0 : index
    %c0_19 = arith.constant 0 : index
    %58 = vector.load %arg3[%c0_18, %c0_19] : memref<4x1xf32, #tpu.memory_space<vmem>>, vector<4x1xf32>
    %59 = vector.broadcast %58 : vector<4x1xf32> to vector<4x256xf32>
    %60 = arith.addf %57, %59 : vector<4x256xf32>
    %cst_20 = arith.constant 0.000000e+00 : f32
    %61 = vector.broadcast %cst_20 : f32 to vector<4x256xf32>
    %62 = arith.maximumf %60, %61 : vector<4x256xf32>
    %63 = arith.truncf %62 : vector<4x256xf32> to vector<4x256xbf16>
    %c0_21 = arith.constant 0 : index
    %c128 = arith.constant 128 : index
    %64 = vector.load %arg22[%c0_21, %c128] : memref<4x512xbf16, #tpu.memory_space<vmem>>, vector<4x256xbf16>
    tpu.vector_store %arg22[%c0_21, %c128], %63 {strides = array<i32>} : memref<4x512xbf16, #tpu.memory_space<vmem>>, vector<4x256xbf16>,
    %c0_22 = arith.constant 0 : index
    %c127 = arith.constant 127 : index
    %65 = vector.load %arg22[%c0_22, %c127] : memref<4x512xbf16, #tpu.memory_space<vmem>>, vector<4x256xbf16>
    %66 = vector.broadcast %32 : vector<1x256xbf16> to vector<4x256xbf16>
    %67 = arith.mulf %65, %66 : vector<4x256xbf16>
    %c0_23 = arith.constant 0 : index
    %c128_24 = arith.constant 128 : index
    %68 = vector.load %arg22[%c0_23, %c128_24] : memref<4x512xbf16, #tpu.memory_space<vmem>>, vector<4x256xbf16>
    %c0_25 = arith.constant 0 : index
    %c129 = arith.constant 129 : index
    %69 = vector.load %arg22[%c0_25, %c129] : memref<4x512xbf16, #tpu.memory_space<vmem>>, vector<4x256xbf16>
    %70 = vector.broadcast %27 : vector<1x256xbf16> to vector<4x256xbf16>
    %71 = arith.mulf %69, %70 : vector<4x256xbf16>
    %c0_26 = arith.constant 0 : index
    %c0_27 = arith.constant 0 : index
    %c0_28 = arith.constant 0 : index
    %72 = vector.load %arg4[%c0_26, %c0_27, %c0_28] : memref<3x6x4xbf16, #tpu.memory_space<vmem>>, vector<1x6x4xbf16>
    %73 = vector.shape_cast %72 : vector<1x6x4xbf16> to vector<6x4xbf16>
    %cst_29 = arith.constant dense<0.000000e+00> : vector<6x256xf32>
    %74 = tpu.matmul %73, %67, %cst_29 {dimension_numbers = #tpu.dot_dimension_numbers<[1], [0], [0], [1], [0, 0, 1, 1], [], []>} : vector<6x4xbf16>, vector<4x256xbf16>, vector<6x256xf32> -> vector<6x256xf32>
    %c1 = arith.constant 1 : index
    %c0_30 = arith.constant 0 : index
    %c0_31 = arith.constant 0 : index
    %75 = vector.load %arg4[%c1, %c0_30, %c0_31] : memref<3x6x4xbf16, #tpu.memory_space<vmem>>, vector<1x6x4xbf16>
    %76 = vector.shape_cast %75 : vector<1x6x4xbf16> to vector<6x4xbf16>
    %cst_32 = arith.constant dense<0.000000e+00> : vector<6x256xf32>
    %77 = tpu.matmul %76, %68, %cst_32 {dimension_numbers = #tpu.dot_dimension_numbers<[1], [0], [0], [1], [0, 0, 1, 1], [], []>} : vector<6x4xbf16>, vector<4x256xbf16>, vector<6x256xf32> -> vector<6x256xf32>
    %78 = arith.addf %74, %77 : vector<6x256xf32>
    %c2 = arith.constant 2 : index
    %c0_33 = arith.constant 0 : index
    %c0_34 = arith.constant 0 : index
    %79 = vector.load %arg4[%c2, %c0_33, %c0_34] : memref<3x6x4xbf16, #tpu.memory_space<vmem>>, vector<1x6x4xbf16>
    %80 = vector.shape_cast %79 : vector<1x6x4xbf16> to vector<6x4xbf16>
    %cst_35 = arith.constant dense<0.000000e+00> : vector<6x256xf32>
    %81 = tpu.matmul %80, %71, %cst_35 {dimension_numbers = #tpu.dot_dimension_numbers<[1], [0], [0], [1], [0, 0, 1, 1], [], []>} : vector<6x4xbf16>, vector<4x256xbf16>, vector<6x256xf32> -> vector<6x256xf32>
    %82 = arith.addf %78, %81 : vector<6x256xf32>
    %c0_36 = arith.constant 0 : index
    %c0_37 = arith.constant 0 : index
    %83 = vector.load %arg5[%c0_36, %c0_37] : memref<6x1xf32, #tpu.memory_space<vmem>>, vector<6x1xf32>
    %84 = vector.broadcast %83 : vector<6x1xf32> to vector<6x256xf32>
    %85 = arith.addf %82, %84 : vector<6x256xf32>
    %cst_38 = arith.constant 0.000000e+00 : f32
    %86 = vector.broadcast %cst_38 : f32 to vector<6x256xf32>
    %87 = arith.maximumf %85, %86 : vector<6x256xf32>
    %88 = arith.truncf %87 : vector<6x256xf32> to vector<6x256xbf16>
    %c0_39 = arith.constant 0 : index
    %c128_40 = arith.constant 128 : index
    %89 = vector.load %arg23[%c0_39, %c128_40] : memref<6x512xbf16, #tpu.memory_space<vmem>>, vector<6x256xbf16>
    tpu.vector_store %arg23[%c0_39, %c128_40], %88 {strides = array<i32>} : memref<6x512xbf16, #tpu.memory_space<vmem>>, vector<6x256xbf16>,
    %c0_41 = arith.constant 0 : index
    %c112 = arith.constant 112 : index
    %90 = vector.load %arg23[%c0_41, %c112] : memref<6x512xbf16, #tpu.memory_space<vmem>>, vector<6x256xbf16>
    %c0_42 = arith.constant 0 : index
    %c128_43 = arith.constant 128 : index
    %91 = vector.load %arg23[%c0_42, %c128_43] : memref<6x512xbf16, #tpu.memory_space<vmem>>, vector<6x256xbf16>
    %c0_44 = arith.constant 0 : index
    %c144 = arith.constant 144 : index
    %92 = vector.load %arg23[%c0_44, %c144] : memref<6x512xbf16, #tpu.memory_space<vmem>>, vector<6x256xbf16>
    %c0_45 = arith.constant 0 : index
    %c0_46 = arith.constant 0 : index
    %c0_47 = arith.constant 0 : index
    %93 = vector.load %arg6[%c0_45, %c0_46, %c0_47] : memref<3x6x6xbf16, #tpu.memory_space<vmem>>, vector<1x6x6xbf16>
    %94 = vector.shape_cast %93 : vector<1x6x6xbf16> to vector<6x6xbf16>
    %cst_48 = arith.constant dense<0.000000e+00> : vector<6x256xf32>
    %95 = tpu.matmul %94, %90, %cst_48 {dimension_numbers = #tpu.dot_dimension_numbers<[1], [0], [0], [1], [0, 0, 1, 1], [], []>} : vector<6x6xbf16>, vector<6x256xbf16>, vector<6x256xf32> -> vector<6x256xf32>
    %c1_49 = arith.constant 1 : index
    %c0_50 = arith.constant 0 : index
    %c0_51 = arith.constant 0 : index
    %96 = vector.load %arg6[%c1_49, %c0_50, %c0_51] : memref<3x6x6xbf16, #tpu.memory_space<vmem>>, vector<1x6x6xbf16>
    %97 = vector.shape_cast %96 : vector<1x6x6xbf16> to vector<6x6xbf16>
    %cst_52 = arith.constant dense<0.000000e+00> : vector<6x256xf32>
    %98 = tpu.matmul %97, %91, %cst_52 {dimension_numbers = #tpu.dot_dimension_numbers<[1], [0], [0], [1], [0, 0, 1, 1], [], []>} : vector<6x6xbf16>, vector<6x256xbf16>, vector<6x256xf32> -> vector<6x256xf32>
    %99 = arith.addf %95, %98 : vector<6x256xf32>
    %c2_53 = arith.constant 2 : index
    %c0_54 = arith.constant 0 : index
    %c0_55 = arith.constant 0 : index
    %100 = vector.load %arg6[%c2_53, %c0_54, %c0_55] : memref<3x6x6xbf16, #tpu.memory_space<vmem>>, vector<1x6x6xbf16>
    %101 = vector.shape_cast %100 : vector<1x6x6xbf16> to vector<6x6xbf16>
    %cst_56 = arith.constant dense<0.000000e+00> : vector<6x256xf32>
    %102 = tpu.matmul %101, %92, %cst_56 {dimension_numbers = #tpu.dot_dimension_numbers<[1], [0], [0], [1], [0, 0, 1, 1], [], []>} : vector<6x6xbf16>, vector<6x256xbf16>, vector<6x256xf32> -> vector<6x256xf32>
    %103 = arith.addf %99, %102 : vector<6x256xf32>
    %c0_57 = arith.constant 0 : index
    %c0_58 = arith.constant 0 : index
    %104 = vector.load %arg7[%c0_57, %c0_58] : memref<6x1xf32, #tpu.memory_space<vmem>>, vector<6x1xf32>
    %105 = vector.broadcast %104 : vector<6x1xf32> to vector<6x256xf32>
    %106 = arith.addf %103, %105 : vector<6x256xf32>
    %cst_59 = arith.constant 0.000000e+00 : f32
    %107 = vector.broadcast %cst_59 : f32 to vector<6x256xf32>
    %108 = arith.maximumf %106, %107 : vector<6x256xf32>
    %109 = arith.truncf %108 : vector<6x256xf32> to vector<6x256xbf16>
    %c0_60 = arith.constant 0 : index
    %c128_61 = arith.constant 128 : index
    %110 = vector.load %arg23[%c0_60, %c128_61] : memref<6x512xbf16, #tpu.memory_space<vmem>>, vector<6x256xbf16>
    tpu.vector_store %arg23[%c0_60, %c128_61], %109 {strides = array<i32>} : memref<6x512xbf16, #tpu.memory_space<vmem>>, vector<6x256xbf16>,
    %c0_62 = arith.constant 0 : index
    %c77 = arith.constant 77 : index
    %111 = vector.load %arg23[%c0_62, %c77] : memref<6x512xbf16, #tpu.memory_space<vmem>>, vector<6x256xbf16>
    %112 = vector.broadcast %42 : vector<1x256xbf16> to vector<6x256xbf16>
    %113 = arith.mulf %111, %112 : vector<6x256xbf16>
    %c0_63 = arith.constant 0 : index
    %c80 = arith.constant 80 : index
    %114 = vector.load %arg23[%c0_63, %c80] : memref<6x512xbf16, #tpu.memory_space<vmem>>, vector<6x256xbf16>
    %c0_64 = arith.constant 0 : index
    %c83 = arith.constant 83 : index
    %115 = vector.load %arg23[%c0_64, %c83] : memref<6x512xbf16, #tpu.memory_space<vmem>>, vector<6x256xbf16>
    %116 = vector.broadcast %37 : vector<1x256xbf16> to vector<6x256xbf16>
    %117 = arith.mulf %115, %116 : vector<6x256xbf16>
    %c0_65 = arith.constant 0 : index
    %c125 = arith.constant 125 : index
    %118 = vector.load %arg23[%c0_65, %c125] : memref<6x512xbf16, #tpu.memory_space<vmem>>, vector<6x256xbf16>
    %119 = vector.broadcast %42 : vector<1x256xbf16> to vector<6x256xbf16>
    %120 = arith.mulf %118, %119 : vector<6x256xbf16>
    %c0_66 = arith.constant 0 : index
    %c128_67 = arith.constant 128 : index
    %121 = vector.load %arg23[%c0_66, %c128_67] : memref<6x512xbf16, #tpu.memory_space<vmem>>, vector<6x256xbf16>
    %c0_68 = arith.constant 0 : index
    %c131 = arith.constant 131 : index
    %122 = vector.load %arg23[%c0_68, %c131] : memref<6x512xbf16, #tpu.memory_space<vmem>>, vector<6x256xbf16>
    %123 = vector.broadcast %37 : vector<1x256xbf16> to vector<6x256xbf16>
    %124 = arith.mulf %122, %123 : vector<6x256xbf16>
    %c0_69 = arith.constant 0 : index
    %c173 = arith.constant 173 : index
    %125 = vector.load %arg23[%c0_69, %c173] : memref<6x512xbf16, #tpu.memory_space<vmem>>, vector<6x256xbf16>
    %126 = vector.broadcast %42 : vector<1x256xbf16> to vector<6x256xbf16>
    %127 = arith.mulf %125, %126 : vector<6x256xbf16>
    %c0_70 = arith.constant 0 : index
    %c176 = arith.constant 176 : index
    %128 = vector.load %arg23[%c0_70, %c176] : memref<6x512xbf16, #tpu.memory_space<vmem>>, vector<6x256xbf16>
    %c0_71 = arith.constant 0 : index
    %c179 = arith.constant 179 : index
    %129 = vector.load %arg23[%c0_71, %c179] : memref<6x512xbf16, #tpu.memory_space<vmem>>, vector<6x256xbf16>
    %130 = vector.broadcast %37 : vector<1x256xbf16> to vector<6x256xbf16>
    %131 = arith.mulf %129, %130 : vector<6x256xbf16>
    %c0_72 = arith.constant 0 : index
    %c0_73 = arith.constant 0 : index
    %c0_74 = arith.constant 0 : index
    %132 = vector.load %arg8[%c0_72, %c0_73, %c0_74] : memref<9x6x1xf32, #tpu.memory_space<vmem>>, vector<1x6x1xf32>
    %133 = vector.shape_cast %132 : vector<1x6x1xf32> to vector<6x1xf32>
    %134 = arith.extf %113 : vector<6x256xbf16> to vector<6x256xf32>
    %135 = vector.broadcast %133 : vector<6x1xf32> to vector<6x256xf32>
    %136 = arith.mulf %134, %135 : vector<6x256xf32>
    %c1_75 = arith.constant 1 : index
    %c0_76 = arith.constant 0 : index
    %c0_77 = arith.constant 0 : index
    %137 = vector.load %arg8[%c1_75, %c0_76, %c0_77] : memref<9x6x1xf32, #tpu.memory_space<vmem>>, vector<1x6x1xf32>
    %138 = vector.shape_cast %137 : vector<1x6x1xf32> to vector<6x1xf32>
    %139 = arith.extf %114 : vector<6x256xbf16> to vector<6x256xf32>
    %140 = vector.broadcast %138 : vector<6x1xf32> to vector<6x256xf32>
    %141 = arith.mulf %139, %140 : vector<6x256xf32>
    %142 = arith.addf %136, %141 : vector<6x256xf32>
    %c2_78 = arith.constant 2 : index
    %c0_79 = arith.constant 0 : index
    %c0_80 = arith.constant 0 : index
    %143 = vector.load %arg8[%c2_78, %c0_79, %c0_80] : memref<9x6x1xf32, #tpu.memory_space<vmem>>, vector<1x6x1xf32>
    %144 = vector.shape_cast %143 : vector<1x6x1xf32> to vector<6x1xf32>
    %145 = arith.extf %117 : vector<6x256xbf16> to vector<6x256xf32>
    %146 = vector.broadcast %144 : vector<6x1xf32> to vector<6x256xf32>
    %147 = arith.mulf %145, %146 : vector<6x256xf32>
    %148 = arith.addf %142, %147 : vector<6x256xf32>
    %c3 = arith.constant 3 : index
    %c0_81 = arith.constant 0 : index
    %c0_82 = arith.constant 0 : index
    %149 = vector.load %arg8[%c3, %c0_81, %c0_82] : memref<9x6x1xf32, #tpu.memory_space<vmem>>, vector<1x6x1xf32>
    %150 = vector.shape_cast %149 : vector<1x6x1xf32> to vector<6x1xf32>
    %151 = arith.extf %120 : vector<6x256xbf16> to vector<6x256xf32>
    %152 = vector.broadcast %150 : vector<6x1xf32> to vector<6x256xf32>
    %153 = arith.mulf %151, %152 : vector<6x256xf32>
    %154 = arith.addf %148, %153 : vector<6x256xf32>
    %c4 = arith.constant 4 : index
    %c0_83 = arith.constant 0 : index
    %c0_84 = arith.constant 0 : index
    %155 = vector.load %arg8[%c4, %c0_83, %c0_84] : memref<9x6x1xf32, #tpu.memory_space<vmem>>, vector<1x6x1xf32>
    %156 = vector.shape_cast %155 : vector<1x6x1xf32> to vector<6x1xf32>
    %157 = arith.extf %121 : vector<6x256xbf16> to vector<6x256xf32>
    %158 = vector.broadcast %156 : vector<6x1xf32> to vector<6x256xf32>
    %159 = arith.mulf %157, %158 : vector<6x256xf32>
    %160 = arith.addf %154, %159 : vector<6x256xf32>
    %c5 = arith.constant 5 : index
    %c0_85 = arith.constant 0 : index
    %c0_86 = arith.constant 0 : index
    %161 = vector.load %arg8[%c5, %c0_85, %c0_86] : memref<9x6x1xf32, #tpu.memory_space<vmem>>, vector<1x6x1xf32>
    %162 = vector.shape_cast %161 : vector<1x6x1xf32> to vector<6x1xf32>
    %163 = arith.extf %124 : vector<6x256xbf16> to vector<6x256xf32>
    %164 = vector.broadcast %162 : vector<6x1xf32> to vector<6x256xf32>
    %165 = arith.mulf %163, %164 : vector<6x256xf32>
    %166 = arith.addf %160, %165 : vector<6x256xf32>
    %c6 = arith.constant 6 : index
    %c0_87 = arith.constant 0 : index
    %c0_88 = arith.constant 0 : index
    %167 = vector.load %arg8[%c6, %c0_87, %c0_88] : memref<9x6x1xf32, #tpu.memory_space<vmem>>, vector<1x6x1xf32>
    %168 = vector.shape_cast %167 : vector<1x6x1xf32> to vector<6x1xf32>
    %169 = arith.extf %127 : vector<6x256xbf16> to vector<6x256xf32>
    %170 = vector.broadcast %168 : vector<6x1xf32> to vector<6x256xf32>
    %171 = arith.mulf %169, %170 : vector<6x256xf32>
    %172 = arith.addf %166, %171 : vector<6x256xf32>
    %c7 = arith.constant 7 : index
    %c0_89 = arith.constant 0 : index
    %c0_90 = arith.constant 0 : index
    %173 = vector.load %arg8[%c7, %c0_89, %c0_90] : memref<9x6x1xf32, #tpu.memory_space<vmem>>, vector<1x6x1xf32>
    %174 = vector.shape_cast %173 : vector<1x6x1xf32> to vector<6x1xf32>
    %175 = arith.extf %128 : vector<6x256xbf16> to vector<6x256xf32>
    %176 = vector.broadcast %174 : vector<6x1xf32> to vector<6x256xf32>
    %177 = arith.mulf %175, %176 : vector<6x256xf32>
    %178 = arith.addf %172, %177 : vector<6x256xf32>
    %c8 = arith.constant 8 : index
    %c0_91 = arith.constant 0 : index
    %c0_92 = arith.constant 0 : index
    %179 = vector.load %arg8[%c8, %c0_91, %c0_92] : memref<9x6x1xf32, #tpu.memory_space<vmem>>, vector<1x6x1xf32>
    %180 = vector.shape_cast %179 : vector<1x6x1xf32> to vector<6x1xf32>
    %181 = arith.extf %131 : vector<6x256xbf16> to vector<6x256xf32>
    %182 = vector.broadcast %180 : vector<6x1xf32> to vector<6x256xf32>
    %183 = arith.mulf %181, %182 : vector<6x256xf32>
    %184 = arith.addf %178, %183 : vector<6x256xf32>
    %c0_93 = arith.constant 0 : index
    %c0_94 = arith.constant 0 : index
    %185 = vector.load %arg9[%c0_93, %c0_94] : memref<6x1xf32, #tpu.memory_space<vmem>>, vector<6x1xf32>
    %186 = vector.broadcast %185 : vector<6x1xf32> to vector<6x256xf32>
    %187 = arith.addf %184, %186 : vector<6x256xf32>
    %c0_95 = arith.constant 0 : index
    %c0_96 = arith.constant 0 : index
    %c0_97 = arith.constant 0 : index
    %188 = vector.load %arg10[%c0_95, %c0_96, %c0_97] : memref<1x4x32xbf16, #tpu.memory_space<vmem>>, vector<1x4x32xbf16>
    %189 = vector.shape_cast %188 : vector<1x4x32xbf16> to vector<4x32xbf16>
    %cst_98 = arith.constant dense<0.000000e+00> : vector<4x256xf32>
    %190 = tpu.matmul %189, %54, %cst_98 {dimension_numbers = #tpu.dot_dimension_numbers<[1], [0], [0], [1], [0, 0, 1, 1], [], []>} : vector<4x32xbf16>, vector<32x256xbf16>, vector<4x256xf32> -> vector<4x256xf32>
    %c0_99 = arith.constant 0 : index
    %c0_100 = arith.constant 0 : index
    %191 = vector.load %arg11[%c0_99, %c0_100] : memref<4x1xf32, #tpu.memory_space<vmem>>, vector<4x1xf32>
    %192 = vector.broadcast %191 : vector<4x1xf32> to vector<4x256xf32>
    %193 = arith.addf %190, %192 : vector<4x256xf32>
    %cst_101 = arith.constant 0.000000e+00 : f32
    %194 = vector.broadcast %cst_101 : f32 to vector<4x256xf32>
    %195 = arith.maximumf %193, %194 : vector<4x256xf32>
    %196 = arith.truncf %195 : vector<4x256xf32> to vector<4x256xbf16>
    %c0_102 = arith.constant 0 : index
    %c128_103 = arith.constant 128 : index
    %197 = vector.load %arg22[%c0_102, %c128_103] : memref<4x512xbf16, #tpu.memory_space<vmem>>, vector<4x256xbf16>
    tpu.vector_store %arg22[%c0_102, %c128_103], %196 {strides = array<i32>} : memref<4x512xbf16, #tpu.memory_space<vmem>>, vector<4x256xbf16>,
    %c0_104 = arith.constant 0 : index
    %c111 = arith.constant 111 : index
    %198 = vector.load %arg22[%c0_104, %c111] : memref<4x512xbf16, #tpu.memory_space<vmem>>, vector<4x256xbf16>
    %199 = vector.broadcast %32 : vector<1x256xbf16> to vector<4x256xbf16>
    %200 = arith.mulf %198, %199 : vector<4x256xbf16>
    %c0_105 = arith.constant 0 : index
    %c112_106 = arith.constant 112 : index
    %201 = vector.load %arg22[%c0_105, %c112_106] : memref<4x512xbf16, #tpu.memory_space<vmem>>, vector<4x256xbf16>
    %c0_107 = arith.constant 0 : index
    %c113 = arith.constant 113 : index
    %202 = vector.load %arg22[%c0_107, %c113] : memref<4x512xbf16, #tpu.memory_space<vmem>>, vector<4x256xbf16>
    %203 = vector.broadcast %27 : vector<1x256xbf16> to vector<4x256xbf16>
    %204 = arith.mulf %202, %203 : vector<4x256xbf16>
    %c0_108 = arith.constant 0 : index
    %c127_109 = arith.constant 127 : index
    %205 = vector.load %arg22[%c0_108, %c127_109] : memref<4x512xbf16, #tpu.memory_space<vmem>>, vector<4x256xbf16>
    %206 = vector.broadcast %32 : vector<1x256xbf16> to vector<4x256xbf16>
    %207 = arith.mulf %205, %206 : vector<4x256xbf16>
    %c0_110 = arith.constant 0 : index
    %c128_111 = arith.constant 128 : index
    %208 = vector.load %arg22[%c0_110, %c128_111] : memref<4x512xbf16, #tpu.memory_space<vmem>>, vector<4x256xbf16>
    %c0_112 = arith.constant 0 : index
    %c129_113 = arith.constant 129 : index
    %209 = vector.load %arg22[%c0_112, %c129_113] : memref<4x512xbf16, #tpu.memory_space<vmem>>, vector<4x256xbf16>
    %210 = vector.broadcast %27 : vector<1x256xbf16> to vector<4x256xbf16>
    %211 = arith.mulf %209, %210 : vector<4x256xbf16>
    %c0_114 = arith.constant 0 : index
    %c143 = arith.constant 143 : index
    %212 = vector.load %arg22[%c0_114, %c143] : memref<4x512xbf16, #tpu.memory_space<vmem>>, vector<4x256xbf16>
    %213 = vector.broadcast %32 : vector<1x256xbf16> to vector<4x256xbf16>
    %214 = arith.mulf %212, %213 : vector<4x256xbf16>
    %c0_115 = arith.constant 0 : index
    %c144_116 = arith.constant 144 : index
    %215 = vector.load %arg22[%c0_115, %c144_116] : memref<4x512xbf16, #tpu.memory_space<vmem>>, vector<4x256xbf16>
    %c0_117 = arith.constant 0 : index
    %c145 = arith.constant 145 : index
    %216 = vector.load %arg22[%c0_117, %c145] : memref<4x512xbf16, #tpu.memory_space<vmem>>, vector<4x256xbf16>
    %217 = vector.broadcast %27 : vector<1x256xbf16> to vector<4x256xbf16>
    %218 = arith.mulf %216, %217 : vector<4x256xbf16>
    %c0_118 = arith.constant 0 : index
    %c0_119 = arith.constant 0 : index
    %c0_120 = arith.constant 0 : index
    %219 = vector.load %arg12[%c0_118, %c0_119, %c0_120] : memref<9x6x4xbf16, #tpu.memory_space<vmem>>, vector<1x6x4xbf16>
    %220 = vector.shape_cast %219 : vector<1x6x4xbf16> to vector<6x4xbf16>
    %cst_121 = arith.constant dense<0.000000e+00> : vector<6x256xf32>
    %221 = tpu.matmul %220, %200, %cst_121 {dimension_numbers = #tpu.dot_dimension_numbers<[1], [0], [0], [1], [0, 0, 1, 1], [], []>} : vector<6x4xbf16>, vector<4x256xbf16>, vector<6x256xf32> -> vector<6x256xf32>
    %c1_122 = arith.constant 1 : index
    %c0_123 = arith.constant 0 : index
    %c0_124 = arith.constant 0 : index
    %222 = vector.load %arg12[%c1_122, %c0_123, %c0_124] : memref<9x6x4xbf16, #tpu.memory_space<vmem>>, vector<1x6x4xbf16>
    %223 = vector.shape_cast %222 : vector<1x6x4xbf16> to vector<6x4xbf16>
    %cst_125 = arith.constant dense<0.000000e+00> : vector<6x256xf32>
    %224 = tpu.matmul %223, %201, %cst_125 {dimension_numbers = #tpu.dot_dimension_numbers<[1], [0], [0], [1], [0, 0, 1, 1], [], []>} : vector<6x4xbf16>, vector<4x256xbf16>, vector<6x256xf32> -> vector<6x256xf32>
    %225 = arith.addf %221, %224 : vector<6x256xf32>
    %c2_126 = arith.constant 2 : index
    %c0_127 = arith.constant 0 : index
    %c0_128 = arith.constant 0 : index
    %226 = vector.load %arg12[%c2_126, %c0_127, %c0_128] : memref<9x6x4xbf16, #tpu.memory_space<vmem>>, vector<1x6x4xbf16>
    %227 = vector.shape_cast %226 : vector<1x6x4xbf16> to vector<6x4xbf16>
    %cst_129 = arith.constant dense<0.000000e+00> : vector<6x256xf32>
    %228 = tpu.matmul %227, %204, %cst_129 {dimension_numbers = #tpu.dot_dimension_numbers<[1], [0], [0], [1], [0, 0, 1, 1], [], []>} : vector<6x4xbf16>, vector<4x256xbf16>, vector<6x256xf32> -> vector<6x256xf32>
    %229 = arith.addf %225, %228 : vector<6x256xf32>
    %c3_130 = arith.constant 3 : index
    %c0_131 = arith.constant 0 : index
    %c0_132 = arith.constant 0 : index
    %230 = vector.load %arg12[%c3_130, %c0_131, %c0_132] : memref<9x6x4xbf16, #tpu.memory_space<vmem>>, vector<1x6x4xbf16>
    %231 = vector.shape_cast %230 : vector<1x6x4xbf16> to vector<6x4xbf16>
    %cst_133 = arith.constant dense<0.000000e+00> : vector<6x256xf32>
    %232 = tpu.matmul %231, %207, %cst_133 {dimension_numbers = #tpu.dot_dimension_numbers<[1], [0], [0], [1], [0, 0, 1, 1], [], []>} : vector<6x4xbf16>, vector<4x256xbf16>, vector<6x256xf32> -> vector<6x256xf32>
    %233 = arith.addf %229, %232 : vector<6x256xf32>
    %c4_134 = arith.constant 4 : index
    %c0_135 = arith.constant 0 : index
    %c0_136 = arith.constant 0 : index
    %234 = vector.load %arg12[%c4_134, %c0_135, %c0_136] : memref<9x6x4xbf16, #tpu.memory_space<vmem>>, vector<1x6x4xbf16>
    %235 = vector.shape_cast %234 : vector<1x6x4xbf16> to vector<6x4xbf16>
    %cst_137 = arith.constant dense<0.000000e+00> : vector<6x256xf32>
    %236 = tpu.matmul %235, %208, %cst_137 {dimension_numbers = #tpu.dot_dimension_numbers<[1], [0], [0], [1], [0, 0, 1, 1], [], []>} : vector<6x4xbf16>, vector<4x256xbf16>, vector<6x256xf32> -> vector<6x256xf32>
    %237 = arith.addf %233, %236 : vector<6x256xf32>
    %c5_138 = arith.constant 5 : index
    %c0_139 = arith.constant 0 : index
    %c0_140 = arith.constant 0 : index
    %238 = vector.load %arg12[%c5_138, %c0_139, %c0_140] : memref<9x6x4xbf16, #tpu.memory_space<vmem>>, vector<1x6x4xbf16>
    %239 = vector.shape_cast %238 : vector<1x6x4xbf16> to vector<6x4xbf16>
    %cst_141 = arith.constant dense<0.000000e+00> : vector<6x256xf32>
    %240 = tpu.matmul %239, %211, %cst_141 {dimension_numbers = #tpu.dot_dimension_numbers<[1], [0], [0], [1], [0, 0, 1, 1], [], []>} : vector<6x4xbf16>, vector<4x256xbf16>, vector<6x256xf32> -> vector<6x256xf32>
    %241 = arith.addf %237, %240 : vector<6x256xf32>
    %c6_142 = arith.constant 6 : index
    %c0_143 = arith.constant 0 : index
    %c0_144 = arith.constant 0 : index
    %242 = vector.load %arg12[%c6_142, %c0_143, %c0_144] : memref<9x6x4xbf16, #tpu.memory_space<vmem>>, vector<1x6x4xbf16>
    %243 = vector.shape_cast %242 : vector<1x6x4xbf16> to vector<6x4xbf16>
    %cst_145 = arith.constant dense<0.000000e+00> : vector<6x256xf32>
    %244 = tpu.matmul %243, %214, %cst_145 {dimension_numbers = #tpu.dot_dimension_numbers<[1], [0], [0], [1], [0, 0, 1, 1], [], []>} : vector<6x4xbf16>, vector<4x256xbf16>, vector<6x256xf32> -> vector<6x256xf32>
    %245 = arith.addf %241, %244 : vector<6x256xf32>
    %c7_146 = arith.constant 7 : index
    %c0_147 = arith.constant 0 : index
    %c0_148 = arith.constant 0 : index
    %246 = vector.load %arg12[%c7_146, %c0_147, %c0_148] : memref<9x6x4xbf16, #tpu.memory_space<vmem>>, vector<1x6x4xbf16>
    %247 = vector.shape_cast %246 : vector<1x6x4xbf16> to vector<6x4xbf16>
    %cst_149 = arith.constant dense<0.000000e+00> : vector<6x256xf32>
    %248 = tpu.matmul %247, %215, %cst_149 {dimension_numbers = #tpu.dot_dimension_numbers<[1], [0], [0], [1], [0, 0, 1, 1], [], []>} : vector<6x4xbf16>, vector<4x256xbf16>, vector<6x256xf32> -> vector<6x256xf32>
    %249 = arith.addf %245, %248 : vector<6x256xf32>
    %c8_150 = arith.constant 8 : index
    %c0_151 = arith.constant 0 : index
    %c0_152 = arith.constant 0 : index
    %250 = vector.load %arg12[%c8_150, %c0_151, %c0_152] : memref<9x6x4xbf16, #tpu.memory_space<vmem>>, vector<1x6x4xbf16>
    %251 = vector.shape_cast %250 : vector<1x6x4xbf16> to vector<6x4xbf16>
    %cst_153 = arith.constant dense<0.000000e+00> : vector<6x256xf32>
    %252 = tpu.matmul %251, %218, %cst_153 {dimension_numbers = #tpu.dot_dimension_numbers<[1], [0], [0], [1], [0, 0, 1, 1], [], []>} : vector<6x4xbf16>, vector<4x256xbf16>, vector<6x256xf32> -> vector<6x256xf32>
    %253 = arith.addf %249, %252 : vector<6x256xf32>
    %c0_154 = arith.constant 0 : index
    %c0_155 = arith.constant 0 : index
    %254 = vector.load %arg13[%c0_154, %c0_155] : memref<6x1xf32, #tpu.memory_space<vmem>>, vector<6x1xf32>
    %255 = vector.broadcast %254 : vector<6x1xf32> to vector<6x256xf32>
    %256 = arith.addf %253, %255 : vector<6x256xf32>
    %cst_156 = arith.constant 0.000000e+00 : f32
    %257 = vector.broadcast %cst_156 : f32 to vector<6x256xf32>
    %258 = arith.maximumf %256, %257 : vector<6x256xf32>
    %259 = arith.truncf %258 : vector<6x256xf32> to vector<6x256xbf16>
    %c0_157 = arith.constant 0 : index
    %c128_158 = arith.constant 128 : index
    %260 = vector.load %arg23[%c0_157, %c128_158] : memref<6x512xbf16, #tpu.memory_space<vmem>>, vector<6x256xbf16>
    tpu.vector_store %arg23[%c0_157, %c128_158], %259 {strides = array<i32>} : memref<6x512xbf16, #tpu.memory_space<vmem>>, vector<6x256xbf16>,
    %c0_159 = arith.constant 0 : index
    %c111_160 = arith.constant 111 : index
    %261 = vector.load %arg23[%c0_159, %c111_160] : memref<6x512xbf16, #tpu.memory_space<vmem>>, vector<6x256xbf16>
    %262 = vector.broadcast %32 : vector<1x256xbf16> to vector<6x256xbf16>
    %263 = arith.mulf %261, %262 : vector<6x256xbf16>
    %c0_161 = arith.constant 0 : index
    %c112_162 = arith.constant 112 : index
    %264 = vector.load %arg23[%c0_161, %c112_162] : memref<6x512xbf16, #tpu.memory_space<vmem>>, vector<6x256xbf16>
    %c0_163 = arith.constant 0 : index
    %c113_164 = arith.constant 113 : index
    %265 = vector.load %arg23[%c0_163, %c113_164] : memref<6x512xbf16, #tpu.memory_space<vmem>>, vector<6x256xbf16>
    %266 = vector.broadcast %27 : vector<1x256xbf16> to vector<6x256xbf16>
    %267 = arith.mulf %265, %266 : vector<6x256xbf16>
    %c0_165 = arith.constant 0 : index
    %c127_166 = arith.constant 127 : index
    %268 = vector.load %arg23[%c0_165, %c127_166] : memref<6x512xbf16, #tpu.memory_space<vmem>>, vector<6x256xbf16>
    %269 = vector.broadcast %32 : vector<1x256xbf16> to vector<6x256xbf16>
    %270 = arith.mulf %268, %269 : vector<6x256xbf16>
    %c0_167 = arith.constant 0 : index
    %c128_168 = arith.constant 128 : index
    %271 = vector.load %arg23[%c0_167, %c128_168] : memref<6x512xbf16, #tpu.memory_space<vmem>>, vector<6x256xbf16>
    %c0_169 = arith.constant 0 : index
    %c129_170 = arith.constant 129 : index
    %272 = vector.load %arg23[%c0_169, %c129_170] : memref<6x512xbf16, #tpu.memory_space<vmem>>, vector<6x256xbf16>
    %273 = vector.broadcast %27 : vector<1x256xbf16> to vector<6x256xbf16>
    %274 = arith.mulf %272, %273 : vector<6x256xbf16>
    %c0_171 = arith.constant 0 : index
    %c143_172 = arith.constant 143 : index
    %275 = vector.load %arg23[%c0_171, %c143_172] : memref<6x512xbf16, #tpu.memory_space<vmem>>, vector<6x256xbf16>
    %276 = vector.broadcast %32 : vector<1x256xbf16> to vector<6x256xbf16>
    %277 = arith.mulf %275, %276 : vector<6x256xbf16>
    %c0_173 = arith.constant 0 : index
    %c144_174 = arith.constant 144 : index
    %278 = vector.load %arg23[%c0_173, %c144_174] : memref<6x512xbf16, #tpu.memory_space<vmem>>, vector<6x256xbf16>
    %c0_175 = arith.constant 0 : index
    %c145_176 = arith.constant 145 : index
    %279 = vector.load %arg23[%c0_175, %c145_176] : memref<6x512xbf16, #tpu.memory_space<vmem>>, vector<6x256xbf16>
    %280 = vector.broadcast %27 : vector<1x256xbf16> to vector<6x256xbf16>
    %281 = arith.mulf %279, %280 : vector<6x256xbf16>
    %c0_177 = arith.constant 0 : index
    %c0_178 = arith.constant 0 : index
    %c0_179 = arith.constant 0 : index
    %282 = vector.load %arg14[%c0_177, %c0_178, %c0_179] : memref<9x6x6xbf16, #tpu.memory_space<vmem>>, vector<1x6x6xbf16>
    %283 = vector.shape_cast %282 : vector<1x6x6xbf16> to vector<6x6xbf16>
    %cst_180 = arith.constant dense<0.000000e+00> : vector<6x256xf32>
    %284 = tpu.matmul %283, %263, %cst_180 {dimension_numbers = #tpu.dot_dimension_numbers<[1], [0], [0], [1], [0, 0, 1, 1], [], []>} : vector<6x6xbf16>, vector<6x256xbf16>, vector<6x256xf32> -> vector<6x256xf32>
    %c1_181 = arith.constant 1 : index
    %c0_182 = arith.constant 0 : index
    %c0_183 = arith.constant 0 : index
    %285 = vector.load %arg14[%c1_181, %c0_182, %c0_183] : memref<9x6x6xbf16, #tpu.memory_space<vmem>>, vector<1x6x6xbf16>
    %286 = vector.shape_cast %285 : vector<1x6x6xbf16> to vector<6x6xbf16>
    %cst_184 = arith.constant dense<0.000000e+00> : vector<6x256xf32>
    %287 = tpu.matmul %286, %264, %cst_184 {dimension_numbers = #tpu.dot_dimension_numbers<[1], [0], [0], [1], [0, 0, 1, 1], [], []>} : vector<6x6xbf16>, vector<6x256xbf16>, vector<6x256xf32> -> vector<6x256xf32>
    %288 = arith.addf %284, %287 : vector<6x256xf32>
    %c2_185 = arith.constant 2 : index
    %c0_186 = arith.constant 0 : index
    %c0_187 = arith.constant 0 : index
    %289 = vector.load %arg14[%c2_185, %c0_186, %c0_187] : memref<9x6x6xbf16, #tpu.memory_space<vmem>>, vector<1x6x6xbf16>
    %290 = vector.shape_cast %289 : vector<1x6x6xbf16> to vector<6x6xbf16>
    %cst_188 = arith.constant dense<0.000000e+00> : vector<6x256xf32>
    %291 = tpu.matmul %290, %267, %cst_188 {dimension_numbers = #tpu.dot_dimension_numbers<[1], [0], [0], [1], [0, 0, 1, 1], [], []>} : vector<6x6xbf16>, vector<6x256xbf16>, vector<6x256xf32> -> vector<6x256xf32>
    %292 = arith.addf %288, %291 : vector<6x256xf32>
    %c3_189 = arith.constant 3 : index
    %c0_190 = arith.constant 0 : index
    %c0_191 = arith.constant 0 : index
    %293 = vector.load %arg14[%c3_189, %c0_190, %c0_191] : memref<9x6x6xbf16, #tpu.memory_space<vmem>>, vector<1x6x6xbf16>
    %294 = vector.shape_cast %293 : vector<1x6x6xbf16> to vector<6x6xbf16>
    %cst_192 = arith.constant dense<0.000000e+00> : vector<6x256xf32>
    %295 = tpu.matmul %294, %270, %cst_192 {dimension_numbers = #tpu.dot_dimension_numbers<[1], [0], [0], [1], [0, 0, 1, 1], [], []>} : vector<6x6xbf16>, vector<6x256xbf16>, vector<6x256xf32> -> vector<6x256xf32>
    %296 = arith.addf %292, %295 : vector<6x256xf32>
    %c4_193 = arith.constant 4 : index
    %c0_194 = arith.constant 0 : index
    %c0_195 = arith.constant 0 : index
    %297 = vector.load %arg14[%c4_193, %c0_194, %c0_195] : memref<9x6x6xbf16, #tpu.memory_space<vmem>>, vector<1x6x6xbf16>
    %298 = vector.shape_cast %297 : vector<1x6x6xbf16> to vector<6x6xbf16>
    %cst_196 = arith.constant dense<0.000000e+00> : vector<6x256xf32>
    %299 = tpu.matmul %298, %271, %cst_196 {dimension_numbers = #tpu.dot_dimension_numbers<[1], [0], [0], [1], [0, 0, 1, 1], [], []>} : vector<6x6xbf16>, vector<6x256xbf16>, vector<6x256xf32> -> vector<6x256xf32>
    %300 = arith.addf %296, %299 : vector<6x256xf32>
    %c5_197 = arith.constant 5 : index
    %c0_198 = arith.constant 0 : index
    %c0_199 = arith.constant 0 : index
    %301 = vector.load %arg14[%c5_197, %c0_198, %c0_199] : memref<9x6x6xbf16, #tpu.memory_space<vmem>>, vector<1x6x6xbf16>
    %302 = vector.shape_cast %301 : vector<1x6x6xbf16> to vector<6x6xbf16>
    %cst_200 = arith.constant dense<0.000000e+00> : vector<6x256xf32>
    %303 = tpu.matmul %302, %274, %cst_200 {dimension_numbers = #tpu.dot_dimension_numbers<[1], [0], [0], [1], [0, 0, 1, 1], [], []>} : vector<6x6xbf16>, vector<6x256xbf16>, vector<6x256xf32> -> vector<6x256xf32>
    %304 = arith.addf %300, %303 : vector<6x256xf32>
    %c6_201 = arith.constant 6 : index
    %c0_202 = arith.constant 0 : index
    %c0_203 = arith.constant 0 : index
    %305 = vector.load %arg14[%c6_201, %c0_202, %c0_203] : memref<9x6x6xbf16, #tpu.memory_space<vmem>>, vector<1x6x6xbf16>
    %306 = vector.shape_cast %305 : vector<1x6x6xbf16> to vector<6x6xbf16>
    %cst_204 = arith.constant dense<0.000000e+00> : vector<6x256xf32>
    %307 = tpu.matmul %306, %277, %cst_204 {dimension_numbers = #tpu.dot_dimension_numbers<[1], [0], [0], [1], [0, 0, 1, 1], [], []>} : vector<6x6xbf16>, vector<6x256xbf16>, vector<6x256xf32> -> vector<6x256xf32>
    %308 = arith.addf %304, %307 : vector<6x256xf32>
    %c7_205 = arith.constant 7 : index
    %c0_206 = arith.constant 0 : index
    %c0_207 = arith.constant 0 : index
    %309 = vector.load %arg14[%c7_205, %c0_206, %c0_207] : memref<9x6x6xbf16, #tpu.memory_space<vmem>>, vector<1x6x6xbf16>
    %310 = vector.shape_cast %309 : vector<1x6x6xbf16> to vector<6x6xbf16>
    %cst_208 = arith.constant dense<0.000000e+00> : vector<6x256xf32>
    %311 = tpu.matmul %310, %278, %cst_208 {dimension_numbers = #tpu.dot_dimension_numbers<[1], [0], [0], [1], [0, 0, 1, 1], [], []>} : vector<6x6xbf16>, vector<6x256xbf16>, vector<6x256xf32> -> vector<6x256xf32>
    %312 = arith.addf %308, %311 : vector<6x256xf32>
    %c8_209 = arith.constant 8 : index
    %c0_210 = arith.constant 0 : index
    %c0_211 = arith.constant 0 : index
    %313 = vector.load %arg14[%c8_209, %c0_210, %c0_211] : memref<9x6x6xbf16, #tpu.memory_space<vmem>>, vector<1x6x6xbf16>
    %314 = vector.shape_cast %313 : vector<1x6x6xbf16> to vector<6x6xbf16>
    %cst_212 = arith.constant dense<0.000000e+00> : vector<6x256xf32>
    %315 = tpu.matmul %314, %281, %cst_212 {dimension_numbers = #tpu.dot_dimension_numbers<[1], [0], [0], [1], [0, 0, 1, 1], [], []>} : vector<6x6xbf16>, vector<6x256xbf16>, vector<6x256xf32> -> vector<6x256xf32>
    %316 = arith.addf %312, %315 : vector<6x256xf32>
    %c0_213 = arith.constant 0 : index
    %c0_214 = arith.constant 0 : index
    %317 = vector.load %arg15[%c0_213, %c0_214] : memref<6x1xf32, #tpu.memory_space<vmem>>, vector<6x1xf32>
    %318 = vector.broadcast %317 : vector<6x1xf32> to vector<6x256xf32>
    %319 = arith.addf %316, %318 : vector<6x256xf32>
    %cst_215 = arith.constant 0.000000e+00 : f32
    %320 = vector.broadcast %cst_215 : f32 to vector<6x256xf32>
    %321 = arith.maximumf %319, %320 : vector<6x256xf32>
    %322 = arith.truncf %321 : vector<6x256xf32> to vector<6x256xbf16>
    %c0_216 = arith.constant 0 : index
    %c128_217 = arith.constant 128 : index
    %323 = vector.load %arg23[%c0_216, %c128_217] : memref<6x512xbf16, #tpu.memory_space<vmem>>, vector<6x256xbf16>
    tpu.vector_store %arg23[%c0_216, %c128_217], %322 {strides = array<i32>} : memref<6x512xbf16, #tpu.memory_space<vmem>>, vector<6x256xbf16>,
    %c0_218 = arith.constant 0 : index
    %c43 = arith.constant 43 : index
    %324 = vector.load %arg23[%c0_218, %c43] : memref<6x512xbf16, #tpu.memory_space<vmem>>, vector<6x256xbf16>
    %325 = vector.broadcast %52 : vector<1x256xbf16> to vector<6x256xbf16>
    %326 = arith.mulf %324, %325 : vector<6x256xbf16>
    %c0_219 = arith.constant 0 : index
    %c48 = arith.constant 48 : index
    %327 = vector.load %arg23[%c0_219, %c48] : memref<6x512xbf16, #tpu.memory_space<vmem>>, vector<6x256xbf16>
    %c0_220 = arith.constant 0 : index
    %c53 = arith.constant 53 : index
    %328 = vector.load %arg23[%c0_220, %c53] : memref<6x512xbf16, #tpu.memory_space<vmem>>, vector<6x256xbf16>
    %329 = vector.broadcast %47 : vector<1x256xbf16> to vector<6x256xbf16>
    %330 = arith.mulf %328, %329 : vector<6x256xbf16>
    %c0_221 = arith.constant 0 : index
    %c123 = arith.constant 123 : index
    %331 = vector.load %arg23[%c0_221, %c123] : memref<6x512xbf16, #tpu.memory_space<vmem>>, vector<6x256xbf16>
    %332 = vector.broadcast %52 : vector<1x256xbf16> to vector<6x256xbf16>
    %333 = arith.mulf %331, %332 : vector<6x256xbf16>
    %c0_222 = arith.constant 0 : index
    %c128_223 = arith.constant 128 : index
    %334 = vector.load %arg23[%c0_222, %c128_223] : memref<6x512xbf16, #tpu.memory_space<vmem>>, vector<6x256xbf16>
    %c0_224 = arith.constant 0 : index
    %c133 = arith.constant 133 : index
    %335 = vector.load %arg23[%c0_224, %c133] : memref<6x512xbf16, #tpu.memory_space<vmem>>, vector<6x256xbf16>
    %336 = vector.broadcast %47 : vector<1x256xbf16> to vector<6x256xbf16>
    %337 = arith.mulf %335, %336 : vector<6x256xbf16>
    %c0_225 = arith.constant 0 : index
    %c203 = arith.constant 203 : index
    %338 = vector.load %arg23[%c0_225, %c203] : memref<6x512xbf16, #tpu.memory_space<vmem>>, vector<6x256xbf16>
    %339 = vector.broadcast %52 : vector<1x256xbf16> to vector<6x256xbf16>
    %340 = arith.mulf %338, %339 : vector<6x256xbf16>
    %c0_226 = arith.constant 0 : index
    %c208 = arith.constant 208 : index
    %341 = vector.load %arg23[%c0_226, %c208] : memref<6x512xbf16, #tpu.memory_space<vmem>>, vector<6x256xbf16>
    %c0_227 = arith.constant 0 : index
    %c213 = arith.constant 213 : index
    %342 = vector.load %arg23[%c0_227, %c213] : memref<6x512xbf16, #tpu.memory_space<vmem>>, vector<6x256xbf16>
    %343 = vector.broadcast %47 : vector<1x256xbf16> to vector<6x256xbf16>
    %344 = arith.mulf %342, %343 : vector<6x256xbf16>
    %c0_228 = arith.constant 0 : index
    %c0_229 = arith.constant 0 : index
    %c0_230 = arith.constant 0 : index
    %345 = vector.load %arg16[%c0_228, %c0_229, %c0_230] : memref<9x6x1xf32, #tpu.memory_space<vmem>>, vector<1x6x1xf32>
    %346 = vector.shape_cast %345 : vector<1x6x1xf32> to vector<6x1xf32>
    %347 = arith.extf %326 : vector<6x256xbf16> to vector<6x256xf32>
    %348 = vector.broadcast %346 : vector<6x1xf32> to vector<6x256xf32>
    %349 = arith.mulf %347, %348 : vector<6x256xf32>
    %c1_231 = arith.constant 1 : index
    %c0_232 = arith.constant 0 : index
    %c0_233 = arith.constant 0 : index
    %350 = vector.load %arg16[%c1_231, %c0_232, %c0_233] : memref<9x6x1xf32, #tpu.memory_space<vmem>>, vector<1x6x1xf32>
    %351 = vector.shape_cast %350 : vector<1x6x1xf32> to vector<6x1xf32>
    %352 = arith.extf %327 : vector<6x256xbf16> to vector<6x256xf32>
    %353 = vector.broadcast %351 : vector<6x1xf32> to vector<6x256xf32>
    %354 = arith.mulf %352, %353 : vector<6x256xf32>
    %355 = arith.addf %349, %354 : vector<6x256xf32>
    %c2_234 = arith.constant 2 : index
    %c0_235 = arith.constant 0 : index
    %c0_236 = arith.constant 0 : index
    %356 = vector.load %arg16[%c2_234, %c0_235, %c0_236] : memref<9x6x1xf32, #tpu.memory_space<vmem>>, vector<1x6x1xf32>
    %357 = vector.shape_cast %356 : vector<1x6x1xf32> to vector<6x1xf32>
    %358 = arith.extf %330 : vector<6x256xbf16> to vector<6x256xf32>
    %359 = vector.broadcast %357 : vector<6x1xf32> to vector<6x256xf32>
    %360 = arith.mulf %358, %359 : vector<6x256xf32>
    %361 = arith.addf %355, %360 : vector<6x256xf32>
    %c3_237 = arith.constant 3 : index
    %c0_238 = arith.constant 0 : index
    %c0_239 = arith.constant 0 : index
    %362 = vector.load %arg16[%c3_237, %c0_238, %c0_239] : memref<9x6x1xf32, #tpu.memory_space<vmem>>, vector<1x6x1xf32>
    %363 = vector.shape_cast %362 : vector<1x6x1xf32> to vector<6x1xf32>
    %364 = arith.extf %333 : vector<6x256xbf16> to vector<6x256xf32>
    %365 = vector.broadcast %363 : vector<6x1xf32> to vector<6x256xf32>
    %366 = arith.mulf %364, %365 : vector<6x256xf32>
    %367 = arith.addf %361, %366 : vector<6x256xf32>
    %c4_240 = arith.constant 4 : index
    %c0_241 = arith.constant 0 : index
    %c0_242 = arith.constant 0 : index
    %368 = vector.load %arg16[%c4_240, %c0_241, %c0_242] : memref<9x6x1xf32, #tpu.memory_space<vmem>>, vector<1x6x1xf32>
    %369 = vector.shape_cast %368 : vector<1x6x1xf32> to vector<6x1xf32>
    %370 = arith.extf %334 : vector<6x256xbf16> to vector<6x256xf32>
    %371 = vector.broadcast %369 : vector<6x1xf32> to vector<6x256xf32>
    %372 = arith.mulf %370, %371 : vector<6x256xf32>
    %373 = arith.addf %367, %372 : vector<6x256xf32>
    %c5_243 = arith.constant 5 : index
    %c0_244 = arith.constant 0 : index
    %c0_245 = arith.constant 0 : index
    %374 = vector.load %arg16[%c5_243, %c0_244, %c0_245] : memref<9x6x1xf32, #tpu.memory_space<vmem>>, vector<1x6x1xf32>
    %375 = vector.shape_cast %374 : vector<1x6x1xf32> to vector<6x1xf32>
    %376 = arith.extf %337 : vector<6x256xbf16> to vector<6x256xf32>
    %377 = vector.broadcast %375 : vector<6x1xf32> to vector<6x256xf32>
    %378 = arith.mulf %376, %377 : vector<6x256xf32>
    %379 = arith.addf %373, %378 : vector<6x256xf32>
    %c6_246 = arith.constant 6 : index
    %c0_247 = arith.constant 0 : index
    %c0_248 = arith.constant 0 : index
    %380 = vector.load %arg16[%c6_246, %c0_247, %c0_248] : memref<9x6x1xf32, #tpu.memory_space<vmem>>, vector<1x6x1xf32>
    %381 = vector.shape_cast %380 : vector<1x6x1xf32> to vector<6x1xf32>
    %382 = arith.extf %340 : vector<6x256xbf16> to vector<6x256xf32>
    %383 = vector.broadcast %381 : vector<6x1xf32> to vector<6x256xf32>
    %384 = arith.mulf %382, %383 : vector<6x256xf32>
    %385 = arith.addf %379, %384 : vector<6x256xf32>
    %c7_249 = arith.constant 7 : index
    %c0_250 = arith.constant 0 : index
    %c0_251 = arith.constant 0 : index
    %386 = vector.load %arg16[%c7_249, %c0_250, %c0_251] : memref<9x6x1xf32, #tpu.memory_space<vmem>>, vector<1x6x1xf32>
    %387 = vector.shape_cast %386 : vector<1x6x1xf32> to vector<6x1xf32>
    %388 = arith.extf %341 : vector<6x256xbf16> to vector<6x256xf32>
    %389 = vector.broadcast %387 : vector<6x1xf32> to vector<6x256xf32>
    %390 = arith.mulf %388, %389 : vector<6x256xf32>
    %391 = arith.addf %385, %390 : vector<6x256xf32>
    %c8_252 = arith.constant 8 : index
    %c0_253 = arith.constant 0 : index
    %c0_254 = arith.constant 0 : index
    %392 = vector.load %arg16[%c8_252, %c0_253, %c0_254] : memref<9x6x1xf32, #tpu.memory_space<vmem>>, vector<1x6x1xf32>
    %393 = vector.shape_cast %392 : vector<1x6x1xf32> to vector<6x1xf32>
    %394 = arith.extf %344 : vector<6x256xbf16> to vector<6x256xf32>
    %395 = vector.broadcast %393 : vector<6x1xf32> to vector<6x256xf32>
    %396 = arith.mulf %394, %395 : vector<6x256xf32>
    %397 = arith.addf %391, %396 : vector<6x256xf32>
    %c0_255 = arith.constant 0 : index
    %c0_256 = arith.constant 0 : index
    %398 = vector.load %arg17[%c0_255, %c0_256] : memref<6x1xf32, #tpu.memory_space<vmem>>, vector<6x1xf32>
    %399 = vector.broadcast %398 : vector<6x1xf32> to vector<6x256xf32>
    %400 = arith.addf %397, %399 : vector<6x256xf32>
    %c0_257 = arith.constant 0 : index
    %c0_258 = arith.constant 0 : index
    %401 = vector.load %arg18[%c0_257, %c0_258] : memref<32x6xbf16, #tpu.memory_space<vmem>>, vector<32x6xbf16>
    %402 = arith.truncf %187 : vector<6x256xf32> to vector<6x256xbf16>
    %cst_259 = arith.constant dense<0.000000e+00> : vector<32x256xf32>
    %403 = tpu.matmul %401, %402, %cst_259 {dimension_numbers = #tpu.dot_dimension_numbers<[1], [0], [0], [1], [0, 0, 1, 1], [], []>} : vector<32x6xbf16>, vector<6x256xbf16>, vector<32x256xf32> -> vector<32x256xf32>
    %c0_260 = arith.constant 0 : index
    %c0_261 = arith.constant 0 : index
    %404 = vector.load %arg19[%c0_260, %c0_261] : memref<32x6xbf16, #tpu.memory_space<vmem>>, vector<32x6xbf16>
    %405 = arith.truncf %400 : vector<6x256xf32> to vector<6x256xbf16>
    %cst_262 = arith.constant dense<0.000000e+00> : vector<32x256xf32>
    %406 = tpu.matmul %404, %405, %cst_262 {dimension_numbers = #tpu.dot_dimension_numbers<[1], [0], [0], [1], [0, 0, 1, 1], [], []>} : vector<32x6xbf16>, vector<6x256xbf16>, vector<32x256xf32> -> vector<32x256xf32>
    %407 = arith.addf %403, %406 : vector<32x256xf32>
    %c0_263 = arith.constant 0 : index
    %c0_264 = arith.constant 0 : index
    %408 = vector.load %arg20[%c0_263, %c0_264] : memref<32x1xf32, #tpu.memory_space<vmem>>, vector<32x1xf32>
    %409 = vector.broadcast %408 : vector<32x1xf32> to vector<32x256xf32>
    %410 = arith.addf %407, %409 : vector<32x256xf32>
    %411 = arith.extf %54 : vector<32x256xbf16> to vector<32x256xf32>
    %cst_265 = arith.constant 1.000000e-01 : f32
    %412 = vector.broadcast %cst_265 : f32 to vector<32x256xf32>
    %413 = arith.mulf %410, %412 : vector<32x256xf32>
    %414 = arith.addf %413, %411 : vector<32x256xf32>
    %cst_266 = arith.constant 0.000000e+00 : f32
    %415 = vector.broadcast %cst_266 : f32 to vector<32x256xf32>
    %416 = arith.maximumf %414, %415 : vector<32x256xf32>
    %c0_267 = arith.constant 0 : index
    %c0_268 = arith.constant 0 : index
    %c0_269 = arith.constant 0 : index
    %417 = vector.load %arg21[%c0_267, %c0_268, %c0_269] : memref<1x32x256xf32, #tpu.memory_space<vmem>>, vector<1x32x256xf32>
    %418 = vector.shape_cast %417 : vector<1x32x256xf32> to vector<32x256xf32>
    %419 = vector.shape_cast %416 : vector<32x256xf32> to vector<1x32x256xf32>
    tpu.vector_store %arg21[%c0_267, %c0_268, %c0_269], %419 {strides = array<i32>} : memref<1x32x256xf32, #tpu.memory_space<vmem>>, vector<1x32x256xf32>,
    return
  }
  func.func @transform_0(%arg0: i32) -> (i32, i32, i32) {
    %c0_i32 = arith.constant 0 : i32
    %c0_i32_0 = arith.constant 0 : i32
    %c0_i32_1 = arith.constant 0 : i32
    return %arg0, %c0_i32, %c0_i32_0 : i32, i32, i32
  }
  func.func @transform_1(%arg0: i32) -> (i32, i32, i32) {
    %c0_i32 = arith.constant 0 : i32
    %c0_i32_0 = arith.constant 0 : i32
    %c0_i32_1 = arith.constant 0 : i32
    %c0_i32_2 = arith.constant 0 : i32
    return %c0_i32, %c0_i32_0, %c0_i32_1 : i32, i32, i32
  }
  func.func @transform_2(%arg0: i32) -> (i32, i32) {
    %c0_i32 = arith.constant 0 : i32
    %c0_i32_0 = arith.constant 0 : i32
    %c0_i32_1 = arith.constant 0 : i32
    return %c0_i32, %c0_i32_0 : i32, i32
  }
  func.func @transform_3(%arg0: i32) -> (i32, i32, i32) {
    %c0_i32 = arith.constant 0 : i32
    %c0_i32_0 = arith.constant 0 : i32
    %c0_i32_1 = arith.constant 0 : i32
    %c0_i32_2 = arith.constant 0 : i32
    return %c0_i32, %c0_i32_0, %c0_i32_1 : i32, i32, i32
  }
  func.func @transform_4(%arg0: i32) -> (i32, i32) {
    %c0_i32 = arith.constant 0 : i32
    %c0_i32_0 = arith.constant 0 : i32
    %c0_i32_1 = arith.constant 0 : i32
    return %c0_i32, %c0_i32_0 : i32, i32
  }
  func.func @transform_5(%arg0: i32) -> (i32, i32, i32) {
    %c0_i32 = arith.constant 0 : i32
    %c0_i32_0 = arith.constant 0 : i32
    %c0_i32_1 = arith.constant 0 : i32
    %c0_i32_2 = arith.constant 0 : i32
    return %c0_i32, %c0_i32_0, %c0_i32_1 : i32, i32, i32
  }
  func.func @transform_6(%arg0: i32) -> (i32, i32) {
    %c0_i32 = arith.constant 0 : i32
    %c0_i32_0 = arith.constant 0 : i32
    %c0_i32_1 = arith.constant 0 : i32
    return %c0_i32, %c0_i32_0 : i32, i32
  }
  func.func @transform_7(%arg0: i32) -> (i32, i32, i32) {
    %c0_i32 = arith.constant 0 : i32
    %c0_i32_0 = arith.constant 0 : i32
    %c0_i32_1 = arith.constant 0 : i32
    %c0_i32_2 = arith.constant 0 : i32
    return %c0_i32, %c0_i32_0, %c0_i32_1 : i32, i32, i32
  }
  func.func @transform_8(%arg0: i32) -> (i32, i32) {
    %c0_i32 = arith.constant 0 : i32
    %c0_i32_0 = arith.constant 0 : i32
    %c0_i32_1 = arith.constant 0 : i32
    return %c0_i32, %c0_i32_0 : i32, i32
  }
  func.func @transform_9(%arg0: i32) -> (i32, i32, i32) {
    %c0_i32 = arith.constant 0 : i32
    %c0_i32_0 = arith.constant 0 : i32
    %c0_i32_1 = arith.constant 0 : i32
    %c0_i32_2 = arith.constant 0 : i32
    return %c0_i32, %c0_i32_0, %c0_i32_1 : i32, i32, i32
  }
  func.func @transform_10(%arg0: i32) -> (i32, i32) {
    %c0_i32 = arith.constant 0 : i32
    %c0_i32_0 = arith.constant 0 : i32
    %c0_i32_1 = arith.constant 0 : i32
    return %c0_i32, %c0_i32_0 : i32, i32
  }
  func.func @transform_11(%arg0: i32) -> (i32, i32, i32) {
    %c0_i32 = arith.constant 0 : i32
    %c0_i32_0 = arith.constant 0 : i32
    %c0_i32_1 = arith.constant 0 : i32
    %c0_i32_2 = arith.constant 0 : i32
    return %c0_i32, %c0_i32_0, %c0_i32_1 : i32, i32, i32
  }
  func.func @transform_12(%arg0: i32) -> (i32, i32) {
    %c0_i32 = arith.constant 0 : i32
    %c0_i32_0 = arith.constant 0 : i32
    %c0_i32_1 = arith.constant 0 : i32
    return %c0_i32, %c0_i32_0 : i32, i32
  }
  func.func @transform_13(%arg0: i32) -> (i32, i32, i32) {
    %c0_i32 = arith.constant 0 : i32
    %c0_i32_0 = arith.constant 0 : i32
    %c0_i32_1 = arith.constant 0 : i32
    %c0_i32_2 = arith.constant 0 : i32
    return %c0_i32, %c0_i32_0, %c0_i32_1 : i32, i32, i32
  }
  func.func @transform_14(%arg0: i32) -> (i32, i32) {
    %c0_i32 = arith.constant 0 : i32
    %c0_i32_0 = arith.constant 0 : i32
    %c0_i32_1 = arith.constant 0 : i32
    return %c0_i32, %c0_i32_0 : i32, i32
  }
  func.func @transform_15(%arg0: i32) -> (i32, i32, i32) {
    %c0_i32 = arith.constant 0 : i32
    %c0_i32_0 = arith.constant 0 : i32
    %c0_i32_1 = arith.constant 0 : i32
    %c0_i32_2 = arith.constant 0 : i32
    return %c0_i32, %c0_i32_0, %c0_i32_1 : i32, i32, i32
  }
  func.func @transform_16(%arg0: i32) -> (i32, i32) {
    %c0_i32 = arith.constant 0 : i32
    %c0_i32_0 = arith.constant 0 : i32
    %c0_i32_1 = arith.constant 0 : i32
    return %c0_i32, %c0_i32_0 : i32, i32
  }
  func.func @transform_17(%arg0: i32) -> (i32, i32) {
    %c0_i32 = arith.constant 0 : i32
    %c0_i32_0 = arith.constant 0 : i32
    %c0_i32_1 = arith.constant 0 : i32
    return %c0_i32, %c0_i32_0 : i32, i32
  }
  func.func @transform_18(%arg0: i32) -> (i32, i32) {
    %c0_i32 = arith.constant 0 : i32
    %c0_i32_0 = arith.constant 0 : i32
    %c0_i32_1 = arith.constant 0 : i32
    return %c0_i32, %c0_i32_0 : i32, i32
  }
  func.func @transform_19(%arg0: i32) -> (i32, i32) {
    %c0_i32 = arith.constant 0 : i32
    %c0_i32_0 = arith.constant 0 : i32
    %c0_i32_1 = arith.constant 0 : i32
    return %c0_i32, %c0_i32_0 : i32, i32
  }
  func.func @transform_20(%arg0: i32) -> (i32, i32, i32) {
    %c0_i32 = arith.constant 0 : i32
    %c0_i32_0 = arith.constant 0 : i32
    %c0_i32_1 = arith.constant 0 : i32
    return %arg0, %c0_i32, %c0_i32_0 : i32, i32, i32
  }
}

</mosaic_0001>

<bundles_post_ra>
// kernel: tpu_custom_call.1
= control target key start
LH: loop header
LB: loop body
LE: loop exit
PB: predicated region body
PF: predicated region fallthrough
CT: control target
= control target key end

     0   :  { %s5239_s0 = inlined_call_operand.vmem [shape: bf16[2,32,256], index: 0, kind: input, shape index: {}]   ;;  %s5240_s1 = inlined_call_operand.vmem [shape: bf16[1,4,32], index: 1, kind: input, shape index: {}]   ;;  %s5241_s2 = inlined_call_operand.vmem [shape: f32[4,1], index: 2, kind: input, shape index: {}]   ;;  %s5242_s3 = inlined_call_operand.vmem [shape: bf16[3,6,4], index: 3, kind: input, shape index: {}]   ;;  %s5243_s4 = inlined_call_operand.vmem [shape: f32[6,1], index: 4, kind: input, shape index: {}]   ;;  %s5244_s5 = inlined_call_operand.vmem [shape: bf16[3,6,6], index: 5, kind: input, shape index: {}]   ;;  %s5245_s6 = inlined_call_operand.vmem [shape: f32[6,1], index: 6, kind: input, shape index: {}]   ;;  %s5246_s7 = inlined_call_operand.vmem [shape: f32[9,6,1], index: 7, kind: input, shape index: {}]   ;;  %s5247_s8 = inlined_call_operand.vmem [shape: f32[6,1], index: 8, kind: input, shape index: {}]   ;;  %s5248_s9 = inlined_call_operand.vmem [shape: bf16[1,4,32], index: 9, kind: input, shape index: {}]   ;;  %s5249_s10 = inlined_call_operand.vmem [shape: f32[4,1], index: 10, kind: input, shape index: {}]   ;;  %s5250_s11 = inlined_call_operand.vmem [shape: bf16[9,6,4], index: 11, kind: input, shape index: {}]   ;;  %s5251_s12 = inlined_call_operand.vmem [shape: f32[6,1], index: 12, kind: input, shape index: {}]   ;;  %s5252_s13 = inlined_call_operand.vmem [shape: bf16[9,6,6], index: 13, kind: input, shape index: {}]   ;;  %s5253_s14 = inlined_call_operand.vmem [shape: f32[6,1], index: 14, kind: input, shape index: {}]   ;;  %s5254_s15 = inlined_call_operand.vmem [shape: f32[9,6,1], index: 15, kind: input, shape index: {}]   ;;  %s5255_s16 = inlined_call_operand.vmem [shape: f32[6,1], index: 16, kind: input, shape index: {}]   ;;  %s5256_s17 = inlined_call_operand.vmem [shape: bf16[32,6], index: 17, kind: input, shape index: {}]   ;;  %s5257_s18 = inlined_call_operand.vmem [shape: bf16[32,6], index: 18, kind: input, shape index: {}]   ;;  %s5258_s19 = inlined_call_operand.vmem [shape: f32[32,1], index: 19, kind: input, shape index: {}]   ;;  %s5259_s20 = inlined_call_operand.hbm [shape: f32[2,32,256], index: 20, kind: output, shape index: {}]  }
   0x1   :  { %5283 = sst [smem:[#allocation9_spill]] %s5239_s0 }
   0x2   :  { %5284 = sst [smem:[#allocation10_spill]] %s5240_s1 }
   0x3   :  { %5285 = sst [smem:[#allocation11_spill]] %s5241_s2 }
   0x4   :  { %5286 = sst [smem:[#allocation12_spill]] %s5242_s3 }
   0x5   :  { %5287 = sst [smem:[#allocation13_spill]] %s5243_s4 }
   0x6   :  { %5288 = sst [smem:[#allocation14_spill]] %s5244_s5 }
   0x7   :  { %5289 = sst [smem:[#allocation15_spill]] %s5245_s6 }
   0x8   :  { %5290 = sst [smem:[#allocation16_spill]] %s5248_s9 }
   0x9   :  { %5291 = sst [smem:[#allocation17_spill]] %s5249_s10 }
   0xa   :  { %25 = vsyncpa [#allocation5], 0 }
   0xb   :  { %27 = vsyncpa [#allocation5 + $0x1], 0  ;;  %s4277_s1 = smov 0   ;;  %s4279_s22 = smov 0  }
   0xc   :  { %s4281_s23 = smov 0   ;;  %s4283_s24 = smov 0  }
   0xd LB: > { %5292 = sst [smem:[#allocation7_spill]] %s4129_s23  ;;  %s4298_s2 = sadd.s32 4294967295, %s4133_s24   ;;  %s4133_s24 = sphi %s4283_s24, %s5320_s24   ;;  %s4129_s23 = sphi %s4281_s23, %s5317_s23   ;;  %s4125_s22 = sphi %s4279_s22, %s5319_s22   ;;  %s4121_s1 = sphi %s4277_s1, %s5318_s1  }
   0xe   : > { %s3776_s25 = sadd.s32 4294967294, %s4133_s24   ;;  %s4302_s3 = sadd.s32 1, %s4133_s24  }
   0xf   : > { %s465_s26 = sadd.s32 1, %s4129_s23  ;;  %s462_s27 = ssub.s32 %s4133_s24, %s4302_s3 }
  0x10   : > { %p475_p0 = scmp.ne.s32.totalorder %s4129_s23, %s4125_s22  ;;  %p463_p1 = scmp.eq.s32.totalorder %s462_s27, 0 }
  0x11   : > { %p476_p2 = scmp.eq.s32.totalorder %s4298_s2, 1  ;;  %p481_p3 = scmp.ne.s32.totalorder %s4125_s22, %s4121_s1 }
  0x12   : > { %p482_p4 = scmp.eq.s32.totalorder %s3776_s25, 1  ;;  %p3779_p7 = scmp.ge.s32.totalorder %s4133_s24, 1 }
  0x13   : > { %s4313_s28 = scalar_select %p463_p1, %s4129_s23, %s465_s26  }
  0x14   : > { %p4315_p5 = por %p476_p2, %p475_p0  ;;  %p4319_p6 = por %p482_p4, %p481_p3 }
  0x15   : > { %5293 = sst [smem:[#allocation8_spill]] %s4313_s28  ;;  %p565_p8 = scmp.lt.s32.totalorder %s4133_s24, 3 }
  0x17   : > { %p566_p9 = pnand %p3779_p7, %p565_p8 }
  0x18   : > { %p623_p10 = scmp.lt.s32.totalorder (!%p566_p9), %s4298_s2, 1  ;;  %v633_v0 = vlaneseq (!%p566_p9)  ;;  %v4135_v1 = vmov (!%p566_p9), 0   ;;  %s5296_s21 = sld [smem:[#allocation11_spill]] (!%p566_p9)  ;;  %v4136_v4 = vmov (!%p566_p9), 1983009808   ;;  %v4137_v17 = vmov (!%p566_p9), 0.0  }
  0x19   : > { %569 = sbr.rel (%p566_p9) target bundleno = 2332 (0x91c), region = 100  ;;  %775 = vmatprep.mubr.bf16.mxu0 (!%p566_p9), %v4135_v1  ;;  %629 = vst [vmem:[#allocation2] sm:$0x3] (!%p566_p9), %v4135_v1  ;;  %630 = vst [vmem:[#allocation2 + $0x6] sm:$0x3] (!%p566_p9), %v4135_v1  ;;  %4043 = vset.pattern.permute.xlu0 (!%p566_p9), %v4135_v1  ;;  %v805_v5 = vunpack.c.l.s4 (!%p566_p9), %v4136_v4  ;;  %s5297_s23 = sld [smem:[#allocation9_spill]] (!%p566_p9) }
  0x1a   : > { %631 = vst [vmem:[#allocation3] sm:$0x7] (!%p566_p9), %v4135_v1  ;;  %632 = vst [vmem:[#allocation3 + $0xc] sm:$0x7] (!%p566_p9), %v4135_v1  ;;  %v634_v3 = vand.u32 (!%p566_p9), 127, %v633_v0  ;;  %892 = vmatprep.mubr.bf16.mxu1 (!%p566_p9), %v4135_v1  ;;  %4044 = vset.pattern.permute.xlu1 (!%p566_p9), %v4135_v1  ;;  %v808_v9 = vshrl.u32 (!%p566_p9), %v633_v0, 7 }
  0x1b   : > { %v806_v8 = vunpack.c.0.s8 (!%p566_p9), %v805_v5  ;;  %s5298_s0 = sld [smem:[#allocation10_spill]] (!%p566_p9)  ;;  %vm739_vm4 = vcmask (!%p566_p9), 261120   ;;  %vm833_vm5 = vcmask (!%p566_p9), 7168   ;;  %vm814_vm6 = vcmask (!%p566_p9), 1039360   ;;  %s5301_s27 = sld [smem:[#allocation13_spill]] (!%p566_p9) }
  0x1c   : > { %v635_v6 = vadd.s32 (!%p566_p9), 128, %v634_v3  ;;  %v4338_v7 = vand.u32 (!%p566_p9), 15, %v634_v3  ;;  %vm853_vm7 = vcmask (!%p566_p9), 1041408   ;;  %vm849_vm8 = vcmask (!%p566_p9), 31744   ;;  %s5302_s10 = sld [smem:[#allocation17_spill]] (!%p566_p9)  ;;  %s5303_s5 = sld [smem:[#allocation14_spill]] (!%p566_p9) }
  0x1d   : > { %v4362_v21 = vsub.s32 (!%p566_p9), %v806_v8, %v808_v9  ;;  %vm1090_vm9 = vcmask (!%p566_p9), 1042432   ;;  %vm1086_vm10 = vcmask (!%p566_p9), 48128   ;;  %vm1152_vm11 = vcmask (!%p566_p9), 130048   ;;  %s5304_s9 = sld [smem:[#allocation16_spill]] (!%p566_p9)  ;;  %s5310_s6 = sld [smem:[#allocation15_spill]] (!%p566_p9) }
  0x1e   : > { %v713_v2 = vld [vmem:[%s5296_s21] sm:$0xf] (!%p566_p9)  ;;  %v4348_v13 = vand.u32 (!%p566_p9), 15, %v635_v6  ;;  %vm660_vm0 = vcmp.lt.s32.totalorder (!%p566_p9), %v4338_v7, 15  ;;  %vm668_vm1 = vcmp.ge.s32.totalorder (!%p566_p9), %v4338_v7, 1  ;;  %s5264_s21 = smov (!%p566_p9), 1  }
  0x1f   : > { %716 = vperm.xlu0 (!%p566_p9), %4043, %v713_v2   ;;  %v3783_v18 = vsel (!%p566_p9), %vm660_vm0, 1.0, %v4137_v17  ;;  %v3785_v19 = vsel (!%p566_p9), %vm668_vm1, 1.0, %v4137_v17  ;;  %vm1216_vm12 = vcmask (!%p566_p9), 916480   ;;  %vm1689_vm13 = vcmask (!%p566_p9), 908288  }
  0x20   : > { %s624_s25 = scalar_select %p623_p10, %s4298_s2, 1  ;;  %vm661_vm2 = vcmp.lt.s32.totalorder %v4348_v13, 15  ;;  %vm669_vm3 = vcmp.ge.s32.totalorder %v4348_v13, 1  ;;  %vm1696_vm14 = vcmask 924672   ;;  %vm1707_vm15 = vcmask 121856  }
  0x21   : > { %v3784_v22 = vsel %vm661_vm2, 1.0, %v4137_v17  ;;  %v3786_v23 = vsel %vm669_vm3, 1.0, %v4137_v17  ;;  %v712_v29 = vld [vmem:[%s5298_s0] sm:$0x3]  ;;  %s5269_s0 = smov 112   ;;  %vm1714_vm0 = vcmask 138240  }
  0x22   : > { %s3948_s26 = sshll.u32 %s624_s25, 5  ;;  %v4371_v25 = vpack.c.bf16 %v3784_v22, %v3783_v18  ;;  %v4373_v26 = vpack.c.bf16 %v3786_v23, %v3785_v19  ;;  %s5262_s25 = smov 127   ;;  %v1055_v62 = vld [vmem:[%s5301_s27] sm:$0x3f]  ;;  %vm676_vm1 = vcmp.lt.s32.totalorder %v4338_v7, 13  ;;  %vm677_vm2 = vcmp.lt.s32.totalorder %v4348_v13, 13 }
  0x23   : > { %s4343_s30 = scalar_lea.vmem %s5297_s23, %s3948_s26  ;;  %s5299_s23 = sld [smem:[#allocation12_spill]]  ;;  %vm692_vm3 = vcmp.lt.s32.totalorder %v4338_v7, 11 }
  0x24   : > { %v708_v10 = vld [vmem:[%s4343_s30] sm:$0xff]  ;;  %v709_v11 = vld [vmem:[%s4343_s30 + $0x8] sm:$0xff]  ;;  %v710_v12 = vld [vmem:[%s4343_s30 + $0x10] sm:$0xff]  ;;  %v4378_v27 = vrot.slane %v4371_v25, %v4362_v21  ;;  %v4382_v28 = vrot.slane %v4373_v26, %v4362_v21  ;;  %s5275_s27 = smov 17   ;;  %s5306_s26 = smov 127  }
  0x25   : > { %v4352_v14 = vcombine.high %v708_v10, %v709_v11  ;;  %v4354_v15 = vcombine.low %v708_v10, %v709_v11  ;;  %v711_v16 = vld [vmem:[%s4343_s30 + $0x18] sm:$0xff] }
  0x26   : > { %v4359_v20 = vcombine.high %v710_v12, %v711_v16  ;;  %v4369_v24 = vcombine.low %v710_v12, %v711_v16  ;;  %830 = vrot.lane.b32.xlu1 %v4378_v27, %s5264_s21  ;;  %811 = vrot.lane.b32.xlu0 %v4382_v28, %s5262_s25 }
  0x27   : > { %743 = vmatprep.subr.bf16.mxu0 %v4352_v14 }
  0x28   : > { %744 = vmatpush1.bf16.msra.mxu0 %v4354_v15 }
  0x29   : > { %745 = vmatprep.subr.bf16.mxu0 %v4359_v20  ;;  %s5300_s28 = smov %s5299_s23  ;;  %v3804_v56 = vld [vmem:[%s5299_s23 + $0x4] sm:$0x7]  ;;  %s5277_s23 = smov 15  }
  0x2a   : > { %v837_v9 = vld [vmem:[%s5300_s28] sm:$0x7]  ;;  %v3810_v18 = vld [vmem:[%s5300_s28 + $0x8] sm:$0x7]  ;;  %s5267_s28 = smov 111  }
  0x2c   : > { %746 = vmatpush1.bf16.msra.mxu0 %v4369_v24 }
  0x2f   : > { %3799 = vmatmul.mubr.msk.bf16.vlgmr.msra.gmra.mrb[0].mxu0 %vm739_vm4, %v712_v29 }
  0x30   : > { %1044 = vmatprep.mubr.bf16.mxu0 %v4135_v1 }
  0x98   : > { %v831_v40 = vpop.permute.xlu1 %830 }
  0x99   : > { %v832_v42 = vrot.slane %v831_v40, 6 }
  0x9b   : > { %v4395_v45 = vsel %vm833_vm5, %v832_v42, %v831_v40 }
  0x9e   : > { %v717_v30 = vpop.permute.xlu0 %716 }
  0xa2   : > { %v812_v41 = vpop.permute.xlu0 %811 }
  0xa3   : > { %v813_v43 = vrot.slane %v812_v41, 6 }
  0xa5   : > { %v4398_v47 = vsel %vm814_vm6, %v813_v43, %v812_v41 }
 0x102   : > { %v777_v31 = vpop.f32.mrb[0].mxu0 }
 0x103   : > { %v778_v32 = vadd.f32 %v777_v31, %v717_v30  ;;  %v779_v33 = vpop.f32.mrb[1].mxu0 }
 0x104   : > { %v780_v34 = vadd.f32 %v779_v33, %v717_v30  ;;  %v781_v35 = vpop.f32.mrb[2].mxu0 }
 0x105   : > { %v784_v36 = vmax.f32 %v778_v32, 0.0  ;;  %v782_v37 = vpop.f32.mrb[3].mxu0 }
 0x106   : > { %v785_v38 = vmax.f32 %v780_v34, 0.0 }
 0x108   : > { %v3800_v39 = vpack.c.bf16 %v785_v38, %v784_v36 }
 0x10a   : > { %3801 = vst.sshfl [vmem:[#allocation2 + $0x2] sm:$0x33 pattern:$0x76325410] %v3800_v39 }
 0x111   : > { %v819_v44 = vld [vmem:[#allocation2 + $0x2] sm:$0x3f] }
 0x112   : > { %v800_v46 = vld [vmem:[#allocation2] sm:$0x3f]  ;;  %v836_v48 = vmul.bf16 %v4395_v45, %v819_v44 }
 0x113   : > { %v817_v49 = vmul.bf16 %v4398_v47, %v800_v46  ;;  %v3805_v50 = vld.sshfl [vmem:[#allocation2 + $0x2] sm:$0x33 pattern:$0x76325410] }
 0x114   : > { %v848_v51 = vcombine.high %v3805_v50, %v3805_v50  ;;  %v986_v52 = vrot.slane %v836_v48, %v4362_v21  ;;  %v855_v54 = vsel %vm853_vm7, %v3805_v50, 0  ;;  %v979_v58 = vcombine.high %v836_v48, %v836_v48 }
 0x115   : > { %v909_v53 = vrot.slane %v817_v49, %v4362_v21  ;;  %v902_v55 = vcombine.high %v817_v49, %v817_v49 }
 0x116   : > { %3806 = vmatprep.subr.msk.bf16.mxu1 %vm853_vm7, %v848_v51  ;;  %995 = vrot.lane.b32.xlu0 %v986_v52, %s5262_s25  ;;  %v993_v60 = vrot.slane %v979_v58, %v4362_v21  ;;  %v994_v61 = vcombine.high %v986_v52, %v986_v52  ;;  %v3814_v58 = vld [vmem:[%s5303_s5 + $0x4] sm:$0x7] }
 0x117   : > { %861 = vmatpush1.bf16.msra.mxu1 %v855_v54  ;;  %918 = vrot.lane.b32.xlu1 %v909_v53, %s5264_s21  ;;  %v917_v57 = vcombine.high %v909_v53, %v909_v53  ;;  %v916_v59 = vrot.slane %v902_v55, %v4362_v21 }
 0x11a   : > { %3807 = vmatmul.mubr.msk.bf16.vlgmr.msra.gmra.mrb[0].mxu1 %vm849_vm8, %v3804_v56  ;;  %920 = vrot.lane.b32.xlu0 %v917_v57, %s5264_s21  ;;  %v1619_v57 = vld [vmem:[%s5302_s10] sm:$0xf]  ;;  %s4157_s10 = smov 43  }
 0x11b   : > { %967 = vmatprep.mubr.bf16.mxu1 %v4135_v1  ;;  %922 = vrot.lane.b32.xlu1 %v916_v59, %s5264_s21  ;;  %s5271_s21 = smov 113  }
 0x11e   : > { %999 = vrot.lane.b32.xlu0 %v993_v60, %s5262_s25  ;;  %v4054_v60 = vld [vmem:[#allocation3 + $0xc] ss:$0 sps:$4 sm:$0x77]  }
 0x11f   : > { %997 = vrot.lane.b32.xlu1 %v994_v61, %s5262_s25  ;;  %s5273_s25 = smov 16  }
 0x123   : > { %1058 = vperm.xlu1 %4044, %v1055_v62  }
 0x188   : > { %v996_v63 = vpop.permute.xlu0 %995 }
 0x189   : > { %v919_v0 = vpop.permute.xlu1 %918 }
 0x18c   : > { %v921_v2 = vpop.permute.xlu0 %920 }
 0x18d   : > { %v924_v3 = vsel %vm833_vm5, %v919_v0, %v921_v2  ;;  %v923_v4 = vpop.permute.xlu1 %922 }
 0x18e   : > { %v925_v5 = vsel %vm833_vm5, %v921_v2, %v923_v4  ;;  %v930_v6 = vsel %vm853_vm7, %v924_v3, 0  ;;  %v1618_v4 = vld [vmem:[%s5304_s9] sm:$0x3]  ;;  %s4152_s9 = smov 45  }
 0x18f   : > { %3808 = vmatprep.subr.msk.bf16.mxu1 %vm853_vm7, %v925_v5 }
 0x190   : > { %936 = vmatpush1.bf16.msra.mxu1 %v930_v6  ;;  %v1000_v8 = vpop.permute.xlu0 %999 }
 0x191   : > { %v998_v10 = vpop.permute.xlu1 %997 }
 0x192   : > { %v1001_v11 = vsel %vm814_vm6, %v996_v63, %v998_v10  ;;  %v1002_v12 = vsel %vm814_vm6, %v998_v10, %v1000_v8 }
 0x193   : > { %3809 = vmatmul.mubr.msk.bf16.vlgmr.msra.gmra.mrb[4].mxu1 %vm849_vm8, %v837_v9  ;;  %3811 = vmatprep.subr.msk.bf16.mxu0 %vm853_vm7, %v1002_v12  ;;  %v1007_v16 = vsel %vm853_vm7, %v1001_v11, 0  ;;  %v3824_v12 = vld [vmem:[%s5303_s5 + $0x8] sm:$0x7] }
 0x194   : > { %1013 = vmatpush1.bf16.msra.mxu0 %v1007_v16  ;;  %1129 = vmatprep.mubr.bf16.mxu1 %v4135_v1 }
 0x197   : > { %3812 = vmatmul.mubr.msk.bf16.vlgmr.msra.gmra.mrb[4].mxu0 %vm849_vm8, %v3810_v18 }
 0x198   : > { %1196 = vmatprep.mubr.bf16.mxu0 %v4135_v1 }
 0x1a2   : > { %v1059_v37 = vpop.permute.xlu1 %1058 }
 0x1ed   : > { %v894_v19 = vpop.f32.mrb[0].mxu1 }
 0x1ee   : > { %v896_v22 = vpop.f32.mrb[1].mxu1 }
 0x1ef   : > { %v898_v23 = vpop.f32.mrb[2].mxu1 }
 0x1f0   : > { %v899_v29 = vpop.f32.mrb[3].mxu1 }
 0x266   : > { %v969_v30 = vpop.f32.mrb[4].mxu1 }
 0x267   : > { %v970_v31 = vadd.f32 %v969_v30, %v894_v19  ;;  %v971_v32 = vpop.f32.mrb[5].mxu1 }
 0x268   : > { %v972_v33 = vadd.f32 %v971_v32, %v896_v22  ;;  %v973_v34 = vpop.f32.mrb[6].mxu1 }
 0x269   : > { %v974_v35 = vpop.f32.mrb[7].mxu1 }
 0x26a   : > { %v1046_v36 = vpop.f32.mrb[4].mxu0 }
 0x26b   : > { %v1053_v38 = vadd.f32 %v1046_v36, %v970_v31  ;;  %v1048_v39 = vpop.f32.mrb[5].mxu0 }
 0x26c   : > { %v1054_v40 = vadd.f32 %v1048_v39, %v972_v33  ;;  %v1050_v41 = vpop.f32.mrb[6].mxu0 }
 0x26d   : > { %v1061_v42 = vadd.f32 %v1059_v37, %v1053_v38  ;;  %v1051_v43 = vpop.f32.mrb[7].mxu0 }
 0x26e   : > { %v1062_v44 = vadd.f32 %v1059_v37, %v1054_v40 }
 0x26f   : > { %v1063_v46 = vmax.f32 %v1061_v42, 0.0 }
 0x270   : > { %v1064_v48 = vmax.f32 %v1062_v44, 0.0 }
 0x272   : > { %v3949_v49 = vpack.c.bf16 %v1064_v48, %v1063_v46 }
 0x274   : > { %1073 = vst [vmem:[#allocation3 + $0x4] sm:$0x77] %v3949_v49 }
 0x27b   : > { %v1076_v50 = vld [vmem:[#allocation3 + $0x4] sm:$0x77] }
 0x27c   : > { %v1074_v51 = vld [vmem:[#allocation3] sm:$0x77]  ;;  %v3816_v52 = vcombine.high %v1076_v50, %v1076_v50  ;;  %v3815_v55 = vcombine.low %v1076_v50, %v1076_v50  ;;  %v4053_v59 = vld [vmem:[#allocation3 + $0x8] ss:$0 sps:$4 sm:$0x77]  }
 0x27d   : > { %v3820_v53 = vcombine.high %v1074_v51, %v1074_v51  ;;  %v3819_v54 = vcombine.low %v1074_v51, %v1074_v51 }
 0x27e   : > { %3817 = vmatprep.subr.msk.bf16.mxu1 %vm1090_vm9, %v3816_v52  ;;  %v1092_v56 = vsel %vm1090_vm9, %v3815_v55, 0 }
 0x27f   : > { %1148 = vrot.lane.b32.xlu1 %v3820_v53, %s5273_s25  ;;  %1146 = vrot.lane.b32.xlu0 %v3819_v54, %s5273_s25 }
 0x280   : > { %1098 = vmatpush1.bf16.msra.mxu1 %v1092_v56 }
 0x283   : > { %1622 = vperm.xlu1 %4044, %v1619_v57   ;;  %3818 = vmatmul.mubr.msk.bf16.vlgmr.msra.gmra.mrb[8].mxu1 %vm1086_vm10, %v3814_v58 }
 0x284   : > { %1150 = vrot.lane.b32.xlu0 %v4053_v59, %s5273_s25  ;;  %1260 = vmatprep.mubr.bf16.mxu1 %v4135_v1 }
 0x287   : > { %1693 = vrot.lane.b32.xlu1 %v4378_v27, %s5271_s21  ;;  %s5307_s21 = smov 113  }
 0x288   : > { %1686 = vrot.lane.b32.xlu0 %v4382_v28, %s5267_s28  ;;  %s5308_s28 = smov 112  }
 0x28b   : > { %1711 = vrot.lane.b32.xlu1 %v4378_v27, %s5275_s27 }
 0x28c   : > { %1704 = vrot.lane.b32.xlu0 %v4382_v28, %s5277_s23  ;;  %v1078_v28 = vld [vmem:[%s5303_s5] sm:$0x7]  ;;  %s4147_s5 = smov 53  }
 0x28f   : > { %1212 = vrot.lane.b32.xlu1 %v3816_v52, %s5269_s0 }
 0x290   : > { %1214 = vrot.lane.b32.xlu0 %v4054_v60, %s5269_s0 }
 0x294   : > { %1210 = vrot.lane.b32.xlu0 %v3815_v55, %s5269_s0  ;;  %s5305_s0 = smov 1  }
 0x2f1   : > { %v1149_v61 = vpop.permute.xlu1 %1148  ;;  %v1147_v62 = vpop.permute.xlu0 %1146 }
 0x2f2   : > { %v1153_v63 = vsel %vm1152_vm11, %v1147_v62, %v1149_v61 }
 0x2f3   : > { %v1159_v2 = vsel %vm1090_vm9, %v1153_v63, 0 }
 0x2f6   : > { %v1151_v0 = vpop.permute.xlu0 %1150 }
 0x2f7   : > { %v1154_v27 = vsel %vm1152_vm11, %v1149_v61, %v1151_v0 }
 0x2f8   : > { %3822 = vmatprep.subr.msk.bf16.mxu0 %vm1090_vm9, %v1154_v27 }
 0x2f9   : > { %1165 = vmatpush1.bf16.msra.mxu0 %v1159_v2 }
 0x2fa   : > { %1628 = vmatprep.subr.bf16.mxu0 %v4352_v14  ;;  %v1687_v3 = vpop.permute.xlu0 %1686 }
 0x2fb   : > { %v1688_v43 = vrot.slane %v1687_v3, 6 }
 0x2fc   : > { %3823 = vmatmul.mubr.msk.bf16.vlgmr.msra.gmra.mrb[8].mxu0 %vm1086_vm10, %v1078_v28 }
 0x2fd   : > { %1629 = vmatpush1.bf16.msra.mxu0 %v4354_v15  ;;  %1660 = vmatprep.mubr.bf16.mxu0 %v4135_v1  ;;  %v1690_v46 = vsel %vm1689_vm13, %v1688_v43, %v1687_v3 }
 0x2fe   : > { %1630 = vmatprep.subr.bf16.mxu0 %v4359_v20  ;;  %v4480_v5 = vpop.permute.xlu0 %1704 }
 0x2ff   : > { %v1706_v59 = vrot.slane %v4480_v5, 6 }
 0x301   : > { %1631 = vmatpush1.bf16.msra.mxu0 %v4369_v24  ;;  %v1708_v2 = vsel %vm1707_vm15, %v1706_v59, %v4480_v5 }
 0x302   : > { %v1623_v6 = vpop.permute.xlu1 %1622  ;;  %v1215_v8 = vpop.permute.xlu0 %1214 }
 0x304   : > { %3839 = vmatmul.mubr.msk.bf16.vlgmr.msra.gmra.mrb[12].mxu0 %vm739_vm4, %v1618_v4 }
 0x305   : > { %1862 = vmatprep.mubr.bf16.mxu0 %v4135_v1 }
 0x306   : > { %v1694_v14 = vpop.permute.xlu1 %1693  ;;  %v1211_v9 = vpop.permute.xlu0 %1210 }
 0x307   : > { %v1695_v44 = vrot.slane %v1694_v14, 6 }
 0x309   : > { %v1697_v52 = vsel %vm1696_vm14, %v1695_v44, %v1694_v14 }
 0x30a   : > { %v4484_v15 = vpop.permute.xlu1 %1711 }
 0x30e   : > { %v1213_v20 = vpop.permute.xlu1 %1212 }
 0x30f   : > { %v1217_v24 = vsel %vm1216_vm12, %v1211_v9, %v1213_v20  ;;  %v1218_v10 = vsel %vm1216_vm12, %v1213_v20, %v1215_v8 }
 0x310   : > { %3826 = vmatprep.subr.msk.bf16.mxu1 %vm1090_vm9, %v1218_v10  ;;  %v1223_v11 = vsel %vm1090_vm9, %v1217_v24, 0 }
 0x311   : > { %1229 = vmatpush1.bf16.msra.mxu1 %v1223_v11 }
 0x314   : > { %3827 = vmatmul.mubr.msk.bf16.vlgmr.msra.gmra.mrb[12].mxu1 %vm1086_vm10, %v3824_v12 }
 0x315   : > { %1787 = vmatprep.mubr.bf16.mxu1 %v4135_v1 }
 0x356   : > { %v1131_v16 = vpop.f32.mrb[8].mxu1 }
 0x357   : > { %v1133_v18 = vpop.f32.mrb[9].mxu1 }
 0x358   : > { %v1135_v19 = vpop.f32.mrb[10].mxu1 }
 0x359   : > { %v1136_v22 = vpop.f32.mrb[11].mxu1  ;;  %v1713_v19 = vrot.slane %v4484_v15, 6 }
 0x3cf   : > { %v1198_v23 = vpop.f32.mrb[8].mxu0 }
 0x3d0   : > { %v1199_v29 = vadd.f32 %v1198_v23, %v1131_v16  ;;  %v1200_v30 = vpop.f32.mrb[9].mxu0 }
 0x3d1   : > { %v1201_v31 = vadd.f32 %v1200_v30, %v1133_v18  ;;  %v1202_v32 = vpop.f32.mrb[10].mxu0 }
 0x3d2   : > { %v1203_v33 = vpop.f32.mrb[11].mxu0 }
 0x3d7   : > { %v1662_v34 = vpop.f32.mrb[12].mxu0 }
 0x3d8   : > { %v1663_v35 = vadd.f32 %v1662_v34, %v1623_v6  ;;  %v1664_v36 = vpop.f32.mrb[13].mxu0 }
 0x3d9   : > { %v1665_v37 = vadd.f32 %v1664_v36, %v1623_v6  ;;  %v1666_v38 = vpop.f32.mrb[14].mxu0 }
 0x3da   : > { %v1669_v39 = vmax.f32 %v1663_v35, 0.0  ;;  %v1667_v40 = vpop.f32.mrb[15].mxu0 }
 0x3db   : > { %v1670_v41 = vmax.f32 %v1665_v37, 0.0  ;;  %v1271_v40 = vld [vmem:[%s5310_s6] sm:$0x3f]  ;;  %s5313_s6 = smov 16  }
 0x3dd   : > { %v3840_v42 = vpack.c.bf16 %v1670_v41, %v1669_v39  ;;  %v2408_v41 = vld [vmem:[%s5251_s12] sm:$0x3f] }
 0x3df   : > { %3841 = vst.sshfl [vmem:[#allocation2 + $0x2] sm:$0x33 pattern:$0x76325410] %v3840_v42 }
 0x3e6   : > { %v1685_v48 = vld [vmem:[#allocation2] sm:$0x3f] }
 0x3e7   : > { %v1262_v49 = vpop.f32.mrb[12].mxu1  ;;  %v1729_v50 = vrot.slane %v1685_v48, %v4362_v21  ;;  %v1722_v51 = vcombine.high %v1685_v48, %v1685_v48  ;;  %v1692_v57 = vmul.bf16 %v1690_v46, %v1685_v48  ;;  %v1699_v62 = vmul.bf16 %v1697_v52, %v1685_v48  ;;  %v1702_v63 = vld [vmem:[#allocation2 + $0x2] sm:$0x3f] }
 0x3e8   : > { %v4498_v53 = vadd.f32 %v1262_v49, %v1199_v29  ;;  %v1264_v54 = vpop.f32.mrb[13].mxu1  ;;  %v1700_v27 = vmul.bf16 %v1685_v48, %v4398_v47  ;;  %v1703_v3 = vmul.bf16 %v1702_v63, %v4395_v45  ;;  %v1710_v6 = vmul.bf16 %v1708_v2, %v1702_v63 }
 0x3e9   : > { %1738 = vrot.lane.b32.xlu1 %v1729_v50, %s5273_s25  ;;  %v4501_v55 = vadd.f32 %v1264_v54, %v1201_v31  ;;  %v1737_v56 = vcombine.high %v1729_v50, %v1729_v50  ;;  %v1266_v58 = vpop.f32.mrb[14].mxu1  ;;  %v1736_v61 = vrot.slane %v1722_v51, %v4362_v21  ;;  %v1804_v0 = vrot.slane %v1692_v57, %v4362_v21 }
 0x3ea   : > { %v1267_v60 = vpop.f32.mrb[15].mxu1  ;;  %v1881_v28 = vrot.slane %v1699_v62, %v4362_v21  ;;  %v1960_v4 = vrot.slane %v1700_v27, %v4362_v21  ;;  %v2102_v14 = vrot.slane %v1703_v3, %v4362_v21  ;;  %v2181_v47 = vrot.slane %v1710_v6, %v4362_v21 }
 0x3eb   : > { %1740 = vrot.lane.b32.xlu0 %v1737_v56, %s5273_s25  ;;  %v1797_v5 = vcombine.high %v1692_v57, %v1692_v57  ;;  %v1812_v8 = vcombine.high %v1804_v0, %v1804_v0  ;;  %v1874_v9 = vcombine.high %v1699_v62, %v1699_v62  ;;  %v1953_v10 = vcombine.high %v1700_v27, %v1700_v27  ;;  %v3854_v62 = vld.sshfl [vmem:[#allocation2 + $0x2] sm:$0x33 pattern:$0x76325410] }
 0x3ec   : > { %v1889_v24 = vcombine.high %v1881_v28, %v1881_v28  ;;  %v1968_v11 = vcombine.high %v1960_v4, %v1960_v4  ;;  %v2260_v16 = vrot.slane %v1702_v63, %v4362_v21  ;;  %v2095_v18 = vcombine.high %v1703_v3, %v1703_v3 }
 0x3ed   : > { %1742 = vrot.lane.b32.xlu1 %v1736_v61, %s5273_s25  ;;  %v1811_v45 = vrot.slane %v1797_v5, %v4362_v21  ;;  %v1888_v20 = vrot.slane %v1874_v9, %v4362_v21  ;;  %v1967_v12 = vrot.slane %v1953_v10, %v4362_v21  ;;  %v1715_v29 = vsel %vm1714_vm0, %v1713_v19, %v4484_v15  ;;  %s5309_s25 = smov 111   ;;  %v1718_v61 = vld [vmem:[%s5250_s11] sm:$0x7]  ;;  %v3853_v10 = vld [vmem:[%s5250_s11 + $0x10] sm:$0x7] }
 0x3ee   : > { %v2268_v22 = vcombine.high %v2260_v16, %v2260_v16  ;;  %v2109_v23 = vrot.slane %v2095_v18, %v4362_v21  ;;  %v2110_v30 = vcombine.high %v2102_v14, %v2102_v14  ;;  %v2174_v31 = vcombine.high %v1710_v6, %v1710_v6  ;;  %v3847_v6 = vld [vmem:[%s5250_s11 + $0x8] sm:$0x7] }
 0x3ef   : > { %1813 = vrot.lane.b32.xlu0 %v1804_v0, %s5275_s27  ;;  %v2189_v32 = vcombine.high %v2181_v47, %v2181_v47  ;;  %v2253_v33 = vcombine.high %v1702_v63, %v1702_v63  ;;  %v1717_v34 = vmul.bf16 %v1715_v29, %v1702_v63  ;;  %v2039_v3 = vcombine.high %v3854_v62, %v3854_v62 }
 0x3f0   : > { %v2188_v35 = vrot.slane %v2174_v31, %v4362_v21  ;;  %v2044_v9 = vsel %vm853_vm7, %v3854_v62, 0 }
 0x3f1   : > { %1890 = vrot.lane.b32.xlu1 %v1881_v28, %s5277_s23  ;;  %v2267_v36 = vrot.slane %v2253_v33, %v4362_v21  ;;  %v2339_v37 = vrot.slane %v1717_v34, %v4362_v21  ;;  %v2332_v15 = vcombine.high %v1717_v34, %v1717_v34 }
 0x3f3   : > { %1969 = vrot.lane.b32.xlu0 %v1960_v4, %s5305_s0  ;;  %v2347_v38 = vcombine.high %v2339_v37, %v2339_v37  ;;  %v2346_v39 = vrot.slane %v2332_v15, %v4362_v21 }
 0x3f5   : > { %2111 = vrot.lane.b32.xlu1 %v2102_v14, %s5306_s26 }
 0x3f7   : > { %2190 = vrot.lane.b32.xlu0 %v2181_v47, %s5307_s21 }
 0x3f9   : > { %1815 = vrot.lane.b32.xlu1 %v1812_v8, %s5275_s27 }
 0x3fb   : > { %1817 = vrot.lane.b32.xlu0 %v1811_v45, %s5275_s27  ;;  %s5311_s27 = smov 15   ;;  %v3850_v45 = vld [vmem:[%s5250_s11 + $0xc] sm:$0x7] }
 0x3fd   : > { %1894 = vrot.lane.b32.xlu1 %v1888_v20, %s5277_s23 }
 0x3ff   : > { %1892 = vrot.lane.b32.xlu0 %v1889_v24, %s5277_s23  ;;  %s5312_s23 = smov 17  }
 0x401   : > { %1971 = vrot.lane.b32.xlu1 %v1968_v11, %s5305_s0 }
 0x403   : > { %1973 = vrot.lane.b32.xlu0 %v1967_v12, %s5305_s0 }
 0x405   : > { %2269 = vrot.lane.b32.xlu1 %v2260_v16, %s5308_s28 }
 0x407   : > { %2271 = vrot.lane.b32.xlu0 %v2268_v22, %s5308_s28 }
 0x409   : > { %2115 = vrot.lane.b32.xlu1 %v2109_v23, %s5306_s26  ;;  %v3857_v23 = vld [vmem:[%s5250_s11 + $0x14] sm:$0x7] }
 0x40b   : > { %2113 = vrot.lane.b32.xlu0 %v2110_v30, %s5306_s26 }
 0x40d   : > { %2192 = vrot.lane.b32.xlu1 %v2189_v32, %s5307_s21 }
 0x40f   : > { %2194 = vrot.lane.b32.xlu0 %v2188_v35, %s5307_s21  ;;  %v3860_v35 = vld [vmem:[%s5250_s11 + $0x18] sm:$0x7] }
 0x411   : > { %2273 = vrot.lane.b32.xlu1 %v2267_v36, %s5308_s28 }
 0x413   : > { %2348 = vrot.lane.b32.xlu0 %v2339_v37, %s5309_s25 }
 0x415   : > { %2350 = vrot.lane.b32.xlu1 %v2347_v38, %s5309_s25 }
 0x417   : > { %2352 = vrot.lane.b32.xlu0 %v2346_v39, %s5309_s25  ;;  %v3863_v39 = vld [vmem:[%s5250_s11 + $0x1c] sm:$0x7] }
 0x419   : > { %1274 = vperm.xlu1 %4044, %v1271_v40  }
 0x41b   : > { %2411 = vperm.xlu0 %4043, %v2408_v41  }
 0x41d   : > { %2432 = vrot.lane.b32.xlu1 %v4373_v26, %s5309_s25 }
 0x41f   : > { %2443 = vrot.lane.b32.xlu0 %v4371_v25, %s5307_s21 }
 0x421   : > { %2451 = vrot.lane.b32.xlu1 %v4373_v26, %s5306_s26 }
 0x423   : > { %2461 = vrot.lane.b32.xlu0 %v4371_v25, %s5305_s0 }
 0x425   : > { %2469 = vrot.lane.b32.xlu1 %v4373_v26, %s5311_s27  ;;  %v3842_v26 = vld [vmem:[%s5250_s11 + $0x4] sm:$0x7] }
 0x427   : > { %2477 = vrot.lane.b32.xlu0 %v4371_v25, %s5312_s23 }
 0x45b   : > { %v1739_v21 = vpop.permute.xlu1 %1738 }
 0x45d   : > { %v1741_v42 = vpop.permute.xlu0 %1740 }
 0x45e   : > { %v1744_v43 = vsel %vm1152_vm11, %v1739_v21, %v1741_v42 }
 0x45f   : > { %v1743_v44 = vpop.permute.xlu1 %1742  ;;  %v1750_v49 = vsel %vm853_vm7, %v1744_v43, 0 }
 0x460   : > { %v1745_v46 = vsel %vm1152_vm11, %v1741_v42, %v1743_v44  ;;  %v3866_v42 = vld [vmem:[%s5250_s11 + $0x20] sm:$0x7] }
 0x461   : > { %3843 = vmatprep.subr.msk.bf16.mxu1 %vm853_vm7, %v1745_v46  ;;  %v1814_v48 = vpop.permute.xlu0 %1813 }
 0x462   : > { %1756 = vmatpush1.bf16.msra.mxu1 %v1750_v49 }
 0x463   : > { %v1891_v50 = vpop.permute.xlu1 %1890 }
 0x465   : > { %v1970_v51 = vpop.permute.xlu0 %1969  ;;  %3844 = vmatmul.mubr.msk.bf16.vlgmr.msra.gmra.mrb[16].mxu1 %vm849_vm8, %v3842_v26 }
 0x466   : > { %1939 = vmatprep.mubr.bf16.mxu1 %v4135_v1 }
 0x467   : > { %v2112_v25 = vpop.permute.xlu1 %2111 }
 0x469   : > { %v2191_v52 = vpop.permute.xlu0 %2190 }
 0x46b   : > { %v1816_v54 = vpop.permute.xlu1 %1815 }
 0x46c   : > { %v1819_v56 = vsel %vm1714_vm0, %v1814_v48, %v1816_v54 }
 0x46d   : > { %v1818_v57 = vpop.permute.xlu0 %1817  ;;  %v1825_v60 = vsel %vm853_vm7, %v1819_v56, 0 }
 0x46e   : > { %v1820_v58 = vsel %vm1714_vm0, %v1816_v54, %v1818_v57  ;;  %v4662_v57 = vld [vmem:[#allocation3 + $0xc] sm:$0x7] }
 0x46f   : > { %v1895_v59 = vpop.permute.xlu1 %1894  ;;  %3845 = vmatprep.subr.msk.bf16.mxu0 %vm853_vm7, %v1820_v58 }
 0x470   : > { %1831 = vmatpush1.bf16.msra.mxu0 %v1825_v60 }
 0x471   : > { %v1893_v63 = vpop.permute.xlu0 %1892 }
 0x472   : > { %v1896_v0 = vsel %vm1707_vm15, %v1891_v50, %v1893_v63  ;;  %v1897_v27 = vsel %vm1707_vm15, %v1893_v63, %v1895_v59 }
 0x473   : > { %v1972_v2 = vpop.permute.xlu1 %1971  ;;  %3846 = vmatmul.mubr.msk.bf16.vlgmr.msra.gmra.mrb[16].mxu0 %vm849_vm8, %v1718_v61  ;;  %3848 = vmatprep.subr.msk.bf16.mxu1 %vm853_vm7, %v1897_v27  ;;  %v1902_v28 = vsel %vm853_vm7, %v1896_v0, 0 }
 0x474   : > { %v1975_v4 = vsel %vm833_vm5, %v1970_v51, %v1972_v2  ;;  %1908 = vmatpush1.bf16.msra.mxu1 %v1902_v28  ;;  %2018 = vmatprep.mubr.bf16.mxu0 %v4135_v1 }
 0x475   : > { %3855 = vmatprep.subr.msk.bf16.mxu1 %vm853_vm7, %v2039_v3  ;;  %v1974_v14 = vpop.permute.xlu0 %1973  ;;  %v1981_v8 = vsel %vm853_vm7, %v1975_v4, 0 }
 0x476   : > { %v1976_v47 = vsel %vm833_vm5, %v1972_v2, %v1974_v14 }
 0x477   : > { %v2270_v5 = vpop.permute.xlu1 %2269  ;;  %3849 = vmatmul.mubr.msk.bf16.vlgmr.msra.gmra.mrb[20].mxu1 %vm849_vm8, %v3847_v6  ;;  %3851 = vmatprep.subr.msk.bf16.mxu0 %vm853_vm7, %v1976_v47 }
 0x478   : > { %1987 = vmatpush1.bf16.msra.mxu0 %v1981_v8  ;;  %2050 = vmatpush1.bf16.msra.mxu1 %v2044_v9 }
 0x479   : > { %v2272_v20 = vpop.permute.xlu0 %2271  ;;  %2081 = vmatprep.mubr.bf16.mxu1 %v4135_v1 }
 0x47a   : > { %v2275_v30 = vsel %vm1216_vm12, %v2270_v5, %v2272_v20 }
 0x47b   : > { %v2116_v24 = vpop.permute.xlu1 %2115  ;;  %3852 = vmatmul.mubr.msk.bf16.vlgmr.msra.gmra.mrb[20].mxu0 %vm849_vm8, %v3850_v45  ;;  %v2281_v37 = vsel %vm853_vm7, %v2275_v30, 0 }
 0x47c   : > { %2160 = vmatprep.mubr.bf16.mxu0 %v4135_v1 }
 0x47d   : > { %v2114_v11 = vpop.permute.xlu0 %2113 }
 0x47e   : > { %v2117_v12 = vsel %vm814_vm6, %v2112_v25, %v2114_v11  ;;  %v2118_v16 = vsel %vm814_vm6, %v2114_v11, %v2116_v24 }
 0x47f   : > { %v2193_v18 = vpop.permute.xlu1 %2192  ;;  %3856 = vmatmul.mubr.msk.bf16.vlgmr.msra.gmra.mrb[24].mxu1 %vm849_vm8, %v3853_v10  ;;  %3858 = vmatprep.subr.msk.bf16.mxu0 %vm853_vm7, %v2118_v16  ;;  %v2123_v19 = vsel %vm853_vm7, %v2117_v12, 0 }
 0x480   : > { %v2196_v22 = vsel %vm1696_vm14, %v2191_v52, %v2193_v18  ;;  %2129 = vmatpush1.bf16.msra.mxu0 %v2123_v19  ;;  %2239 = vmatprep.mubr.bf16.mxu1 %v4135_v1 }
 0x481   : > { %v2195_v29 = vpop.permute.xlu0 %2194  ;;  %v2202_v33 = vsel %vm853_vm7, %v2196_v22, 0 }
 0x482   : > { %v2197_v31 = vsel %vm1696_vm14, %v2193_v18, %v2195_v29 }
 0x483   : > { %v2274_v32 = vpop.permute.xlu1 %2273  ;;  %3859 = vmatmul.mubr.msk.bf16.vlgmr.msra.gmra.mrb[24].mxu0 %vm849_vm8, %v3857_v23  ;;  %3861 = vmatprep.subr.msk.bf16.mxu1 %vm853_vm7, %v2197_v31 }
 0x484   : > { %v2276_v34 = vsel %vm1216_vm12, %v2272_v20, %v2274_v32  ;;  %2208 = vmatpush1.bf16.msra.mxu1 %v2202_v33  ;;  %2318 = vmatprep.mubr.bf16.mxu0 %v4135_v1 }
 0x485   : > { %3864 = vmatprep.subr.msk.bf16.mxu0 %vm853_vm7, %v2276_v34  ;;  %v2349_v36 = vpop.permute.xlu0 %2348 }
 0x486   : > { %2287 = vmatpush1.bf16.msra.mxu0 %v2281_v37 }
 0x487   : > { %v2351_v15 = vpop.permute.xlu1 %2350  ;;  %3862 = vmatmul.mubr.msk.bf16.vlgmr.msra.gmra.mrb[28].mxu1 %vm849_vm8, %v3860_v35 }
 0x488   : > { %v2354_v38 = vsel %vm1689_vm13, %v2349_v36, %v2351_v15  ;;  %2397 = vmatprep.mubr.bf16.mxu1 %v4135_v1 }
 0x489   : > { %v2353_v40 = vpop.permute.xlu0 %2352  ;;  %v2360_v21 = vsel %vm853_vm7, %v2354_v38, 0 }
 0x48a   : > { %v2355_v41 = vsel %vm1689_vm13, %v2351_v15, %v2353_v40 }
 0x48b   : > { %3865 = vmatmul.mubr.msk.bf16.vlgmr.msra.gmra.mrb[28].mxu0 %vm849_vm8, %v3863_v39  ;;  %3867 = vmatprep.subr.msk.bf16.mxu1 %vm853_vm7, %v2355_v41  ;;  %vm693_vm7 = vcmp.lt.s32.totalorder %v4348_v13, 11 }
 0x48c   : > { %2366 = vmatpush1.bf16.msra.mxu1 %v2360_v21  ;;  %2545 = vmatprep.mubr.bf16.mxu0 %v4135_v1 }
 0x48f   : > { %3868 = vmatmul.mubr.msk.bf16.vlgmr.msra.gmra.mrb[32].mxu1 %vm849_vm8, %v3866_v42  ;;  %vm684_vm8 = vcmp.ge.s32.totalorder %v4338_v7, 3 }
 0x490   : > { %2611 = vmatprep.mubr.bf16.mxu1 %v4135_v1 }
 0x498   : > { %v1275_v43 = vpop.permute.xlu1 %1274 }
 0x499   : > { %v1277_v44 = vadd.f32 %v1275_v43, %v4498_v53  ;;  %v1278_v46 = vadd.f32 %v1275_v43, %v4501_v55 }
 0x49a   : > { %v4650_v51 = vpop.permute.xlu0 %2411 }
 0x49b   : > { %v1279_v48 = vmax.f32 %v1277_v44, 0.0  ;;  %v1280_v49 = vmax.f32 %v1278_v46, 0.0 }
 0x49c   : > { %v4648_v50 = vpop.permute.xlu1 %2432 }
 0x49d   : > { %v3950_v26 = vpack.c.bf16 %v1280_v49, %v1279_v48 }
 0x49e   : > { %v4654_v52 = vpop.permute.xlu0 %2443 }
 0x49f   : > { %1289 = vst [vmem:[#allocation3 + $0x4] sm:$0x77] %v3950_v26 }
 0x4a0   : > { %v4652_v25 = vpop.permute.xlu1 %2451 }
 0x4a2   : > { %v4658_v56 = vpop.permute.xlu0 %2461 }
 0x4a3   : > { %v2463_v55 = vrot.slane %v4658_v56, 4 }
 0x4a4   : > { %v4656_v54 = vpop.permute.xlu1 %2469 }
 0x4a5   : > { %v2471_v53 = vrot.slane %v4656_v54, 4  ;;  %v2468_v59 = vmul.bf16 %v2463_v55, %v4662_v57 }
 0x4a7   : > { %v2476_v58 = vmul.bf16 %v2471_v53, %v4662_v57  ;;  %v3903_v61 = vcombine.low %v2468_v59, %v2468_v59 }
 0x4a9   : > { %v3909_v60 = vcombine.low %v2476_v58, %v2476_v58  ;;  %2833 = vrot.lane.b32.xlu1 %v3903_v61, %s5306_s26 }
 0x4ab   : > { %2903 = vrot.lane.b32.xlu0 %v3909_v60, %s5307_s21 }
 0x538   : > { %v1789_v62 = vpop.f32.mrb[16].mxu1 }
 0x539   : > { %v1791_v63 = vpop.f32.mrb[17].mxu1 }
 0x53a   : > { %v1793_v0 = vpop.f32.mrb[18].mxu1 }
 0x53b   : > { %v1794_v27 = vpop.f32.mrb[19].mxu1 }
 0x546   : > { %v1864_v2 = vpop.f32.mrb[16].mxu0 }
 0x547   : > { %v1865_v28 = vadd.f32 %v1864_v2, %v1789_v62  ;;  %v1866_v3 = vpop.f32.mrb[17].mxu0 }
 0x548   : > { %v1867_v4 = vadd.f32 %v1866_v3, %v1791_v63  ;;  %v1868_v6 = vpop.f32.mrb[18].mxu0  ;;  %v4674_v3 = vld [vmem:[#allocation3] sm:$0x77] }
 0x549   : > { %v1869_v14 = vpop.f32.mrb[19].mxu0  ;;  %v4678_v6 = vld [vmem:[#allocation3 + $0x4] sm:$0x77] }
 0x54a   : > { %v1941_v47 = vpop.f32.mrb[20].mxu1  ;;  %v2434_v14 = vrot.slane %v4648_v50, 4 }
 0x54b   : > { %v1948_v5 = vadd.f32 %v1941_v47, %v1865_v28  ;;  %v1943_v8 = vpop.f32.mrb[21].mxu1 }
 0x54c   : > { %v1949_v9 = vadd.f32 %v1943_v8, %v1867_v4  ;;  %v1945_v45 = vpop.f32.mrb[22].mxu1  ;;  %v4676_v4 = vld [vmem:[#allocation3 + $0x8] sm:$0x7] }
 0x54d   : > { %v1946_v20 = vpop.f32.mrb[23].mxu1 }
 0x54e   : > { %v2020_v24 = vpop.f32.mrb[20].mxu0  ;;  %v2445_v20 = vrot.slane %v4654_v52, 4 }
 0x54f   : > { %v2027_v10 = vadd.f32 %v2020_v24, %v1948_v5  ;;  %v2022_v11 = vpop.f32.mrb[21].mxu0  ;;  %v2435_v5 = vsel %vm1689_vm13, %v2434_v14, %v4648_v50 }
 0x550   : > { %v2028_v12 = vadd.f32 %v2022_v11, %v1949_v9  ;;  %v2024_v16 = vpop.f32.mrb[22].mxu0  ;;  %v2446_v50 = vsel %vm1696_vm14, %v2445_v20, %v4654_v52 }
 0x551   : > { %v2025_v18 = vpop.f32.mrb[23].mxu0 }
 0x552   : > { %v2083_v19 = vpop.f32.mrb[24].mxu1 }
 0x553   : > { %v2090_v22 = vadd.f32 %v2083_v19, %v2027_v10  ;;  %v2085_v23 = vpop.f32.mrb[25].mxu1 }
 0x554   : > { %v2091_v29 = vadd.f32 %v2085_v23, %v2028_v12  ;;  %v2087_v30 = vpop.f32.mrb[26].mxu1  ;;  %v2453_v12 = vrot.slane %v4652_v25, 4 }
 0x555   : > { %v2088_v31 = vpop.f32.mrb[27].mxu1 }
 0x556   : > { %v2162_v32 = vpop.f32.mrb[24].mxu0 }
 0x557   : > { %v2169_v33 = vadd.f32 %v2162_v32, %v2090_v22  ;;  %v2164_v34 = vpop.f32.mrb[25].mxu0  ;;  %v2454_v22 = vsel %vm814_vm6, %v2453_v12, %v4652_v25  ;;  %v2464_v25 = vsel %vm833_vm5, %v2463_v55, %v4658_v56 }
 0x558   : > { %v2170_v35 = vadd.f32 %v2164_v34, %v2091_v29  ;;  %v2166_v36 = vpop.f32.mrb[26].mxu0 }
 0x559   : > { %v2167_v37 = vpop.f32.mrb[27].mxu0 }
 0x55a   : > { %v2241_v15 = vpop.f32.mrb[28].mxu1  ;;  %v2478_v37 = vpop.permute.xlu0 %2477 }
 0x55b   : > { %v2248_v38 = vadd.f32 %v2241_v15, %v2169_v33  ;;  %v2243_v39 = vpop.f32.mrb[29].mxu1 }
 0x55c   : > { %v2249_v40 = vadd.f32 %v2243_v39, %v2170_v35  ;;  %v2245_v41 = vpop.f32.mrb[30].mxu1 }
 0x55d   : > { %v2246_v21 = vpop.f32.mrb[31].mxu1  ;;  %v2472_v41 = vsel %vm1707_vm15, %v2471_v53, %v4656_v54 }
 0x55e   : > { %v2320_v42 = vpop.f32.mrb[28].mxu0 }
 0x55f   : > { %v2327_v43 = vadd.f32 %v2320_v42, %v2248_v38  ;;  %v2322_v44 = vpop.f32.mrb[29].mxu0 }
 0x560   : > { %v2328_v46 = vadd.f32 %v2322_v44, %v2249_v40  ;;  %v2324_v48 = vpop.f32.mrb[30].mxu0  ;;  %v2479_v40 = vrot.slane %v2478_v37, 4 }
 0x561   : > { %v2325_v49 = vpop.f32.mrb[31].mxu0  ;;  %v3913_v48 = vcombine.low %v4662_v57, %v4662_v57 }
 0x562   : > { %v2399_v26 = vpop.f32.mrb[32].mxu1  ;;  %v2480_v55 = vsel %vm1714_vm0, %v2479_v40, %v2478_v37  ;;  %v2484_v53 = vmul.bf16 %v2479_v40, %v4662_v57  ;;  %v3831_v57 = vld [vmem:[%s5246_s7 + $0x8] sm:$0x3f] }
 0x563   : > { %v2406_v58 = vadd.f32 %v2399_v26, %v2327_v43  ;;  %v2401_v59 = vpop.f32.mrb[33].mxu1 }
 0x564   : > { %v2407_v60 = vadd.f32 %v2401_v59, %v2328_v46  ;;  %v2403_v61 = vpop.f32.mrb[34].mxu1  ;;  %v3919_v26 = vcombine.low %v2484_v53, %v2484_v53  ;;  %v3787_v59 = vsel %vm676_vm1, 1.0, %v4137_v17  ;;  %vm685_vm1 = vcmp.ge.s32.totalorder %v4348_v13, 3 }
 0x565   : > { %v2414_v62 = vadd.f32 %v4650_v51, %v2406_v58  ;;  %v2404_v63 = vpop.f32.mrb[35].mxu1  ;;  %v3094_v58 = vld [vmem:[%s5253_s14] sm:$0x3f] }
 0x566   : > { %v2415_v0 = vadd.f32 %v4650_v51, %v2407_v60  ;;  %v3788_v60 = vsel %vm677_vm2, 1.0, %v4137_v17  ;;  %v3791_v63 = vsel %vm692_vm3, 1.0, %v4137_v17  ;;  %vm700_vm2 = vcmp.ge.s32.totalorder %v4338_v7, 5  ;;  %v3833_v7 = vld [vmem:[%s5246_s7 + $0x18] sm:$0x3f] }
 0x567   : > { %v2416_v27 = vmax.f32 %v2414_v62, 0.0  ;;  %v3952_v61 = vpack.c.bf16 %v3788_v60, %v3787_v59  ;;  %v3925_v62 = vld [vmem:[%s5254_s15 + $0x8] sm:$0x3f]  ;;  %vm701_vm3 = vcmp.ge.s32.totalorder %v4348_v13, 5  ;;  %v3927_v13 = vld [vmem:[%s5254_s15 + $0x18] sm:$0x3f] }
 0x568   : > { %v2417_v2 = vmax.f32 %v2415_v0, 0.0  ;;  %v3792_v0 = vsel %vm693_vm7, 1.0, %v4137_v17  ;;  %vm1423_vm7 = vcmask 998400  }
 0x56a   : > { %v3953_v28 = vpack.c.bf16 %v2417_v2, %v2416_v27  ;;  %v3958_v27 = vpack.c.bf16 %v3792_v0, %v3791_v63  ;;  %v3832_v2 = vld [vmem:[%s5246_s7 + $0x10] sm:$0x3f] }
 0x56c   : > { %2426 = vst [vmem:[#allocation3 + $0x4] sm:$0x77] %v3953_v28  ;;  %v3789_v28 = vsel %vm684_vm8, 1.0, %v4137_v17  ;;  %vm1454_vm8 = vcmask 654336  }
 0x573   : > { %v2427_v47 = vld [vmem:[#allocation3] sm:$0x77]  ;;  %v2428_v51 = vld [vmem:[#allocation3 + $0x8] sm:$0x7] }
 0x574   : > { %v3874_v8 = vcombine.high %v2427_v47, %v2427_v47  ;;  %v3873_v9 = vcombine.low %v2427_v47, %v2427_v47  ;;  %v2438_v45 = vmul.bf16 %v2435_v5, %v2427_v47  ;;  %v3875_v10 = vcombine.low %v2428_v51, %v2428_v51  ;;  %v2459_v36 = vld [vmem:[#allocation3 + $0x4] sm:$0x77] }
 0x575   : > { %v2439_v11 = vmul.bf16 %v2434_v14, %v2428_v51  ;;  %v2449_v16 = vmul.bf16 %v2446_v50, %v2427_v47  ;;  %v2457_v23 = vmul.bf16 %v2454_v22, %v2427_v47  ;;  %v2450_v31 = vmul.bf16 %v2445_v20, %v2428_v51  ;;  %v3926_v5 = vld [vmem:[%s5254_s15 + $0x10] sm:$0x3f]  ;;  %v3835_v20 = vld [vmem:[%s5246_s7 + $0x28] sm:$0x3f]  ;;  %v3931_v50 = vld [vmem:[%s5254_s15 + $0x38] sm:$0x3f] }
 0x576   : > { %2498 = vrot.lane.b32.xlu0 %v3874_v8, %s5313_s6  ;;  %2496 = vrot.lane.b32.xlu1 %v3873_v9, %s5313_s6  ;;  %v3878_v24 = vcombine.low %v2438_v45, %v2438_v45  ;;  %v3879_v19 = vcombine.high %v2438_v45, %v2438_v45  ;;  %v2458_v33 = vmul.bf16 %v2453_v12, %v2428_v51  ;;  %v3790_v14 = vsel %vm685_vm1, 1.0, %v4137_v17  ;;  %v3928_v51 = vld [vmem:[%s5254_s15 + $0x20] sm:$0x3f]  ;;  %v3837_v12 = vld [vmem:[%s5246_s7 + $0x38] sm:$0x3f] }
 0x577   : > { %v3880_v18 = vcombine.low %v2439_v11, %v2439_v11  ;;  %v3885_v29 = vcombine.high %v2449_v16, %v2449_v16  ;;  %v3884_v30 = vcombine.low %v2449_v16, %v2449_v16  ;;  %v3890_v32 = vcombine.low %v2457_v23, %v2457_v23  ;;  %v3930_v11 = vld [vmem:[%s5254_s15 + $0x30] sm:$0x3f]  ;;  %v3838_v16 = vld [vmem:[%s5246_s7 + $0x40] sm:$0x3f] }
 0x578   : > { %v3886_v52 = vcombine.low %v2450_v31, %v2450_v31  ;;  %v3892_v34 = vcombine.low %v2458_v33, %v2458_v33  ;;  %v3891_v35 = vcombine.high %v2457_v23, %v2457_v23  ;;  %v2467_v15 = vmul.bf16 %v2464_v25, %v2459_v36  ;;  %v3181_v22 = vld [vmem:[%s5254_s15] sm:$0x3f]  ;;  %v2834_v23 = vpop.permute.xlu1 %2833 }
 0x579   : > { %v4705_v38 = vcombine.high %v2459_v36, %v2459_v36  ;;  %v4707_v39 = vcombine.low %v2459_v36, %v2459_v36  ;;  %v2475_v21 = vmul.bf16 %v2472_v41, %v2459_v36  ;;  %v2483_v43 = vmul.bf16 %v2480_v55, %v2459_v36  ;;  %v3872_v36 = vld [vmem:[%s5252_s13 + $0x4] sm:$0x7] }
 0x57a   : > { %2562 = vrot.lane.b32.xlu0 %v3878_v24, %s5312_s23  ;;  %2500 = vrot.lane.b32.xlu1 %v3875_v10, %s5313_s6  ;;  %v3902_v42 = vcombine.high %v2467_v15, %v2467_v15  ;;  %v3901_v56 = vcombine.low %v2467_v15, %v2467_v15  ;;  %v3951_v47 = vpack.c.bf16 %v3790_v14, %v3789_v28  ;;  %v3793_v8 = vsel %vm700_vm2, 1.0, %v4137_v17  ;;  %v3929_v24 = vld [vmem:[%s5254_s15 + $0x28] sm:$0x3f]  ;;  %v3836_v10 = vld [vmem:[%s5246_s7 + $0x30] sm:$0x3f] }
 0x57b   : > { %v3907_v44 = vcombine.low %v2475_v21, %v2475_v21  ;;  %v3908_v46 = vcombine.high %v2475_v21, %v2475_v21  ;;  %v3917_v54 = vcombine.low %v2483_v43, %v2483_v43  ;;  %v3918_v49 = vcombine.high %v2483_v43, %v2483_v43  ;;  %v2485_v21 = vld [vmem:[%s5252_s13] sm:$0x7]  ;;  %v3900_v28 = vld [vmem:[%s5252_s13 + $0x14] sm:$0x7] }
 0x57c   : > { %v3794_v9 = vsel %vm701_vm3, 1.0, %v4137_v17  ;;  %v3834_v17 = vld [vmem:[%s5246_s7 + $0x20] sm:$0x3f]  ;;  %v2771_v59 = vsel %vm1090_vm9, %v4707_v39, 0  ;;  %vm1510_vm1 = vcmask 605184   ;;  %vm1600_vm2 = vcmask 211968  }
 0x57d   : > { %v3957_v45 = vpack.c.bf16 %v3794_v9, %v3793_v8  ;;  %vm3137_vm3 = vcmask 433152  }
 0x57e   : > { %2566 = vrot.lane.b32.xlu0 %v3880_v18, %s5312_s23  ;;  %2564 = vrot.lane.b32.xlu1 %v3879_v19, %s5312_s23  ;;  %s4146_s23 = smov 83   ;;  %v3932_v18 = vld [vmem:[%s5254_s15 + $0x40] sm:$0x3f] }
 0x57f   : > { %v1358_v19 = vld [vmem:[%s5246_s7] sm:$0x3f] }
 0x582   : > { %2632 = vrot.lane.b32.xlu0 %v3885_v29, %s5311_s27  ;;  %2630 = vrot.lane.b32.xlu1 %v3884_v30, %s5311_s27  ;;  %v4808_v29 = vpop.permute.xlu0 %2903 }
 0x586   : > { %2700 = vrot.lane.b32.xlu0 %v3890_v32, %s5305_s0  ;;  %2634 = vrot.lane.b32.xlu1 %v3886_v52, %s5311_s27  ;;  %s4150_s27 = smov 3  }
 0x58a   : > { %2704 = vrot.lane.b32.xlu0 %v3892_v34, %s5305_s0  ;;  %2702 = vrot.lane.b32.xlu1 %v3891_v35, %s5305_s0  ;;  %s4165_s0 = smov 91  }
 0x58e   : > { %2966 = vrot.lane.b32.xlu0 %v4705_v38, %s5308_s28  ;;  %2964 = vrot.lane.b32.xlu1 %v4707_v39, %s5308_s28 }
 0x592   : > { %2831 = vrot.lane.b32.xlu0 %v3902_v42, %s5306_s26  ;;  %2829 = vrot.lane.b32.xlu1 %v3901_v56, %s5306_s26  ;;  %s4153_s26 = smov 75  }
 0x596   : > { %2899 = vrot.lane.b32.xlu0 %v3907_v44, %s5307_s21  ;;  %2901 = vrot.lane.b32.xlu1 %v3908_v46, %s5307_s21  ;;  %s5279_s21 = smov 125  }
 0x59a   : > { %2968 = vrot.lane.b32.xlu1 %v3913_v48, %s5308_s28  ;;  %3034 = vrot.lane.b32.xlu0 %v3917_v54, %s5309_s25  ;;  %s5281_s28 = smov 123   ;;  %v3883_v54 = vld [vmem:[%s5252_s13 + $0x8] sm:$0x7] }
 0x59e   : > { %3036 = vrot.lane.b32.xlu1 %v3918_v49, %s5309_s25  ;;  %3038 = vrot.lane.b32.xlu0 %v3919_v26, %s5309_s25  ;;  %s4156_s25 = smov 77  }
 0x5a2   : > { %3097 = vperm.xlu1 %4044, %v3094_v58   ;;  %1377 = vperm.xlu0 %4043, %v3831_v57  }
 0x5a6   : > { %3200 = vperm.xlu1 %4044, %v3925_v62   ;;  %1311 = vrot.lane.b32.xlu0 %v3952_v61, %s4146_s23  ;;  %s4151_s23 = smov 5   ;;  %v3895_v62 = vld [vmem:[%s5252_s13 + $0x10] sm:$0x7] }
 0x5aa   : > { %1408 = vperm.xlu1 %4044, %v3832_v2   ;;  %3134 = vrot.lane.b32.xlu0 %v3958_v27, %s4147_s5  ;;  %s4162_s5 = smov 32  }
 0x5ae   : > { %3231 = vperm.xlu1 %4044, %v3926_v5   ;;  %1320 = vrot.lane.b32.xlu0 %v3951_v47, %s5279_s21  ;;  %s4158_s21 = smov 122  }
 0x5b2   : > { %1439 = vperm.xlu1 %4044, %v3833_v7   ;;  %3143 = vrot.lane.b32.xlu0 %v3957_v45, %s5281_s28  ;;  %v3906_v7 = vld [vmem:[%s5252_s13 + $0x18] sm:$0x7]  ;;  %s4160_s28 = smov 74  }
 0x5b6   : > { %3262 = vperm.xlu1 %4044, %v3927_v13   ;;  %1469 = vperm.xlu0 %4043, %v3834_v17  }
 0x5ba   : > { %3292 = vperm.xlu1 %4044, %v3928_v51   ;;  %1331 = vrot.lane.b32.xlu0 %v3952_v61, %s4150_s27  ;;  %s5314_s27 = smov 125  }
 0x5be   : > { %1495 = vperm.xlu1 %4044, %v3835_v20   ;;  %3154 = vrot.lane.b32.xlu0 %v3958_v27, %s4151_s23  ;;  %s4159_s23 = smov 80  }
 0x5c2   : > { %3318 = vperm.xlu1 %4044, %v3929_v24   ;;  %1340 = vrot.lane.b32.xlu0 %v3951_v47, %s4152_s9  ;;  %s4154_s9 = smov 51   ;;  %v3912_v24 = vld [vmem:[%s5252_s13 + $0x1c] sm:$0x7] }
 0x5c6   : > { %1526 = vperm.xlu1 %4044, %v3836_v10   ;;  %3163 = vrot.lane.b32.xlu0 %v3957_v45, %s4153_s26  ;;  %s4155_s26 = smov 85  }
 0x5ca   : > { %3349 = vperm.xlu1 %4044, %v3930_v11   ;;  %1554 = vperm.xlu0 %4043, %v3837_v12  }
 0x5ce   : > { %3378 = vperm.xlu1 %4044, %v3931_v50   ;;  %1349 = vrot.lane.b32.xlu0 %v3952_v61, %s4154_s9 }
 0x5d2   : > { %1585 = vperm.xlu1 %4044, %v3838_v16   ;;  %3172 = vrot.lane.b32.xlu0 %v3958_v27, %s4155_s26 }
 0x5d6   : > { %3409 = vperm.xlu1 %4044, %v3932_v18   ;;  %1297 = vrot.lane.b32.xlu0 %v3951_v47, %s4156_s25  ;;  %v3916_v18 = vld [vmem:[%s5252_s13 + $0x20] sm:$0x7] }
 0x5da   : > { %1364 = vperm.xlu1 %4044, %v1358_v19   ;;  %3120 = vrot.lane.b32.xlu0 %v3957_v45, %s4157_s10  ;;  %v1372_v19 = vunpack.c.l.bf16 %v4674_v3 }
 0x5de   : > { %3187 = vperm.xlu1 %4044, %v3181_v22   ;;  %v1373_v22 = vunpack.c.h.bf16 %v4674_v3 }
 0x5e8   : > { %v2497_v30 = vpop.permute.xlu1 %2496  ;;  %v2499_v31 = vpop.permute.xlu0 %2498 }
 0x5e9   : > { %v2502_v32 = vsel %vm1152_vm11, %v2497_v30, %v2499_v31 }
 0x5ea   : > { %v2508_v35 = vsel %vm1090_vm9, %v2502_v32, 0  ;;  %v1374_v32 = vunpack.c.l.bf16 %v4676_v4 }
 0x5ec   : > { %v2501_v52 = vpop.permute.xlu1 %2500  ;;  %v2563_v33 = vpop.permute.xlu0 %2562 }
 0x5ed   : > { %v2503_v34 = vsel %vm1152_vm11, %v2499_v31, %v2501_v52  ;;  %vm1334_vm11 = vcmask 23552  }
 0x5ee   : > { %3876 = vmatprep.subr.msk.bf16.mxu0 %vm1090_vm9, %v2503_v34 }
 0x5ef   : > { %2514 = vmatpush1.bf16.msra.mxu0 %v2508_v35 }
 0x5f0   : > { %v2565_v37 = vpop.permute.xlu1 %2564  ;;  %v2567_v25 = vpop.permute.xlu0 %2566 }
 0x5f1   : > { %v2568_v15 = vsel %vm1714_vm0, %v2563_v33, %v2565_v37  ;;  %v2569_v40 = vsel %vm1714_vm0, %v2565_v37, %v2567_v25  ;;  %vm1300_vm0 = vcmask 629760  }
 0x5f2   : > { %3881 = vmatprep.subr.msk.bf16.mxu1 %vm1090_vm9, %v2569_v40  ;;  %3877 = vmatmul.mubr.msk.bf16.vlgmr.msra.gmra.mrb[32].mxu0 %vm1086_vm10, %v3872_v36  ;;  %v2574_v41 = vsel %vm1090_vm9, %v2568_v15, 0 }
 0x5f3   : > { %2580 = vmatpush1.bf16.msra.mxu1 %v2574_v41  ;;  %2679 = vmatprep.mubr.bf16.mxu0 %v4135_v1 }
 0x5f4   : > { %v2631_v42 = vpop.permute.xlu1 %2630  ;;  %v2633_v56 = vpop.permute.xlu0 %2632 }
 0x5f5   : > { %v2636_v55 = vsel %vm1707_vm15, %v2631_v42, %v2633_v56 }
 0x5f6   : > { %3882 = vmatmul.mubr.msk.bf16.vlgmr.msra.gmra.mrb[36].mxu1 %vm1086_vm10, %v2485_v21  ;;  %v2642_v48 = vsel %vm1090_vm9, %v2636_v55, 0 }
 0x5f7   : > { %2749 = vmatprep.mubr.bf16.mxu1 %v4135_v1 }
 0x5f8   : > { %v2635_v43 = vpop.permute.xlu1 %2634  ;;  %v2701_v44 = vpop.permute.xlu0 %2700 }
 0x5f9   : > { %v2637_v46 = vsel %vm1707_vm15, %v2633_v56, %v2635_v43  ;;  %vm1352_vm15 = vcmask 416768  }
 0x5fa   : > { %3887 = vmatprep.subr.msk.bf16.mxu0 %vm1090_vm9, %v2637_v46 }
 0x5fb   : > { %2648 = vmatpush1.bf16.msra.mxu0 %v2642_v48 }
 0x5fc   : > { %v2703_v53 = vpop.permute.xlu1 %2702  ;;  %3898 = vmatprep.subr.msk.bf16.mxu0 %vm1090_vm9, %v4705_v38  ;;  %v2705_v49 = vpop.permute.xlu0 %2704  ;;  %v3889_v38 = vld [vmem:[%s5252_s13 + $0xc] sm:$0x7] }
 0x5fd   : > { %v2706_v26 = vsel %vm833_vm5, %v2701_v44, %v2703_v53  ;;  %v2707_v58 = vsel %vm833_vm5, %v2703_v53, %v2705_v49  ;;  %vm1314_vm5 = vcmask 678912  }
 0x5fe   : > { %3888 = vmatmul.mubr.msk.bf16.vlgmr.msra.gmra.mrb[36].mxu0 %vm1086_vm10, %v3883_v54  ;;  %3893 = vmatprep.subr.msk.bf16.mxu1 %vm1090_vm9, %v2707_v58  ;;  %v2712_v57 = vsel %vm1090_vm9, %v2706_v26, 0 }
 0x5ff   : > { %2718 = vmatpush1.bf16.msra.mxu1 %v2712_v57  ;;  %2777 = vmatpush1.bf16.msra.mxu0 %v2771_v59 }
 0x600   : > { %v2965_v60 = vpop.permute.xlu1 %2964  ;;  %v2967_v61 = vpop.permute.xlu0 %2966  ;;  %2808 = vmatprep.mubr.bf16.mxu0 %v4135_v1 }
 0x601   : > { %v2970_v45 = vsel %vm1216_vm12, %v2965_v60, %v2967_v61 }
 0x602   : > { %3894 = vmatmul.mubr.msk.bf16.vlgmr.msra.gmra.mrb[40].mxu1 %vm1086_vm10, %v3889_v38  ;;  %v2976_v20 = vsel %vm1090_vm9, %v2970_v45, 0 }
 0x603   : > { %2878 = vmatprep.mubr.bf16.mxu1 %v4135_v1 }
 0x604   : > { %v2830_v63 = vpop.permute.xlu1 %2829  ;;  %v2832_v39 = vpop.permute.xlu0 %2831 }
 0x605   : > { %v2835_v0 = vsel %vm814_vm6, %v2830_v63, %v2832_v39  ;;  %v2836_v27 = vsel %vm814_vm6, %v2832_v39, %v2834_v23  ;;  %vm1323_vm6 = vcmask 1022976   ;;  %v1466_v39 = vunpack.c.h.bf16 %v4678_v6 }
 0x606   : > { %v2841_v2 = vsel %vm1090_vm9, %v2835_v0, 0  ;;  %3899 = vmatmul.mubr.msk.bf16.vlgmr.msra.gmra.mrb[40].mxu0 %vm1086_vm10, %v3895_v62  ;;  %3904 = vmatprep.subr.msk.bf16.mxu1 %vm1090_vm9, %v2836_v27 }
 0x607   : > { %2847 = vmatpush1.bf16.msra.mxu1 %v2841_v2  ;;  %2948 = vmatprep.mubr.bf16.mxu0 %v4135_v1 }
 0x608   : > { %v2902_v14 = vpop.permute.xlu1 %2901  ;;  %v2900_v47 = vpop.permute.xlu0 %2899 }
 0x609   : > { %v2906_v5 = vsel %vm1696_vm14, %v2902_v14, %v4808_v29  ;;  %v2905_v8 = vsel %vm1696_vm14, %v2900_v47, %v2902_v14  ;;  %v4920_v14 = vld [vmem:[#allocation3 + $0xc] sm:$0x7]  ;;  %vm3166_vm14 = vcmask 613376  }
 0x60a   : > { %v2911_v9 = vsel %vm1090_vm9, %v2905_v8, 0  ;;  %3905 = vmatmul.mubr.msk.bf16.vlgmr.msra.gmra.mrb[44].mxu1 %vm1086_vm10, %v3900_v28  ;;  %3910 = vmatprep.subr.msk.bf16.mxu0 %vm1090_vm9, %v2906_v5  ;;  %v1465_v5 = vunpack.c.l.bf16 %v4678_v6 }
 0x60b   : > { %2917 = vmatpush1.bf16.msra.mxu0 %v2911_v9  ;;  %3013 = vmatprep.mubr.bf16.mxu1 %v4135_v1 }
 0x60c   : > { %v2969_v13 = vpop.permute.xlu1 %2968  ;;  %v3035_v17 = vpop.permute.xlu0 %3034 }
 0x60d   : > { %v2971_v51 = vsel %vm1216_vm12, %v2967_v61, %v2969_v13  ;;  %vm3157_vm12 = vcmask 39936  }
 0x60e   : > { %3911 = vmatmul.mubr.msk.bf16.vlgmr.msra.gmra.mrb[44].mxu0 %vm1086_vm10, %v3906_v7  ;;  %3914 = vmatprep.subr.msk.bf16.mxu1 %vm1090_vm9, %v2971_v51 }
 0x60f   : > { %2982 = vmatpush1.bf16.msra.mxu1 %v2976_v20  ;;  %3083 = vmatprep.mubr.bf16.mxu0 %v4135_v1 }
 0x610   : > { %v3037_v10 = vpop.permute.xlu1 %3036  ;;  %v3039_v11 = vpop.permute.xlu0 %3038 }
 0x611   : > { %v3040_v12 = vsel %vm1689_vm13, %v3035_v17, %v3037_v10  ;;  %v3041_v50 = vsel %vm1689_vm13, %v3037_v10, %v3039_v11  ;;  %v4928_v17 = vld [vmem:[#allocation3 + $0xc] sm:$0x7]  ;;  %vm1343_vm13 = vcmask 367616  }
 0x612   : > { %v3046_v16 = vsel %vm1090_vm9, %v3040_v12, 0  ;;  %3915 = vmatmul.mubr.msk.bf16.vlgmr.msra.gmra.mrb[48].mxu1 %vm1086_vm10, %v3912_v24  ;;  %3920 = vmatprep.subr.msk.bf16.mxu0 %vm1090_vm9, %v3041_v50 }
 0x613   : > { %3052 = vmatpush1.bf16.msra.mxu0 %v3046_v16  ;;  %3607 = vmatprep.mubr.bf16.mxu1 %v4135_v1 }
 0x616   : > { %3921 = vmatmul.mubr.msk.bf16.vlgmr.msra.gmra.mrb[48].mxu0 %vm1086_vm10, %v3916_v18 }
 0x617   : > { %3521 = vmatprep.mubr.bf16.mxu0 %v4135_v1 }
 0x621   : > { %v4894_v23 = vpop.permute.xlu1 %3097  ;;  %v1378_v29 = vpop.permute.xlu0 %1377 }
 0x622   : > { %v1380_v30 = vmul.f32 %v1378_v29, %v1372_v19  ;;  %v1381_v31 = vmul.f32 %v1378_v29, %v1373_v22  ;;  %v1382_v34 = vmul.f32 %v1378_v29, %v1374_v32 }
 0x624   : > { %1388 = vrot.lane.b32.xlu1 %v1381_v31, %s5314_s27  ;;  %1386 = vrot.lane.b32.xlu0 %v1380_v30, %s5314_s27 }
 0x625   : > { %v4899_v52 = vpop.permute.xlu1 %3200  ;;  %v1312_v33 = vpop.permute.xlu0 %1311 }
 0x626   : > { %v1313_v35 = vrot.slane %v1312_v33, 4 }
 0x628   : > { %v1315_v36 = vsel %vm1314_vm5, %v1313_v35, %v1312_v33  ;;  %1390 = vrot.lane.b32.xlu0 %v1382_v34, %s5314_s27  ;;  %v1319_v25 = vmul.bf16 %v1313_v35, %v4676_v4  ;;  %s4166_s27 = smov 26   ;;  %vm3123_vm5 = vcmask 351232  }
 0x629   : > { %v1318_v37 = vmul.bf16 %v1315_v36, %v4674_v3  ;;  %v1409_v15 = vpop.permute.xlu1 %1408  ;;  %v4904_v40 = vpop.permute.xlu0 %3134 }
 0x62a   : > { %v1405_v42 = vunpack.c.l.bf16 %v1319_v25 }
 0x62b   : > { %v1403_v41 = vunpack.c.l.bf16 %v1318_v37  ;;  %v1404_v21 = vunpack.c.h.bf16 %v1318_v37 }
 0x62c   : > { %v1413_v54 = vmul.f32 %v1409_v15, %v1405_v42 }
 0x62d   : > { %v1411_v56 = vmul.f32 %v1409_v15, %v1403_v41  ;;  %v1412_v55 = vmul.f32 %v1409_v15, %v1404_v21  ;;  %v4906_v43 = vpop.permute.xlu1 %3231  ;;  %v1321_v44 = vpop.permute.xlu0 %1320 }
 0x62e   : > { %v1322_v46 = vrot.slane %v1321_v44, 4 }
 0x62f   : > { %1419 = vrot.lane.b32.xlu1 %v1412_v55, %s4158_s21  ;;  %1417 = vrot.lane.b32.xlu0 %v1411_v56, %s4158_s21 }
 0x630   : > { %v1324_v48 = vsel %vm1323_vm6, %v1322_v46, %v1321_v44  ;;  %v1328_v49 = vmul.bf16 %v1322_v46, %v4676_v4 }
 0x631   : > { %v1327_v53 = vmul.bf16 %v1324_v48, %v4674_v3  ;;  %v1440_v26 = vpop.permute.xlu1 %1439  ;;  %v4911_v58 = vpop.permute.xlu0 %3143 }
 0x632   : > { %v1436_v38 = vunpack.c.l.bf16 %v1328_v49 }
 0x633   : > { %v1434_v57 = vunpack.c.l.bf16 %v1327_v53  ;;  %v1435_v59 = vunpack.c.h.bf16 %v1327_v53  ;;  %1421 = vrot.lane.b32.xlu0 %v1413_v54, %s4158_s21  ;;  %v1609_v54 = vld [vmem:[%s5247_s8] sm:$0x3f]  ;;  %s5315_s21 = smov 123  }
 0x634   : > { %v1444_v0 = vmul.f32 %v1440_v26, %v1436_v38  ;;  %v3433_v38 = vld [vmem:[%s5255_s16] sm:$0x3f] }
 0x635   : > { %v1442_v60 = vmul.f32 %v1440_v26, %v1434_v57  ;;  %v1443_v61 = vmul.f32 %v1440_v26, %v1435_v59  ;;  %v4913_v62 = vpop.permute.xlu1 %3262  ;;  %v1470_v63 = vpop.permute.xlu0 %1469 }
 0x636   : > { %v1473_v27 = vmul.f32 %v1470_v63, %v1466_v39  ;;  %v1472_v9 = vmul.f32 %v1470_v63, %v1465_v5 }
 0x637   : > { %1450 = vrot.lane.b32.xlu1 %v1443_v61, %s4159_s23  ;;  %1448 = vrot.lane.b32.xlu0 %v1442_v60, %s4159_s23 }
 0x639   : > { %v4918_v2 = vpop.permute.xlu1 %3292  ;;  %v1332_v28 = vpop.permute.xlu0 %1331 }
 0x63a   : > { %v1333_v47 = vrot.slane %v1332_v28, 4 }
 0x63b   : > { %1452 = vrot.lane.b32.xlu0 %v1444_v0, %s4159_s23  ;;  %1478 = vrot.lane.b32.xlu1 %v1473_v27, %s4156_s25  ;;  %v1551_v27 = vunpack.c.l.bf16 %v4920_v14  ;;  %s4167_s23 = smov 118  }
 0x63c   : > { %v1335_v8 = vsel %vm1334_vm11, %v1333_v47, %v1332_v28  ;;  %v1339_v7 = vmul.bf16 %v1333_v47, %v4920_v14  ;;  %v3375_v28 = vunpack.c.l.bf16 %v4928_v17  ;;  %vm3146_vm11 = vcmask 1006592  }
 0x63d   : > { %v1338_v45 = vmul.bf16 %v1335_v8, %v4678_v6  ;;  %v1496_v13 = vpop.permute.xlu1 %1495  ;;  %v3155_v51 = vpop.permute.xlu0 %3154 }
 0x63e   : > { %v3156_v20 = vrot.slane %v3155_v51, 4  ;;  %v1492_v50 = vunpack.c.l.bf16 %v1339_v7 }
 0x63f   : > { %v1490_v24 = vunpack.c.l.bf16 %v1338_v45  ;;  %v1491_v10 = vunpack.c.h.bf16 %v1338_v45  ;;  %1476 = vrot.lane.b32.xlu0 %v1472_v9, %s4156_s25  ;;  %s4161_s25 = smov 38  }
 0x640   : > { %v4931_v11 = vsel %vm3157_vm12, %v3156_v20, %v3155_v51  ;;  %v3162_v12 = vmul.bf16 %v3156_v20, %v4928_v17  ;;  %v1500_v33 = vmul.f32 %v1496_v13, %v1492_v50  ;;  %vm3175_vm12 = vcmask 695296  }
 0x641   : > { %v1498_v16 = vmul.f32 %v1496_v13, %v1490_v24  ;;  %v1499_v18 = vmul.f32 %v1496_v13, %v1491_v10  ;;  %v4934_v19 = vpop.permute.xlu1 %3318  ;;  %v1341_v22 = vpop.permute.xlu0 %1340 }
 0x642   : > { %v3315_v29 = vunpack.c.l.bf16 %v3162_v12  ;;  %v1342_v30 = vrot.slane %v1341_v22, 4 }
 0x643   : > { %1506 = vrot.lane.b32.xlu1 %v1499_v18, %s4160_s28  ;;  %1504 = vrot.lane.b32.xlu0 %v1498_v16, %s4160_s28 }
 0x644   : > { %v3323_v31 = vmul.f32 %v4934_v19, %v3315_v29  ;;  %v1344_v32 = vsel %vm1343_vm13, %v1342_v30, %v1341_v22  ;;  %v1348_v35 = vmul.bf16 %v1342_v30, %v4920_v14  ;;  %vm3277_vm13 = vcmask 392192  }
 0x645   : > { %v1347_v34 = vmul.bf16 %v1344_v32, %v4678_v6  ;;  %v1527_v36 = vpop.permute.xlu1 %1526  ;;  %v3164_v37 = vpop.permute.xlu0 %3163 }
 0x646   : > { %v3165_v25 = vrot.slane %v3164_v37, 4  ;;  %v1523_v42 = vunpack.c.l.bf16 %v1348_v35 }
 0x647   : > { %v1521_v15 = vunpack.c.l.bf16 %v1347_v34  ;;  %v1522_v41 = vunpack.c.h.bf16 %v1347_v34  ;;  %1508 = vrot.lane.b32.xlu0 %v1500_v33, %s4160_s28  ;;  %3331 = vrot.lane.b32.xlu1 %v3323_v31, %s4161_s25  ;;  %s4163_s28 = smov 96  }
 0x648   : > { %v4940_v21 = vsel %vm3166_vm14, %v3165_v25, %v3164_v37  ;;  %v3171_v44 = vmul.bf16 %v3165_v25, %v4928_v17  ;;  %v1531_v53 = vmul.f32 %v1527_v36, %v1523_v42  ;;  %vm3333_vm14 = vcmask 310272  }
 0x649   : > { %v1529_v56 = vmul.f32 %v1527_v36, %v1521_v15  ;;  %v1530_v55 = vmul.f32 %v1527_v36, %v1522_v41  ;;  %v4943_v46 = vpop.permute.xlu1 %3349  ;;  %v1555_v48 = vpop.permute.xlu0 %1554 }
 0x64a   : > { %v3346_v49 = vunpack.c.l.bf16 %v3171_v44  ;;  %v1557_v47 = vmul.f32 %v1555_v48, %v1465_v5  ;;  %v1558_v8 = vmul.f32 %v1555_v48, %v1466_v39  ;;  %v1559_v51 = vmul.f32 %v1555_v48, %v1551_v27 }
 0x64b   : > { %1537 = vrot.lane.b32.xlu1 %v1530_v55, %s4162_s5  ;;  %1535 = vrot.lane.b32.xlu0 %v1529_v56, %s4162_s5 }
 0x64c   : > { %v3354_v60 = vmul.f32 %v4943_v46, %v3346_v49 }
 0x64d   : > { %v4948_v26 = vpop.permute.xlu1 %3378  ;;  %v1350_v57 = vpop.permute.xlu0 %1349 }
 0x64e   : > { %v1351_v59 = vrot.slane %v1350_v57, 4  ;;  %v3383_v20 = vmul.f32 %v4948_v26, %v3375_v28 }
 0x64f   : > { %1612 = vperm.xlu1 %4044, %v1609_v54   ;;  %1539 = vrot.lane.b32.xlu0 %v1531_v53, %s4162_s5  ;;  %s4164_s5 = smov 29  }
 0x650   : > { %v1353_v0 = vsel %vm1352_vm15, %v1351_v59, %v1350_v57  ;;  %v1357_v10 = vmul.bf16 %v1351_v59, %v4920_v14 }
 0x651   : > { %v1586_v61 = vpop.permute.xlu1 %1585  ;;  %v4954_v63 = vpop.permute.xlu0 %3172  ;;  %v1356_v9 = vmul.bf16 %v1353_v0, %v4678_v6 }
 0x652   : > { %v1582_v29 = vunpack.c.l.bf16 %v1357_v10 }
 0x653   : > { %3436 = vperm.xlu1 %4044, %v3433_v38   ;;  %3362 = vrot.lane.b32.xlu0 %v3354_v60, %s4163_s28  ;;  %v1580_v39 = vunpack.c.l.bf16 %v1356_v9  ;;  %v1581_v12 = vunpack.c.h.bf16 %v1356_v9 }
 0x655   : > { %v4965_v45 = vpop.permute.xlu1 %3409  ;;  %v1298_v7 = vpop.permute.xlu0 %1297  ;;  %v1589_v30 = vmul.f32 %v1586_v61, %v1581_v12 }
 0x656   : > { %v1299_v13 = vrot.slane %v1298_v7, 4 }
 0x657   : > { %1565 = vrot.lane.b32.xlu1 %v1558_v8, %s4164_s5  ;;  %1563 = vrot.lane.b32.xlu0 %v1557_v47, %s4164_s5 }
 0x658   : > { %v1301_v24 = vsel %vm1300_vm0, %v1299_v13, %v1298_v7  ;;  %v1305_v5 = vmul.bf16 %v1299_v13, %v4676_v4  ;;  %v1588_v4 = vmul.f32 %v1586_v61, %v1580_v39 }
 0x659   : > { %v4972_v6 = vmul.bf16 %v1301_v24, %v4674_v3  ;;  %v4975_v18 = vpop.permute.xlu1 %1364  ;;  %v1590_v3 = vmul.f32 %v1586_v61, %v1582_v29  ;;  %v4980_v31 = vpop.permute.xlu0 %3120 }
 0x65a   : > { %v1361_v50 = vunpack.c.l.bf16 %v1305_v5 }
 0x65b   : > { %v1360_v16 = vunpack.c.h.bf16 %v4972_v6  ;;  %3391 = vrot.lane.b32.xlu1 %v3383_v20, %s4165_s0  ;;  %1567 = vrot.lane.b32.xlu0 %v1559_v51, %s4164_s5  ;;  %s4169_s5 = smov 86  }
 0x65c   : > { %v1369_v22 = vmul.f32 %v4975_v18, %v1361_v50 }
 0x65d   : > { %v1368_v14 = vmul.f32 %v4975_v18, %v1360_v16  ;;  %v4982_v32 = vpop.permute.xlu1 %3187 }
 0x65f   : > { %1596 = vrot.lane.b32.xlu1 %v1589_v30, %s4166_s27  ;;  %1594 = vrot.lane.b32.xlu0 %v1588_v4, %s4166_s27 }
 0x663   : > { %1598 = vrot.lane.b32.xlu0 %v1590_v3, %s4166_s27 }
 0x696   : > { %v4984_v33 = vpop.permute.xlu0 %1386  ;;  %v4986_v34 = vpop.permute.xlu1 %1388 }
 0x69a   : > { %v1391_v35 = vpop.permute.xlu0 %1390 }
 0x69b   : > { %v1394_v36 = vsel %vm1323_vm6, %v4986_v34, %v1391_v35  ;;  %v1400_v37 = vadd.f32 %v1391_v35, %v1369_v22 }
 0x69c   : > { %v1399_v25 = vadd.f32 %v1394_v36, %v1368_v14 }
 0x6a1   : > { %v4990_v15 = vpop.permute.xlu0 %1417  ;;  %v4992_v41 = vpop.permute.xlu1 %1419 }
 0x6a5   : > { %v1422_v42 = vpop.permute.xlu0 %1421 }
 0x6a6   : > { %v1425_v56 = vsel %vm1423_vm7, %v4992_v41, %v1422_v42  ;;  %v1431_v55 = vadd.f32 %v1422_v42, %v1400_v37 }
 0x6a7   : > { %v1430_v44 = vadd.f32 %v1425_v56, %v1399_v25 }
 0x6a9   : > { %v4996_v48 = vpop.permute.xlu1 %1450  ;;  %v4998_v54 = vpop.permute.xlu0 %1448 }
 0x6ad   : > { %v1453_v53 = vpop.permute.xlu0 %1452  ;;  %v1479_v59 = vpop.permute.xlu1 %1478 }
 0x6ae   : > { %v1456_v49 = vsel %vm1454_vm8, %v4996_v48, %v1453_v53  ;;  %v1462_v57 = vadd.f32 %v1453_v53, %v1431_v55 }
 0x6af   : > { %v1461_v38 = vadd.f32 %v1456_v49, %v1430_v44 }
 0x6b0   : > { %v1487_v60 = vadd.f32 %v1479_v59, %v1462_v57 }
 0x6b1   : > { %v5002_v61 = vpop.permute.xlu0 %1476 }
 0x6b2   : > { %v1481_v0 = vsel %vm1300_vm0, %v5002_v61, %v1479_v59  ;;  %vm3364_vm0 = vcmask 785408  }
 0x6b3   : > { %v1486_v27 = vadd.f32 %v1481_v0, %v1461_v38 }
 0x6b5   : > { %v1507_v28 = vpop.permute.xlu1 %1506  ;;  %v5006_v47 = vpop.permute.xlu0 %1504 }
 0x6b6   : > { %v1511_v8 = vsel %vm1510_vm1, %v5006_v47, %v1507_v28 }
 0x6b7   : > { %v1517_v9 = vadd.f32 %v1511_v8, %v1486_v27 }
 0x6b9   : > { %v5009_v7 = vpop.permute.xlu1 %3331  ;;  %v1509_v13 = vpop.permute.xlu0 %1508 }
 0x6ba   : > { %v1512_v51 = vsel %vm1510_vm1, %v1507_v28, %v1509_v13 }
 0x6bb   : > { %v1518_v20 = vadd.f32 %v1512_v51, %v1487_v60 }
 0x6bd   : > { %v1538_v24 = vpop.permute.xlu1 %1537  ;;  %v5011_v5 = vpop.permute.xlu0 %1535 }
 0x6be   : > { %v1541_v10 = vsel %vm739_vm4, %v5011_v5, %v1538_v24 }
 0x6bf   : > { %v1547_v39 = vadd.f32 %v1541_v10, %v1517_v9 }
 0x6c1   : > { %v1540_v12 = vpop.permute.xlu0 %1539 }
 0x6c2   : > { %v1542_v50 = vsel %vm739_vm4, %v1538_v24, %v1540_v12  ;;  %vm1569_vm4 = vcmask 236544  }
 0x6c3   : > { %v1548_v16 = vadd.f32 %v1542_v50, %v1518_v20 }
 0x6c5   : > { %v5016_v22 = vpop.permute.xlu0 %3362  ;;  %v2547_v29 = vpop.f32.mrb[32].mxu0 }
 0x6c6   : > { %v2549_v4 = vpop.f32.mrb[33].mxu0 }
 0x6c7   : > { %v2551_v30 = vpop.f32.mrb[34].mxu0 }
 0x6c8   : > { %v2552_v14 = vpop.f32.mrb[35].mxu0 }
 0x6c9   : > { %v2613_v3 = vpop.f32.mrb[36].mxu1  ;;  %v5018_v37 = vpop.permute.xlu0 %1563 }
 0x6ca   : > { %v2614_v35 = vadd.f32 %v2613_v3, %v2547_v29  ;;  %v2615_v36 = vpop.f32.mrb[37].mxu1 }
 0x6cb   : > { %v2616_v25 = vadd.f32 %v2615_v36, %v2549_v4  ;;  %v2617_v42 = vpop.f32.mrb[38].mxu1 }
 0x6cc   : > { %v2618_v56 = vpop.f32.mrb[39].mxu1 }
 0x6cd   : > { %v1568_v44 = vpop.permute.xlu0 %1567 }
 0x6ce   : > { %v5020_v55 = vpop.permute.xlu1 %1612 }
 0x6d1   : > { %v2681_v53 = vpop.f32.mrb[36].mxu0  ;;  %v5024_v13 = vpop.permute.xlu0 %1594 }
 0x6d2   : > { %v2688_v49 = vadd.f32 %v2681_v53, %v2614_v35  ;;  %v2683_v57 = vpop.f32.mrb[37].mxu0  ;;  %v5022_v59 = vpop.permute.xlu1 %3436 }
 0x6d3   : > { %v2689_v38 = vadd.f32 %v2683_v57, %v2616_v25  ;;  %v2685_v60 = vpop.f32.mrb[38].mxu0 }
 0x6d4   : > { %v2686_v0 = vpop.f32.mrb[39].mxu0 }
 0x6d5   : > { %v2751_v27 = vpop.f32.mrb[40].mxu1  ;;  %v1599_v42 = vpop.permute.xlu0 %1598 }
 0x6d6   : > { %v2758_v28 = vadd.f32 %v2751_v27, %v2688_v49  ;;  %v2753_v8 = vpop.f32.mrb[41].mxu1  ;;  %v1566_v9 = vpop.permute.xlu1 %1565 }
 0x6d7   : > { %v2759_v51 = vadd.f32 %v2753_v8, %v2689_v38  ;;  %v1570_v20 = vsel %vm1569_vm4, %v5018_v37, %v1566_v9  ;;  %v1571_v24 = vsel %vm1569_vm4, %v1566_v9, %v1568_v44  ;;  %v2755_v10 = vpop.f32.mrb[42].mxu1 }
 0x6d8   : > { %v1576_v12 = vadd.f32 %v1570_v20, %v1547_v39  ;;  %v1577_v50 = vadd.f32 %v1571_v24, %v1548_v16  ;;  %v2756_v29 = vpop.f32.mrb[43].mxu1 }
 0x6d9   : > { %v2810_v4 = vpop.f32.mrb[40].mxu0 }
 0x6da   : > { %v2817_v30 = vadd.f32 %v2810_v4, %v2758_v28  ;;  %v2812_v14 = vpop.f32.mrb[41].mxu0  ;;  %v5027_v3 = vpop.permute.xlu1 %3391 }
 0x6db   : > { %v2818_v35 = vadd.f32 %v2812_v14, %v2759_v51  ;;  %v2814_v36 = vpop.f32.mrb[42].mxu0 }
 0x6dc   : > { %v2815_v25 = vpop.f32.mrb[43].mxu0 }
 0x6dd   : > { %v2880_v56 = vpop.f32.mrb[44].mxu1 }
 0x6de   : > { %v2887_v53 = vadd.f32 %v2880_v56, %v2817_v30  ;;  %v2882_v49 = vpop.f32.mrb[45].mxu1  ;;  %v1597_v57 = vpop.permute.xlu1 %1596 }
 0x6df   : > { %v2888_v38 = vadd.f32 %v2882_v49, %v2818_v35  ;;  %v1601_v44 = vsel %vm1600_vm2, %v5024_v13, %v1597_v57  ;;  %v1602_v39 = vsel %vm1600_vm2, %v1597_v57, %v1599_v42  ;;  %v2884_v16 = vpop.f32.mrb[46].mxu1 }
 0x6e0   : > { %v1607_v60 = vadd.f32 %v1601_v44, %v1576_v12  ;;  %v1608_v0 = vadd.f32 %v1602_v39, %v1577_v50  ;;  %v2885_v27 = vpop.f32.mrb[47].mxu1 }
 0x6e1   : > { %v2950_v28 = vpop.f32.mrb[44].mxu0 }
 0x6e2   : > { %v5031_v8 = vadd.f32 %v5020_v55, %v1607_v60  ;;  %v5034_v9 = vadd.f32 %v5020_v55, %v1608_v0  ;;  %v2957_v51 = vadd.f32 %v2950_v28, %v2887_v53  ;;  %v2952_v20 = vpop.f32.mrb[45].mxu0 }
 0x6e3   : > { %v2958_v24 = vadd.f32 %v2952_v20, %v2888_v38  ;;  %v2954_v10 = vpop.f32.mrb[46].mxu0  ;;  %v3136_v20 = vrot.slane %v4904_v40, 4 }
 0x6e4   : > { %v2955_v29 = vpop.f32.mrb[47].mxu0 }
 0x6e5   : > { %v3015_v4 = vpop.f32.mrb[48].mxu1 }
 0x6e6   : > { %v3022_v30 = vadd.f32 %v3015_v4, %v2957_v51  ;;  %v3017_v14 = vpop.f32.mrb[49].mxu1 }
 0x6e7   : > { %v3023_v35 = vadd.f32 %v3017_v14, %v2958_v24  ;;  %v3019_v36 = vpop.f32.mrb[50].mxu1  ;;  %v3122_v24 = vrot.slane %v4980_v31, 4  ;;  %v3138_v14 = vsel %vm3137_vm3, %v3136_v20, %v4904_v40 }
 0x6e8   : > { %v3020_v12 = vpop.f32.mrb[51].mxu1 }
 0x6e9   : > { %v3085_v50 = vpop.f32.mrb[48].mxu0 }
 0x6ea   : > { %v3092_v25 = vadd.f32 %v3085_v50, %v3022_v30  ;;  %v3087_v42 = vpop.f32.mrb[49].mxu0  ;;  %v3145_v30 = vrot.slane %v4911_v58, 4 }
 0x6eb   : > { %v3093_v56 = vadd.f32 %v3087_v42, %v3023_v35  ;;  %v3089_v49 = vpop.f32.mrb[50].mxu0  ;;  %v3124_v35 = vsel %vm3123_vm5, %v3122_v24, %v4980_v31 }
 0x6ec   : > { %v3100_v57 = vadd.f32 %v4894_v23, %v3092_v25  ;;  %v3090_v44 = vpop.f32.mrb[51].mxu0  ;;  %v3147_v42 = vsel %vm3146_vm11, %v3145_v30, %v4911_v58 }
 0x6ed   : > { %v3101_v53 = vadd.f32 %v4894_v23, %v3093_v56 }
 0x6ee   : > { %v3102_v39 = vmax.f32 %v3100_v57, 0.0 }
 0x6ef   : > { %v3103_v38 = vmax.f32 %v3101_v53, 0.0 }
 0x6f1   : > { %v3956_v16 = vpack.c.bf16 %v3103_v38, %v3102_v39 }
 0x6f3   : > { %3112 = vst [vmem:[#allocation3 + $0x4] sm:$0x77] %v3956_v16 }
 0x6fa   : > { %v3113_v60 = vld [vmem:[#allocation3] sm:$0x77]  ;;  %v3114_v0 = vld [vmem:[#allocation3 + $0x8] sm:$0x7] }
 0x6fb   : > { %v3152_v27 = vld [vmem:[#allocation3 + $0x4] sm:$0x77]  ;;  %v3195_v28 = vunpack.c.l.bf16 %v3113_v60  ;;  %v3196_v51 = vunpack.c.h.bf16 %v3113_v60  ;;  %v3197_v23 = vunpack.c.l.bf16 %v3114_v0  ;;  %v3141_v25 = vmul.bf16 %v3138_v14, %v3113_v60 }
 0x6fc   : > { %v3288_v4 = vunpack.c.l.bf16 %v3152_v27  ;;  %v3289_v50 = vunpack.c.h.bf16 %v3152_v27  ;;  %v5054_v56 = vmul.bf16 %v3124_v35, %v3113_v60  ;;  %v3150_v40 = vmul.bf16 %v3147_v42, %v3113_v60 }
 0x6fd   : > { %v3203_v10 = vmul.f32 %v4899_v52, %v3195_v28  ;;  %v3204_v29 = vmul.f32 %v4899_v52, %v3196_v51  ;;  %v3205_v36 = vmul.f32 %v4899_v52, %v3197_v23  ;;  %v3227_v57 = vunpack.c.h.bf16 %v3141_v25 }
 0x6fe   : > { %v3295_v12 = vmul.f32 %v4918_v2, %v3288_v4  ;;  %v3296_v49 = vmul.f32 %v4918_v2, %v3289_v50  ;;  %v3382_v31 = vmul.f32 %v4948_v26, %v3289_v50  ;;  %v5058_v52 = vmul.bf16 %v3122_v24, %v3114_v0 }
 0x6ff   : > { %3209 = vrot.lane.b32.xlu1 %v3203_v10, %s5315_s21  ;;  %3211 = vrot.lane.b32.xlu0 %v3204_v29, %s5315_s21  ;;  %v3381_v58 = vmul.f32 %v4948_v26, %v3288_v4  ;;  %v3142_v44 = vmul.bf16 %v3136_v20, %v3114_v0  ;;  %v3235_v53 = vmul.f32 %v4906_v43, %v3227_v57  ;;  %v3226_v39 = vunpack.c.l.bf16 %v3141_v25 }
 0x700   : > { %v3258_v38 = vunpack.c.h.bf16 %v3150_v40  ;;  %v3161_v16 = vmul.bf16 %v4931_v11, %v3152_v27  ;;  %v3174_v2 = vrot.slane %v4954_v63, 4  ;;  %v3170_v20 = vmul.bf16 %v4940_v21, %v3152_v27 }
 0x701   : > { %v3228_v60 = vunpack.c.l.bf16 %v3142_v44  ;;  %v3234_v28 = vmul.f32 %v4906_v43, %v3226_v39  ;;  %v1359_v11 = vunpack.c.l.bf16 %v4972_v6  ;;  %v3257_v10 = vunpack.c.l.bf16 %v3150_v40 }
 0x702   : > { %v3266_v51 = vmul.f32 %v4913_v62, %v3258_v38  ;;  %v3314_v26 = vunpack.c.h.bf16 %v3161_v16  ;;  %v3176_v24 = vsel %vm3175_vm12, %v3174_v2, %v4954_v63  ;;  %v3151_v29 = vmul.bf16 %v3145_v30, %v3114_v0 }
 0x703   : > { %3213 = vrot.lane.b32.xlu1 %v3205_v36, %s5315_s21  ;;  %3299 = vrot.lane.b32.xlu0 %v3295_v12, %s4157_s10  ;;  %v3236_v23 = vmul.f32 %v4906_v43, %v3228_v60  ;;  %v3344_v14 = vunpack.c.l.bf16 %v3170_v20  ;;  %v3179_v35 = vmul.bf16 %v3176_v24, %v3152_v27  ;;  %v1367_v21 = vmul.f32 %v4975_v18, %v1359_v11  ;;  %s4170_s21 = smov [#allocation4]  }
 0x704   : > { %v3322_v4 = vmul.f32 %v4934_v19, %v3314_v26  ;;  %v1393_v63 = vsel %vm1323_vm6, %v4984_v33, %v4986_v34  ;;  %v3265_v36 = vmul.f32 %v4913_v62, %v3257_v10  ;;  %v3259_v0 = vunpack.c.l.bf16 %v3151_v29 }
 0x705   : > { %v3352_v6 = vmul.f32 %v4943_v46, %v3344_v14  ;;  %v3405_v30 = vunpack.c.h.bf16 %v3179_v35  ;;  %v1424_v43 = vsel %vm1423_vm7, %v4990_v15, %v4992_v41  ;;  %v1398_v27 = vadd.f32 %v1393_v63, %v1367_v21 }
 0x706   : > { %v1455_v18 = vsel %vm1454_vm8, %v4998_v54, %v4996_v48  ;;  %v3267_v33 = vmul.f32 %v4913_v62, %v3259_v0  ;;  %v3313_v50 = vunpack.c.l.bf16 %v3161_v16  ;;  %v3345_v42 = vunpack.c.h.bf16 %v3170_v20 }
 0x707   : > { %3301 = vrot.lane.b32.xlu1 %v3296_v49, %s4157_s10  ;;  %3389 = vrot.lane.b32.xlu0 %v3382_v31, %s4165_s0  ;;  %s4168_s10 = smov 48   ;;  %v1429_v12 = vadd.f32 %v1424_v43, %v1398_v27  ;;  %v3413_v34 = vmul.f32 %v4965_v45, %v3405_v30  ;;  %v3180_v48 = vmul.bf16 %v3174_v2, %v4928_v17  ;;  %v3404_v49 = vunpack.c.l.bf16 %v3179_v35 }
 0x708   : > { %v3321_v41 = vmul.f32 %v4934_v19, %v3313_v50  ;;  %v3353_v54 = vmul.f32 %v4943_v46, %v3345_v42  ;;  %v3184_v2 = vunpack.c.l.bf16 %v5058_v52  ;;  %v3182_v60 = vunpack.c.l.bf16 %v5054_v56 }
 0x709   : > { %v1460_v25 = vadd.f32 %v1455_v18, %v1429_v12  ;;  %v3406_v57 = vunpack.c.l.bf16 %v3180_v48  ;;  %v3412_v19 = vmul.f32 %v4965_v45, %v3404_v49  ;;  %vm3246_vm6 = vcmask 965632  }
 0x70a   : > { %v3192_v26 = vmul.f32 %v4982_v32, %v3184_v2  ;;  %v3190_v24 = vmul.f32 %v4982_v32, %v3182_v60  ;;  %vm3393_vm7 = vcmask 744448   ;;  %vm3424_vm8 = vcmask 703488  }
 0x70b   : > { %3387 = vrot.lane.b32.xlu1 %v3381_v58, %s4165_s0  ;;  %3242 = vrot.lane.b32.xlu0 %v3235_v53, %s4167_s23  ;;  %v1485_v15 = vadd.f32 %v5002_v61, %v1460_v25 }
 0x70d   : > { %v1516_v40 = vadd.f32 %v5006_v47, %v1485_v15  ;;  %v3414_v47 = vmul.f32 %v4965_v45, %v3406_v57  ;;  %v3183_v45 = vunpack.c.h.bf16 %v5054_v56 }
 0x70f   : > { %3240 = vrot.lane.b32.xlu1 %v3234_v28, %s4167_s23  ;;  %3273 = vrot.lane.b32.xlu0 %v3266_v51, %s4168_s10  ;;  %v1546_v62 = vadd.f32 %v5011_v5, %v1516_v40  ;;  %v3191_v11 = vmul.f32 %v4982_v32, %v3183_v45 }
 0x711   : > { %v1575_v31 = vadd.f32 %v5018_v37, %v1546_v62 }
 0x713   : > { %3244 = vrot.lane.b32.xlu1 %v3236_v23, %s4167_s23  ;;  %3329 = vrot.lane.b32.xlu0 %v3322_v4, %s4161_s25  ;;  %v1606_v61 = vadd.f32 %v5024_v13, %v1575_v31  ;;  %s4075_s23 = sshll.u32 %s4170_s21, 4  ;;  %s4076_s23 = int_to_ptr.vmem [resolvable:$false] %s4075_s23 }
 0x715   : > { %v1615_v58 = vadd.f32 %v5020_v55, %v1606_v61 }
 0x717   : > { %3271 = vrot.lane.b32.xlu1 %v3265_v36, %s4168_s10  ;;  %3358 = vrot.lane.b32.xlu0 %v3352_v6, %s4163_s28  ;;  %v3446_v17 = vpack.c.bf16 %v1615_v58, %v1615_v58 }
 0x71b   : > { %3275 = vrot.lane.b32.xlu1 %v3267_v33, %s4168_s10  ;;  %3420 = vrot.lane.b32.xlu0 %v3413_v34, %s4169_s5 }
 0x71f   : > { %3327 = vrot.lane.b32.xlu1 %v3321_v41, %s4161_s25 }
 0x723   : > { %3360 = vrot.lane.b32.xlu1 %v3353_v54, %s4163_s28 }
 0x727   : > { %3418 = vrot.lane.b32.xlu1 %v3412_v19, %s4169_s5 }
 0x72b   : > { %3422 = vrot.lane.b32.xlu1 %v3414_v47, %s4169_s5  ;;  %s3959_s5 = sshll.u32 %s4298_s2, 10 }
 0x72c   : > { %s5188_s0 = scalar_lea.hbm %s5259_s20, %s3959_s5 }
 0x72f   : > { %3555 = vrot.lane.b32.xlu1 %v3446_v17, %s4154_s9 }
 0x771   : > { %v3210_v46 = vpop.permute.xlu1 %3209  ;;  %v3212_v5 = vpop.permute.xlu0 %3211 }
 0x772   : > { %v3216_v51 = vsel %vm3146_vm11, %v3210_v46, %v3212_v5 }
 0x773   : > { %v3221_v4 = vadd.f32 %v3216_v51, %v3190_v24 }
 0x775   : > { %v3214_v44 = vpop.permute.xlu1 %3213  ;;  %v3300_v37 = vpop.permute.xlu0 %3299 }
 0x776   : > { %v3217_v20 = vsel %vm3146_vm11, %v3212_v5, %v3214_v44  ;;  %v3223_v52 = vadd.f32 %v3214_v44, %v3192_v26 }
 0x777   : > { %v3222_v56 = vadd.f32 %v3217_v20, %v3191_v11 }
 0x779   : > { %v3302_v53 = vpop.permute.xlu1 %3301  ;;  %v3390_v39 = vpop.permute.xlu0 %3389 }
 0x77a   : > { %v3304_v12 = vsel %vm3123_vm5, %v3300_v37, %v3302_v53  ;;  %v3395_v46 = vsel %vm3393_vm7, %v3390_v39, %v5027_v3 }
 0x77d   : > { %v3388_v38 = vpop.permute.xlu1 %3387  ;;  %v3243_v16 = vpop.permute.xlu0 %3242 }
 0x77e   : > { %v3394_v31 = vsel %vm3393_vm7, %v3388_v38, %v3390_v39 }
 0x781   : > { %v3241_v13 = vpop.permute.xlu1 %3240  ;;  %v3274_v28 = vpop.permute.xlu0 %3273 }
 0x782   : > { %v3247_v29 = vsel %vm3246_vm6, %v3241_v13, %v3243_v16 }
 0x783   : > { %v3252_v21 = vadd.f32 %v3247_v29, %v3221_v4  ;;  %v4063_v29 = vld [vmem:[%s5257_s18] sm:$0xff]  }
 0x785   : > { %v3245_v55 = vpop.permute.xlu1 %3244  ;;  %v3330_v36 = vpop.permute.xlu0 %3329 }
 0x786   : > { %v3248_v23 = vsel %vm3246_vm6, %v3243_v16, %v3245_v55  ;;  %v3254_v14 = vadd.f32 %v3245_v55, %v3223_v52  ;;  %v3335_v33 = vsel %vm3333_vm14, %v3330_v36, %v5009_v7  ;;  %v3447_v55 = vpack.c.bf16 %v5031_v8, %v5031_v8  ;;  %v3630_v8 = vld [vmem:[%s5258_s19 + $0x10] sm:$0xff] }
 0x787   : > { %v3253_v63 = vadd.f32 %v3248_v23, %v3222_v56 }
 0x789   : > { %v3272_v10 = vpop.permute.xlu1 %3271  ;;  %v3359_v34 = vpop.permute.xlu0 %3358 }
 0x78a   : > { %v3278_v35 = vsel %vm3277_vm13, %v3272_v10, %v3274_v28 }
 0x78b   : > { %v3283_v43 = vadd.f32 %v3278_v35, %v3252_v21  ;;  %v4064_v21 = vld [vmem:[%s5256_s17] sm:$0xff]  }
 0x78d   : > { %v3276_v6 = vpop.permute.xlu1 %3275  ;;  %v3308_v50 = vadd.f32 %v3300_v37, %v3283_v43  ;;  %v3421_v61 = vpop.permute.xlu0 %3420 }
 0x78e   : > { %v3279_v0 = vsel %vm3277_vm13, %v3274_v28, %v3276_v6  ;;  %v3285_v30 = vadd.f32 %v3276_v6, %v3254_v14  ;;  %v3628_v28 = vld [vmem:[%s5258_s19] sm:$0xff] }
 0x78f   : > { %v3284_v27 = vadd.f32 %v3279_v0, %v3253_v63  ;;  %v4065_v63 = vld [vmem:[%s5257_s18 + $0x8] sm:$0xff]  }
 0x790   : > { %v3310_v18 = vadd.f32 %v3302_v53, %v3285_v30 }
 0x791   : > { %v3328_v32 = vpop.permute.xlu1 %3327  ;;  %v3309_v25 = vadd.f32 %v3304_v12, %v3284_v27 }
 0x792   : > { %v3341_v15 = vadd.f32 %v3335_v33, %v3310_v18  ;;  %v3334_v41 = vsel %vm3333_vm14, %v3328_v32, %v3330_v36  ;;  %v3339_v42 = vadd.f32 %v3328_v32, %v3308_v50  ;;  %v4066_v36 = vld [vmem:[%s5256_s17 + $0x8] sm:$0xff]   ;;  %v4067_v50 = vld [vmem:[%s4343_s30] sm:$0xff] }
 0x793   : > { %v3340_v54 = vadd.f32 %v3334_v41, %v3309_v25  ;;  %v3660_v25 = vunpack.c.l.bf16 %v4067_v50 }
 0x794   : > { %v3372_v57 = vadd.f32 %v5016_v22, %v3341_v15 }
 0x795   : > { %v3361_v40 = vpop.permute.xlu1 %3360 }
 0x796   : > { %v3365_v48 = vsel %vm3364_vm0, %v3359_v34, %v3361_v40  ;;  %v3366_v62 = vsel %vm3364_vm0, %v3361_v40, %v5016_v22  ;;  %v3401_v5 = vadd.f32 %v5027_v3, %v3372_v57  ;;  %v3448_v3 = vpack.c.bf16 %v5034_v9, %v5034_v9  ;;  %v3631_v9 = vld [vmem:[%s5258_s19 + $0x18] sm:$0xff]  ;;  %v4068_v57 = vld [vmem:[%s4343_s30 + $0x8] sm:$0xff] }
 0x797   : > { %v3370_v49 = vadd.f32 %v3365_v48, %v3339_v42  ;;  %v3371_v7 = vadd.f32 %v3366_v62, %v3340_v54  ;;  %v3661_v48 = vunpack.c.h.bf16 %v4067_v50 }
 0x799   : > { %v3419_v19 = vpop.permute.xlu1 %3418  ;;  %v3399_v47 = vadd.f32 %v3394_v31, %v3370_v49  ;;  %v3400_v53 = vadd.f32 %v3395_v46, %v3371_v7 }
 0x79a   : > { %v3425_v58 = vsel %vm3424_vm8, %v3419_v19, %v3421_v61 }
 0x79b   : > { %v3430_v17 = vadd.f32 %v3425_v58, %v3399_v47  ;;  %v3663_v58 = vunpack.c.h.bf16 %v4068_v57 }
 0x79d   : > { %v3439_v44 = vadd.f32 %v5022_v59, %v3430_v17  ;;  %v3423_v37 = vpop.permute.xlu1 %3422 }
 0x79e   : > { %v3426_v16 = vsel %vm3424_vm8, %v3421_v61, %v3423_v37  ;;  %v3432_v13 = vadd.f32 %v3423_v37, %v3401_v5  ;;  %v3662_v61 = vunpack.c.l.bf16 %v4068_v57 }
 0x79f   : > { %v3431_v2 = vadd.f32 %v3426_v16, %v3400_v53  ;;  %v3453_v39 = vpack.c.bf16 %v3439_v44, %v3439_v44 }
 0x7a0   : > { %v3441_v38 = vadd.f32 %v5022_v59, %v3432_v13 }
 0x7a1   : > { %v3440_v22 = vadd.f32 %v5022_v59, %v3431_v2  ;;  %v3629_v59 = vld [vmem:[%s5258_s19 + $0x8] sm:$0xff]  ;;  %v3556_v51 = vpop.permute.xlu1 %3555 }
 0x7a2   : > { %v3455_v60 = vpack.c.bf16 %v3441_v38, %v3441_v38 }
 0x7a3   : > { %v3454_v45 = vpack.c.bf16 %v3440_v22, %v3440_v22 }
 0x7a4   : > { %3473 = vrot.lane.b32.xlu0 %v3455_v60, %s4155_s26 }
 0x7a5   : > { %3471 = vrot.lane.b32.xlu1 %v3454_v45, %s4155_s26 }
 0x7a8   : > { %3469 = vrot.lane.b32.xlu0 %v3453_v39, %s4155_s26  ;;  %s620_s26 = sand.u32 1, %s4125_s22  }
 0x7a9   : > { %3559 = vrot.lane.b32.xlu1 %v3448_v3, %s4154_s9  ;;  %s3780_s10 = sshll.u32 %s620_s26, 6  ;;  %s5197_s2 = scalar_lea.sflag [#allocation5], %s620_s26 }
 0x7ac   : > { %3557 = vrot.lane.b32.xlu0 %v3447_v55, %s4154_s9  ;;  %s5174_s9 = scalar_lea.vmem [#allocation4], %s3780_s10  ;;  %s4077_s10 = scalar_lea.vmem %s4076_s23, 2048 }
 0x7ad   : > { %3639 = vperm.xlu1 %4044, %v3629_v59   ;;  %s3714_s25 = sshll.u32 %s5174_s9, 4  ;;  %s5191_s25 = int_to_ptr.vmem [resolvable:$true] %s3714_s25 }
 0x7ae   : > { %s4071_s27 = scalar_lea.vmem %s5191_s25, 1024  ;;  %p4078_p0 = scmp.lt.s32.totalorder %s5191_s25, %s4076_s23 }
 0x7af   : > { %p4072_p11 = scmp.ne.s32.totalorder %s5191_s25, %s4071_s27  ;;  %p4079_p1 = scmp.lt.s32.totalorder %s4077_s10, %s4071_s27 }
 0x7b0   : > { %3634 = vperm.xlu0 %4043, %v3628_v28  }
 0x7b1   : > { %3649 = vperm.xlu1 %4044, %v3631_v9   ;;  %v4069_v9 = vld [vmem:[%s4343_s30 + $0x10] sm:$0xff]  ;;  %p4073_p12 = pnand %p4072_p11, %p4315_p5  ;;  %p4080_p2 = por %p4079_p1, %p4078_p0 }
 0x7b3   : > { %p4074_p13 = pneg %p4073_p12 }
 0x7b4   : > { %3644 = vperm.xlu0 %4043, %v3630_v8   ;;  %v3664_v8 = vunpack.c.l.bf16 %v4069_v9 }
 0x7b5   : > { %p4081_p3 = pnand %p4080_p2, %p4074_p13 }
 0x816   : > { %v3474_v26 = vpop.permute.xlu0 %3473 }
 0x817   : > { %v3472_v20 = vpop.permute.xlu1 %3471 }
 0x818   : > { %v3476_v24 = vsel %vm3175_vm12, %v3472_v20, %v3474_v26 }
 0x819   : > { %3935 = vmatprep.subr.msk.bf16.mxu0 %vm1090_vm9, %v3476_v24 }
 0x81a   : > { %v3470_v11 = vpop.permute.xlu0 %3469 }
 0x81b   : > { %v3475_v10 = vsel %vm3175_vm12, %v3470_v11, %v3472_v20  ;;  %v3560_v23 = vpop.permute.xlu1 %3559 }
 0x81c   : > { %v3484_v52 = vsel %vm1090_vm9, %v3475_v10, 0  ;;  %v3665_v10 = vunpack.c.h.bf16 %v4069_v9 }
 0x81d   : > { %3490 = vmatpush1.bf16.msra.mxu0 %v3484_v52 }
 0x81e   : > { %v3558_v4 = vpop.permute.xlu0 %3557 }
 0x81f   : > { %v3561_v56 = vsel %vm1352_vm15, %v3556_v51, %v3558_v4  ;;  %v3562_v14 = vsel %vm1352_vm15, %v3558_v4, %v3560_v23  ;;  %v4070_v4 = vld [vmem:[%s4343_s30 + $0x18] sm:$0xff] }
 0x820   : > { %v3570_v35 = vsel %vm1090_vm9, %v3561_v56, 0  ;;  %3940 = vmatprep.subr.msk.bf16.mxu1 %vm1090_vm9, %v3562_v14  ;;  %3936 = vmatmul.mubr.msk.bf16.vlgmr.msra.gmra.mrb[52].mxu0 %vm1086_vm10, %v4063_v29  ;;  %v3666_v56 = vunpack.c.l.bf16 %v4070_v4 }
 0x821   : > { %3576 = vmatpush1.bf16.msra.mxu1 %v3570_v35  ;;  %3531 = vmatprep.mubr.bf16.mxu0 %v4135_v1 }
 0x824   : > { %3941 = vmatmul.mubr.msk.bf16.vlgmr.msra.gmra.mrb[52].mxu1 %vm1086_vm10, %v4064_v21  ;;  %v3667_v21 = vunpack.c.h.bf16 %v4070_v4 }
 0x825   : > { %3617 = vmatprep.mubr.bf16.mxu1 %v4135_v1 }
 0x828   : > { %3937 = vmatmul.mubr.msk.bf16.gmra.mrb[56].mxu0 %vm1086_vm10, %v4065_v63 }
 0x82c   : > { %3942 = vmatmul.mubr.msk.bf16.gmra.mrb[56].mxu1 %vm1086_vm10, %v4066_v36  ;;  %v3640_v42 = vpop.permute.xlu1 %3639 }
 0x82f   : > { %v3635_v12 = vpop.permute.xlu0 %3634 }
 0x830   : > { %v3650_v20 = vpop.permute.xlu1 %3649 }
 0x833   : > { %v3645_v60 = vpop.permute.xlu0 %3644 }
 0x8f3   : > { %v3523_v6 = vpop.f32.mrb[52].mxu0 }
 0x8f4   : > { %v3525_v0 = vpop.f32.mrb[53].mxu0 }
 0x8f5   : > { %v3527_v30 = vpop.f32.mrb[54].mxu0 }
 0x8f6   : > { %v3529_v43 = vpop.f32.mrb[55].mxu0 }
 0x8f7   : > { %v3609_v27 = vpop.f32.mrb[52].mxu1 }
 0x8f8   : > { %v3610_v18 = vadd.f32 %v3609_v27, %v3523_v6  ;;  %v3611_v32 = vpop.f32.mrb[53].mxu1 }
 0x8f9   : > { %v3612_v1 = vadd.f32 %v3611_v32, %v3525_v0  ;;  %v3613_v33 = vpop.f32.mrb[54].mxu1 }
 0x8fa   : > { %v3652_v34 = vadd.f32 %v3635_v12, %v3610_v18  ;;  %v3614_v15 = vadd.f32 %v3613_v33, %v3527_v30  ;;  %v3615_v41 = vpop.f32.mrb[55].mxu1 }
 0x8fb   : > { %v3653_v40 = vadd.f32 %v3635_v12, %v3612_v1  ;;  %v3616_v62 = vadd.f32 %v3615_v41, %v3529_v43  ;;  %v3533_v54 = vpop.f32.mrb[56].mxu0 }
 0x8fc   : > { %v3668_v49 = vmul.f32 0.1, %v3652_v34  ;;  %v3654_v31 = vadd.f32 %v3640_v42, %v3614_v15  ;;  %v3535_v7 = vpop.f32.mrb[57].mxu0 }
 0x8fd   : > { %v3669_v19 = vmul.f32 0.1, %v3653_v40  ;;  %v3655_v47 = vadd.f32 %v3640_v42, %v3616_v62  ;;  %v3537_v17 = vpop.f32.mrb[58].mxu0 }
 0x8fe   : > { %v3676_v46 = vadd.f32 %v3668_v49, %v3660_v25  ;;  %v3670_v5 = vmul.f32 0.1, %v3654_v31  ;;  %v3539_v44 = vpop.f32.mrb[59].mxu0 }
 0x8ff   : > { %v3677_v37 = vadd.f32 %v3669_v19, %v3661_v48  ;;  %v3671_v53 = vmul.f32 0.1, %v3655_v47  ;;  %v3619_v16 = vpop.f32.mrb[56].mxu1 }
 0x900   : > { %v3684_v13 = vmax.f32 %v3676_v46, 0.0  ;;  %v3678_v2 = vadd.f32 %v3670_v5, %v3662_v61  ;;  %v3620_v38 = vadd.f32 %v3619_v16, %v3533_v54  ;;  %v3621_v22 = vpop.f32.mrb[57].mxu1 }
 0x901   : > { %v3685_v45 = vmax.f32 %v3677_v37, 0.0  ;;  %v3679_v39 = vadd.f32 %v3671_v53, %v3663_v58  ;;  %v3622_v3 = vadd.f32 %v3621_v22, %v3535_v7  ;;  %v3623_v55 = vpop.f32.mrb[58].mxu1 }
 0x902   : > { %3692 = vst [vmem:[%s5174_s9] sm:$0xff] %v3684_v13  ;;  %v3686_v59 = vmax.f32 %v3678_v2, 0.0  ;;  %v3656_v28 = vadd.f32 %v3645_v60, %v3620_v38  ;;  %v3624_v51 = vadd.f32 %v3623_v55, %v3537_v17  ;;  %v3625_v26 = vpop.f32.mrb[59].mxu1 }
 0x903   : > { %3693 = vst [vmem:[%s5174_s9 + $0x8] sm:$0xff] %v3685_v45  ;;  %v3687_v24 = vmax.f32 %v3679_v39, 0.0  ;;  %v3657_v11 = vadd.f32 %v3645_v60, %v3622_v3  ;;  %v3626_v52 = vadd.f32 %v3625_v26, %v3539_v44 }
 0x904   : > { %3694 = vst [vmem:[%s5174_s9 + $0x10] sm:$0xff] %v3686_v59  ;;  %v3672_v29 = vmul.f32 0.1, %v3656_v28  ;;  %v3658_v23 = vadd.f32 %v3650_v20, %v3624_v51 }
 0x905   : > { %3695 = vst [vmem:[%s5174_s9 + $0x18] sm:$0xff] %v3687_v24  ;;  %v3673_v14 = vmul.f32 0.1, %v3657_v11  ;;  %v3659_v35 = vadd.f32 %v3650_v20, %v3626_v52 }
 0x906   : > { %v3680_v63 = vadd.f32 %v3672_v29, %v3664_v8  ;;  %v3674_v36 = vmul.f32 0.1, %v3658_v23 }
 0x907   : > { %v3681_v6 = vadd.f32 %v3673_v14, %v3665_v10  ;;  %v3675_v0 = vmul.f32 0.1, %v3659_v35 }
 0x908   : > { %v3688_v30 = vmax.f32 %v3680_v63, 0.0  ;;  %v3682_v43 = vadd.f32 %v3674_v36, %v3666_v56 }
 0x909   : > { %v3689_v27 = vmax.f32 %v3681_v6, 0.0  ;;  %v3683_v18 = vadd.f32 %v3675_v0, %v3667_v21 }
 0x90a   : > { %3696 = vst [vmem:[%s5174_s9 + $0x20] sm:$0xff] %v3688_v30  ;;  %v3690_v32 = vmax.f32 %v3682_v43, 0.0 }
 0x90b   : > { %3697 = vst [vmem:[%s5174_s9 + $0x28] sm:$0xff] %v3689_v27  ;;  %v3691_v12 = vmax.f32 %v3683_v18, 0.0 }
 0x90c   : > { %3698 = vst [vmem:[%s5174_s9 + $0x30] sm:$0xff] %v3690_v32 }
 0x90d   : > { %3699 = vst [vmem:[%s5174_s9 + $0x38] sm:$0xff] %v3691_v12 }
 0x90e   : > { %4084 = shalt.err (!%p4081_p3)
}
 0x90f   : > { %s4085_s26 = scalar_lea.hbm %s5188_s0, 1024  ;;  %s4089_s30 = scalar_lea.hbm %s5259_s20, 2048 }
 0x910   : > { %p4086_p4 = scmp.ne.s32.totalorder %s5188_s0, %s4085_s26  ;;  %p4090_p9 = scmp.lt.u32.totalorder %s5188_s0, %s5259_s20 }
 0x911   : > { %p4091_p10 = scmp.lt.u32.totalorder %s4089_s30, %s4085_s26  ;;  %p4093_p12 = scmp.lt.u32.totalorder %s4085_s26, %s5188_s0 }
 0x912   : > { %p4087_p7 = pnand %p4086_p4, %p4315_p5 }
 0x913   : > { %p4092_p11 = por %p4091_p10, %p4090_p9 }
 0x914   : > { %p4088_p8 = pneg %p4087_p7 }
 0x915   : > { %p4094_p13 = por %p4093_p12, %p4092_p11 }
 0x917   : > { %p4095_p0 = pnand %p4094_p13, %p4088_p8 }
 0x919   : > { %4098 = shalt.err (!%p4095_p0)
}
 0x91a   : > { %s4171_s27 = smov 256  }
 0x91b   : > { %3968 = dma.vmem_to_hbm [thread:$0]  (%p4315_p5), %s5191_s25, 1024, %s5188_s0, %s5197_s2, %s4171_s27, %s4171_s27, %s5313_s6  }
 0x91c PF: > { %p3974_p1 = scmp.ge.s32.totalorder %s4133_s24, 2  ;;  %s3729_s23 = sand.u32 1, %s4121_s1  }
 0x91d   : > { %s3730_s10 = scalar_lea.sflag [#allocation5], %s3729_s23 }
 0x91e   : > { %p3971_p2 = pnand %p3974_p1, %p4319_p6 }
 0x920   : > { %4116 = dma.done.wait (!%p3971_p2), %s3730_s10, 1024  }
 0x921   : > { %4118 = vsyncadd (!%p3971_p2), %s3730_s10, 4294966272  ;;  %s5316_s26 = sld [smem:[#allocation7_spill]]  ;;  %s5317_s23 = sld [smem:[#allocation8_spill]] }
 0x922   : > { %p30_p3 = scmp.ge.s32.totalorder %s4302_s3, 4   ;;  %s5318_s1 = smov %s4125_s22 }
 0x923   : > { %s5320_s24 = smov %s4302_s3 }
 0x924   :  { %32 = sbr.rel (!%p30_p3) target bundleno = 13 (0xd), region = 171 }
 0x927   : > { %s5319_s22 = smov %s5316_s26 }
 0x92b   :  { %3735 = vsyncpa [#allocation5], 1 }
 0x92c   :  { %3737 = vsyncpa [#allocation5 + $0x1], 1 }

</bundles_post_ra>
